<compile_context>
chip_gen: v7x
topology: tpu7x:2x2x1
jax: 0.10.0
libtpu: 0.0.40
codegen_flags: <defaults>
</compile_context>

<pallas_src>
import functools

import jax
import jax.numpy as jnp
from jax.experimental import pallas as pl
from jax.experimental.pallas import tpu as pltpu


# ---------------------------------------------------------------------------
# Tiling helpers
# ---------------------------------------------------------------------------
def _round_up(x, m):
    return ((x + m - 1) // m) * m


def _choose_s_tiling(s_total):
    """Lane (batch*spatial) axis: pad to <=512-wide tiles so padding waste stays <512 columns."""
    if s_total <= 512:
        tile = _round_up(s_total, 128)
        return tile, tile
    tile = 512
    return _round_up(s_total, tile), tile


def _choose_k_tiling(k_total, tk_target=2048):
    """Reduction axis tiling so patch/weight blocks stay VMEM-bounded for big C_in."""
    if k_total <= tk_target:
        k_pad = _round_up(k_total, 16)
        return k_pad, k_pad
    return _round_up(k_total, tk_target), tk_target


_VMEM_LIMIT = 48 * 1024 * 1024   # leaves headroom inside v7x's 64 MiB/TC; fine on v5e/v6e


# ---------------------------------------------------------------------------
# Pallas kernel 1: conv-as-GEMM with K-axis accumulation + fused shift/LeakyReLU
# ---------------------------------------------------------------------------
def _conv_gemm_kernel(p_ref, w_ref, sh_ref, o_ref, acc_ref, *, neg_slope, apply_act):
    k = pl.program_id(1)

    @pl.when(k == 0)
    def _():
        acc_ref[...] = jnp.zeros_like(acc_ref)

    acc_ref[...] += jnp.dot(w_ref[...], p_ref[...],
                            preferred_element_type=jnp.float32)

    @pl.when(k == pl.num_programs(1) - 1)
    def _():
        z = acc_ref[...] + sh_ref[...]          # conv bias + BN shift (BN scale folded into W)
        if apply_act:                           # LeakyReLU(0.2)
            z = jnp.where(z > 0, z, neg_slope * z)
        o_ref[...] = z.astype(o_ref.dtype)


def _conv_gemm(patches, w_flat, shift, *, tile, tk, apply_act, out_dtype, neg_slope=0.2):
    """patches: (K_pad, S_pad) bf16, w_flat: (C_pad, K_pad) bf16, shift: (C_pad, 1) f32."""
    K_pad, S_pad = patches.shape
    C_pad = w_flat.shape[0]
    s_tiles = S_pad // tile
    k_tiles = K_pad // tk

    flops = 2 * C_pad * K_pad * S_pad
    bytes_accessed = (K_pad * S_pad * 2                     # patches (bf16)
                      + C_pad * K_pad * 2 * s_tiles         # weights re-read per S tile
                      + C_pad * 4                           # shift
                      + C_pad * S_pad * jnp.dtype(out_dtype).itemsize)

    kernel = functools.partial(_conv_gemm_kernel, neg_slope=neg_slope, apply_act=apply_act)
    return pl.pallas_call(
        kernel,
        out_shape=jax.ShapeDtypeStruct((C_pad, S_pad), out_dtype),
        grid_spec=pltpu.PrefetchScalarGridSpec(
            num_scalar_prefetch=0,
            grid=(s_tiles, k_tiles),                        # reduction axis last
            in_specs=[
                pl.BlockSpec((tk, tile), lambda s, k: (k, s)),     # patch tile (lane-dense)
                pl.BlockSpec((C_pad, tk), lambda s, k: (0, k)),    # weight K-slab
                pl.BlockSpec((C_pad, 1), lambda s, k: (0, 0)),     # per-channel shift
            ],
            out_specs=pl.BlockSpec((C_pad, tile), lambda s, k: (0, s)),
            scratch_shapes=[pltpu.VMEM((C_pad, tile), jnp.float32)],
        ),
        compiler_params=pltpu.CompilerParams(
            dimension_semantics=("parallel", "arbitrary"),
            vmem_limit_bytes=_VMEM_LIMIT),
        cost_estimate=pl.CostEstimate(flops=flops, transcendentals=0,
                                      bytes_accessed=bytes_accessed),
    )(patches, w_flat, shift)


# ---------------------------------------------------------------------------
# Pallas kernel 2: 1-channel head conv as VPU multiply + sublane reduction
# (a padded 8/16-row matmul would leave the MXU ~99% idle)
# ---------------------------------------------------------------------------
def _head_conv_kernel(p_ref, w_ref, sh_ref, o_ref, acc_ref, *, neg_slope, apply_act):
    k = pl.program_id(1)

    @pl.when(k == 0)
    def _():
        acc_ref[...] = jnp.zeros_like(acc_ref)

    prod = p_ref[...].astype(jnp.float32) * w_ref[...].astype(jnp.float32)   # (tk, tile)
    acc_ref[...] += jnp.sum(prod, axis=0, keepdims=True)                     # (1, tile)

    @pl.when(k == pl.num_programs(1) - 1)
    def _():
        z = acc_ref[...] + sh_ref[...]
        if apply_act:
            z = jnp.where(z > 0, z, neg_slope * z)
        o_ref[...] = z.astype(o_ref.dtype)


def _head_conv(patches, w_col, shift, *, tile, tk, apply_act, out_dtype, neg_slope=0.2):
    """patches: (K_pad, S_pad) bf16, w_col: (K_pad, 1) bf16, shift: (1, 1) f32."""
    K_pad, S_pad = patches.shape
    s_tiles = S_pad // tile
    k_tiles = K_pad // tk

    flops = 2 * K_pad * S_pad
    bytes_accessed = K_pad * S_pad * 2 + K_pad * 2 * s_tiles + 4 + S_pad * 4

    kernel = functools.partial(_head_conv_kernel, neg_slope=neg_slope, apply_act=apply_act)
    return pl.pallas_call(
        kernel,
        out_shape=jax.ShapeDtypeStruct((1, S_pad), out_dtype),
        grid_spec=pltpu.PrefetchScalarGridSpec(
            num_scalar_prefetch=0,
            grid=(s_tiles, k_tiles),
            in_specs=[
                pl.BlockSpec((tk, tile), lambda s, k: (k, s)),
                pl.BlockSpec((tk, 1), lambda s, k: (k, 0)),
                pl.BlockSpec((1, 1), lambda s, k: (0, 0)),
            ],
            out_specs=pl.BlockSpec((1, tile), lambda s, k: (0, s)),
            scratch_shapes=[pltpu.VMEM((1, tile), jnp.float32)],
        ),
        compiler_params=pltpu.CompilerParams(
            dimension_semantics=("parallel", "arbitrary"),
            vmem_limit_bytes=_VMEM_LIMIT),
        cost_estimate=pl.CostEstimate(flops=flops, transcendentals=0,
                                      bytes_accessed=bytes_accessed),
    )(patches, w_col, shift)


# ---------------------------------------------------------------------------
# Wrapper-side glue (XLA): channel-major im2col, BN folding, avg-pool downsample
# ---------------------------------------------------------------------------
def _im2col_cnhw(x, k, stride, pad):
    """x: (C, N, H, W) -> patches (C*k*k, N*OH*OW); row index = c*k*k + dh*k + dw."""
    C, N, H, W = x.shape
    xp = jnp.pad(x, ((0, 0), (0, 0), (pad, pad), (pad, pad)))
    OH = (H + 2 * pad - k) // stride + 1
    OW = (W + 2 * pad - k) // stride + 1
    taps = []
    for dh in range(k):
        for dw in range(k):
            taps.append(jax.lax.slice(
                xp, (0, 0, dh, dw),
                (C, N, dh + stride * (OH - 1) + 1, dw + stride * (OW - 1) + 1),
                (1, 1, stride, stride)))                     # (C, N, OH, OW)
    p = jnp.stack(taps, axis=1)                              # (C, k*k, N, OH, OW)
    p = p.reshape(C * k * k, N * OH * OW)                    # channel-major: no transpose needed
    return p, OH, OW


def _conv_block(x_cnhw, w, b, bn, *, stride, apply_act, out_dtype):
    """One layer: Conv2d(k=4, stride, pad=2) [+BatchNorm2d inference] [+LeakyReLU(0.2)].
    Activations travel in (C, N, H, W) layout, so no per-layer transposes."""
    C_in, N, H, W = x_cnhw.shape
    C_out = w.shape[0]
    kw = w.shape[2]

    patches, OH, OW = _im2col_cnhw(x_cnhw, kw, stride, 2)
    K, S_total = patches.shape
    S_pad, tile = _choose_s_tiling(S_total)
    K_pad, tk = _choose_k_tiling(K)

    patches = jnp.pad(patches.astype(jnp.bfloat16),
                      ((0, K_pad - K), (0, S_pad - S_total)))

    # Fold conv bias + BatchNorm (running stats) into per-channel gain (into W) and shift.
    if bn is None:
        gain = jnp.ones((C_out,), jnp.float32)
        shift = b.astype(jnp.float32)
    else:
        gamma, beta, mean, var = bn
        g = (gamma / jnp.sqrt(var + 1e-5)).astype(jnp.float32)
        gain = g
        shift = (g * (b - mean) + beta).astype(jnp.float32)

    w_flat = w.reshape(C_out, K).astype(jnp.float32) * gain[:, None]

    if C_out == 1:
        w_col = jnp.pad(w_flat.reshape(K, 1).astype(jnp.bfloat16), ((0, K_pad - K), (0, 0)))
        out = _head_conv(patches, w_col, shift.reshape(1, 1),
                         tile=tile, tk=tk, apply_act=apply_act, out_dtype=out_dtype)
        out = out[:, :S_total]
    else:
        C_pad = _round_up(C_out, 16)
        w_p = jnp.pad(w_flat, ((0, C_pad - C_out), (0, K_pad - K))).astype(jnp.bfloat16)
        sh_p = jnp.pad(shift, (0, C_pad - C_out))[:, None]
        out = _conv_gemm(patches, w_p, sh_p, tile=tile, tk=tk,
                         apply_act=apply_act, out_dtype=out_dtype)
        out = out[:C_out, :S_total]

    return out.reshape(C_out, N, OH, OW)


def _avg_pool_3x3_s2_p1(x):
    """nn.AvgPool2d(3, stride=2, padding=1, count_include_pad=False)."""
    win, strd = (1, 1, 3, 3), (1, 1, 2, 2)
    padc = ((0, 0), (0, 0), (1, 1), (1, 1))
    s = jax.lax.reduce_window(x, 0.0, jax.lax.add, win, strd, padc)
    c = jax.lax.reduce_window(jnp.ones_like(x), 0.0, jax.lax.add, win, strd, padc)
    return s / c


def _nlayer_forward(x_cnhw, layer_params, strides):
    h = x_cnhw
    last = len(layer_params) - 1
    for idx, (w, b, bn) in enumerate(layer_params):
        is_last = idx == last
        h = _conv_block(h, w, b, bn, stride=strides[idx],
                        apply_act=not is_last,
                        out_dtype=jnp.float32 if is_last else jnp.bfloat16)
    return h


@functools.partial(jax.jit, static_argnames=("n_layers",))
def multiscale_discriminator_forward(x, params, n_layers=3):
    """params: tuple (num_D) of tuples (n_layers+2) of (w, b, bn-or-None)."""
    num_D = len(params)
    strides = (2,) * n_layers + (1, 1)
    results = []
    cur = x                                                   # (N, C, H, W) f32
    for i in range(num_D):
        h = _nlayer_forward(jnp.transpose(cur, (1, 0, 2, 3)),  # -> channel-major once per scale
                            params[num_D - 1 - i], strides)
        results.append(jnp.transpose(h, (1, 0, 2, 3)))         # (N, 1, OH, OW)
        if i != num_D - 1:
            cur = _avg_pool_3x3_s2_p1(cur)
    return tuple(results)


# ---------------------------------------------------------------------------
# Plain-JAX reference (matches the PyTorch forward; BatchNorm in inference mode)
# ---------------------------------------------------------------------------
def _conv_ref(x, w, b, stride):
    y = jax.lax.conv_general_dilated(
        x, w, (stride, stride), ((2, 2), (2, 2)),
        dimension_numbers=("NCHW", "OIHW", "NCHW"),
        precision=jax.lax.Precision.HIGHEST)
    return y + b[None, :, None, None]


def multiscale_discriminator_reference(x, params, n_layers=3):
    num_D = len(params)
    strides = (2,) * n_layers + (1, 1)
    results = []
    cur = x
    for i in range(num_D):
        lp = params[num_D - 1 - i]
        last = len(lp) - 1
        h = cur
        for idx, (w, b, bn) in enumerate(lp):
            h = _conv_ref(h, w, b, strides[idx])
            if bn is not None:
                gamma, beta, mean, var = bn
                inv = gamma / jnp.sqrt(var + 1e-5)
                h = h * inv[None, :, None, None] + (beta - mean * inv)[None, :, None, None]
            if idx != last:
                h = jnp.where(h > 0, h, 0.2 * h)
        results.append(h)
        if i != num_D - 1:
            cur = _avg_pool_3x3_s2_p1(cur)
    return tuple(results)


# ---------------------------------------------------------------------------
# Parameter construction mirroring NLayerDiscriminator(input_nc, ndf, n_layers)
# ---------------------------------------------------------------------------
def _make_nlayer_params(key, input_nc, ndf, n_layers=3):
    channels = [input_nc, ndf]
    nf = ndf
    for _ in range(1, n_layers):
        nf = min(nf * 2, 512)
        channels.append(nf)
    nf = min(nf * 2, 512)
    channels.append(nf)
    channels.append(1)                                   # final 1-channel prediction map

    layers = []
    for idx in range(n_layers + 2):
        cin, cout = channels[idx], channels[idx + 1]
        key, kw, kb, k1, k2, k3, k4 = jax.random.split(key, 7)
        w = (0.5 / (16 * cin) ** 0.5) * jax.random.normal(kw, (cout, cin, 4, 4), jnp.float32)
        b = 0.1 * jax.random.normal(kb, (cout,), jnp.float32)
        has_bn = (idx != 0) and (idx != n_layers + 1)    # norm on all but first & last conv
        if has_bn:
            gamma = 1.0 + 0.1 * jax.random.normal(k1, (cout,), jnp.float32)
            beta = 0.1 * jax.random.normal(k2, (cout,), jnp.float32)
            mean = 0.1 * jax.random.normal(k3, (cout,), jnp.float32)
            var = jax.random.uniform(k4, (cout,), jnp.float32, minval=0.5, maxval=1.5)
            bn = (gamma, beta, mean, var)
        else:
            bn = None
        layers.append((w, b, bn))
    return tuple(layers)


if __name__ == "__main__":
    key = jax.random.PRNGKey(0)
    k_x, k_p = jax.random.split(key)

    N, input_nc, H, W = 2, 3, 32, 32
    ndf, n_layers, num_D = 8, 3, 3

    x = jax.random.normal(k_x, (N, input_nc, H, W), jnp.float32)
    pkeys = jax.random.split(k_p, num_D)
    params = tuple(_make_nlayer_params(pkeys[i], input_nc, ndf, n_layers) for i in range(num_D))

    outs = multiscale_discriminator_forward(x, params, n_layers=n_layers)
    outs = jax.block_until_ready(outs)

    refs = multiscale_discriminator_reference(x, params, n_layers=n_layers)
    assert len(outs) == num_D
    for o, r in zip(outs, refs):
        assert o.shape == r.shape, (o.shape, r.shape)
        err = float(jnp.max(jnp.abs(o - r)))
        assert jnp.allclose(o, r, rtol=2e-2, atol=2e-2), err

    print("KERNEL_OK")
</pallas_src>

<mosaic_0001>
module attributes {stable_mosaic.version = 11 : i64} {
  func.func @_conv_gemm_kernel(%arg0: i32, %arg1: i32, %arg2: memref<48x512xbf16, #tpu.memory_space<vmem>>, %arg3: memref<16x48xbf16, #tpu.memory_space<vmem>>, %arg4: memref<16x1xf32, #tpu.memory_space<vmem>>, %arg5: memref<16x512xbf16, #tpu.memory_space<vmem>>, %arg6: memref<16x512xf32, #tpu.memory_space<vmem>>) attributes {dimension_semantics = [#tpu.dimension_semantics<parallel>, #tpu.dimension_semantics<arbitrary>], iteration_bounds = array<i64: 2, 1>, scalar_prefetch = 0 : i64, scratch_operands = 1 : i64, tpu.core_type = #tpu.core_type<tc>, window_params = [{transform_indices = @transform_0, window_bounds = array<i64: 48, 512>}, {transform_indices = @transform_1, window_bounds = array<i64: 16, 48>}, {pipeline_mode = #tpu.pipeline_mode<synchronous>, transform_indices = @transform_2, window_bounds = array<i64: 16, 1>}, {transform_indices = @transform_3, window_bounds = array<i64: 16, 512>}]} {
    %c0_i32 = arith.constant 0 : i32
    %0 = arith.cmpi eq, %arg1, %c0_i32 : i32
    %1 = arith.extui %0 : i1 to i32
    %c0_i32_0 = arith.constant 0 : i32
    %2 = arith.cmpi ne, %1, %c0_i32_0 : i32
    scf.if %2 {
      %cst_10 = arith.constant 0.000000e+00 : f32
      %12 = vector.broadcast %cst_10 : f32 to vector<16x512xf32>
      %c0_11 = arith.constant 0 : index
      %c0_12 = arith.constant 0 : index
      %13 = vector.load %arg6[%c0_11, %c0_12] : memref<16x512xf32, #tpu.memory_space<vmem>>, vector<16x512xf32>
      tpu.vector_store %arg6[%c0_11, %c0_12], %12 {strides = array<i32>} : memref<16x512xf32, #tpu.memory_space<vmem>>, vector<16x512xf32>,
    } else {
    }
    %c0 = arith.constant 0 : index
    %c0_1 = arith.constant 0 : index
    %3 = vector.load %arg6[%c0, %c0_1] : memref<16x512xf32, #tpu.memory_space<vmem>>, vector<16x512xf32>
    %c0_2 = arith.constant 0 : index
    %c0_3 = arith.constant 0 : index
    %4 = vector.load %arg3[%c0_2, %c0_3] : memref<16x48xbf16, #tpu.memory_space<vmem>>, vector<16x48xbf16>
    %c0_4 = arith.constant 0 : index
    %c0_5 = arith.constant 0 : index
    %5 = vector.load %arg2[%c0_4, %c0_5] : memref<48x512xbf16, #tpu.memory_space<vmem>>, vector<48x512xbf16>
    %cst = arith.constant dense<0.000000e+00> : vector<16x512xf32>
    %6 = tpu.matmul %4, %5, %cst {dimension_numbers = #tpu.dot_dimension_numbers<[1], [0], [0], [1], [0, 0, 1, 1], [], []>} : vector<16x48xbf16>, vector<48x512xbf16>, vector<16x512xf32> -> vector<16x512xf32>
    %7 = arith.addf %3, %6 : vector<16x512xf32>
    %c0_6 = arith.constant 0 : index
    %c0_7 = arith.constant 0 : index
    %8 = vector.load %arg6[%c0_6, %c0_7] : memref<16x512xf32, #tpu.memory_space<vmem>>, vector<16x512xf32>
    tpu.vector_store %arg6[%c0_6, %c0_7], %7 {strides = array<i32>} : memref<16x512xf32, #tpu.memory_space<vmem>>, vector<16x512xf32>,
    %c0_i32_8 = arith.constant 0 : i32
    %9 = arith.cmpi eq, %arg1, %c0_i32_8 : i32
    %10 = arith.extui %9 : i1 to i32
    %c0_i32_9 = arith.constant 0 : i32
    %11 = arith.cmpi ne, %10, %c0_i32_9 : i32
    scf.if %11 {
      %c0_10 = arith.constant 0 : index
      %c0_11 = arith.constant 0 : index
      %12 = vector.load %arg6[%c0_10, %c0_11] : memref<16x512xf32, #tpu.memory_space<vmem>>, vector<16x512xf32>
      %c0_12 = arith.constant 0 : index
      %c0_13 = arith.constant 0 : index
      %13 = vector.load %arg4[%c0_12, %c0_13] : memref<16x1xf32, #tpu.memory_space<vmem>>, vector<16x1xf32>
      %14 = vector.broadcast %13 : vector<16x1xf32> to vector<16x512xf32>
      %15 = arith.addf %12, %14 : vector<16x512xf32>
      %cst_14 = arith.constant 0.000000e+00 : f32
      %16 = vector.broadcast %cst_14 : f32 to vector<16x512xf32>
      %17 = arith.cmpf ogt, %15, %16 : vector<16x512xf32>
      %cst_15 = arith.constant 2.000000e-01 : f32
      %18 = vector.broadcast %cst_15 : f32 to vector<16x512xf32>
      %19 = arith.mulf %18, %15 : vector<16x512xf32>
      %20 = arith.select %17, %15, %19 : vector<16x512xi1>, vector<16x512xf32>
      %21 = arith.truncf %20 : vector<16x512xf32> to vector<16x512xbf16>
      %c0_16 = arith.constant 0 : index
      %c0_17 = arith.constant 0 : index
      %22 = vector.load %arg5[%c0_16, %c0_17] : memref<16x512xbf16, #tpu.memory_space<vmem>>, vector<16x512xbf16>
      tpu.vector_store %arg5[%c0_16, %c0_17], %21 {strides = array<i32>} : memref<16x512xbf16, #tpu.memory_space<vmem>>, vector<16x512xbf16>,
    } else {
    }
    return
  }
  func.func @transform_0(%arg0: i32, %arg1: i32) -> (i32, i32) {
    %c0_i32 = arith.constant 0 : i32
    return %arg1, %arg0 : i32, i32
  }
  func.func @transform_1(%arg0: i32, %arg1: i32) -> (i32, i32) {
    %c0_i32 = arith.constant 0 : i32
    %c0_i32_0 = arith.constant 0 : i32
    return %c0_i32, %arg1 : i32, i32
  }
  func.func @transform_2(%arg0: i32, %arg1: i32) -> (i32, i32) {
    %c0_i32 = arith.constant 0 : i32
    %c0_i32_0 = arith.constant 0 : i32
    %c0_i32_1 = arith.constant 0 : i32
    return %c0_i32, %c0_i32_0 : i32, i32
  }
  func.func @transform_3(%arg0: i32, %arg1: i32) -> (i32, i32) {
    %c0_i32 = arith.constant 0 : i32
    %c0_i32_0 = arith.constant 0 : i32
    return %c0_i32, %arg0 : i32, i32
  }
}

module attributes {stable_mosaic.version = 11 : i64} {
  func.func @_conv_gemm_kernel(%arg0: i32, %arg1: i32, %arg2: memref<128x256xbf16, #tpu.memory_space<vmem>>, %arg3: memref<16x128xbf16, #tpu.memory_space<vmem>>, %arg4: memref<16x1xf32, #tpu.memory_space<vmem>>, %arg5: memref<16x256xbf16, #tpu.memory_space<vmem>>, %arg6: memref<16x256xf32, #tpu.memory_space<vmem>>) attributes {dimension_semantics = [#tpu.dimension_semantics<parallel>, #tpu.dimension_semantics<arbitrary>], iteration_bounds = array<i64: 1, 1>, scalar_prefetch = 0 : i64, scratch_operands = 1 : i64, tpu.core_type = #tpu.core_type<tc>, window_params = [{transform_indices = @transform_0, window_bounds = array<i64: 128, 256>}, {transform_indices = @transform_1, window_bounds = array<i64: 16, 128>}, {pipeline_mode = #tpu.pipeline_mode<synchronous>, transform_indices = @transform_2, window_bounds = array<i64: 16, 1>}, {transform_indices = @transform_3, window_bounds = array<i64: 16, 256>}]} {
    %c0_i32 = arith.constant 0 : i32
    %0 = arith.cmpi eq, %arg1, %c0_i32 : i32
    %1 = arith.extui %0 : i1 to i32
    %c0_i32_0 = arith.constant 0 : i32
    %2 = arith.cmpi ne, %1, %c0_i32_0 : i32
    scf.if %2 {
      %cst_10 = arith.constant 0.000000e+00 : f32
      %12 = vector.broadcast %cst_10 : f32 to vector<16x256xf32>
      %c0_11 = arith.constant 0 : index
      %c0_12 = arith.constant 0 : index
      %13 = vector.load %arg6[%c0_11, %c0_12] : memref<16x256xf32, #tpu.memory_space<vmem>>, vector<16x256xf32>
      tpu.vector_store %arg6[%c0_11, %c0_12], %12 {strides = array<i32>} : memref<16x256xf32, #tpu.memory_space<vmem>>, vector<16x256xf32>,
    } else {
    }
    %c0 = arith.constant 0 : index
    %c0_1 = arith.constant 0 : index
    %3 = vector.load %arg6[%c0, %c0_1] : memref<16x256xf32, #tpu.memory_space<vmem>>, vector<16x256xf32>
    %c0_2 = arith.constant 0 : index
    %c0_3 = arith.constant 0 : index
    %4 = vector.load %arg3[%c0_2, %c0_3] : memref<16x128xbf16, #tpu.memory_space<vmem>>, vector<16x128xbf16>
    %c0_4 = arith.constant 0 : index
    %c0_5 = arith.constant 0 : index
    %5 = vector.load %arg2[%c0_4, %c0_5] : memref<128x256xbf16, #tpu.memory_space<vmem>>, vector<128x256xbf16>
    %cst = arith.constant dense<0.000000e+00> : vector<16x256xf32>
    %6 = tpu.matmul %4, %5, %cst {dimension_numbers = #tpu.dot_dimension_numbers<[1], [0], [0], [1], [0, 0, 1, 1], [], []>} : vector<16x128xbf16>, vector<128x256xbf16>, vector<16x256xf32> -> vector<16x256xf32>
    %7 = arith.addf %3, %6 : vector<16x256xf32>
    %c0_6 = arith.constant 0 : index
    %c0_7 = arith.constant 0 : index
    %8 = vector.load %arg6[%c0_6, %c0_7] : memref<16x256xf32, #tpu.memory_space<vmem>>, vector<16x256xf32>
    tpu.vector_store %arg6[%c0_6, %c0_7], %7 {strides = array<i32>} : memref<16x256xf32, #tpu.memory_space<vmem>>, vector<16x256xf32>,
    %c0_i32_8 = arith.constant 0 : i32
    %9 = arith.cmpi eq, %arg1, %c0_i32_8 : i32
    %10 = arith.extui %9 : i1 to i32
    %c0_i32_9 = arith.constant 0 : i32
    %11 = arith.cmpi ne, %10, %c0_i32_9 : i32
    scf.if %11 {
      %c0_10 = arith.constant 0 : index
      %c0_11 = arith.constant 0 : index
      %12 = vector.load %arg6[%c0_10, %c0_11] : memref<16x256xf32, #tpu.memory_space<vmem>>, vector<16x256xf32>
      %c0_12 = arith.constant 0 : index
      %c0_13 = arith.constant 0 : index
      %13 = vector.load %arg4[%c0_12, %c0_13] : memref<16x1xf32, #tpu.memory_space<vmem>>, vector<16x1xf32>
      %14 = vector.broadcast %13 : vector<16x1xf32> to vector<16x256xf32>
      %15 = arith.addf %12, %14 : vector<16x256xf32>
      %cst_14 = arith.constant 0.000000e+00 : f32
      %16 = vector.broadcast %cst_14 : f32 to vector<16x256xf32>
      %17 = arith.cmpf ogt, %15, %16 : vector<16x256xf32>
      %cst_15 = arith.constant 2.000000e-01 : f32
      %18 = vector.broadcast %cst_15 : f32 to vector<16x256xf32>
      %19 = arith.mulf %18, %15 : vector<16x256xf32>
      %20 = arith.select %17, %15, %19 : vector<16x256xi1>, vector<16x256xf32>
      %21 = arith.truncf %20 : vector<16x256xf32> to vector<16x256xbf16>
      %c0_16 = arith.constant 0 : index
      %c0_17 = arith.constant 0 : index
      %22 = vector.load %arg5[%c0_16, %c0_17] : memref<16x256xbf16, #tpu.memory_space<vmem>>, vector<16x256xbf16>
      tpu.vector_store %arg5[%c0_16, %c0_17], %21 {strides = array<i32>} : memref<16x256xbf16, #tpu.memory_space<vmem>>, vector<16x256xbf16>,
    } else {
    }
    return
  }
  func.func @transform_0(%arg0: i32, %arg1: i32) -> (i32, i32) {
    %c0_i32 = arith.constant 0 : i32
    return %arg1, %arg0 : i32, i32
  }
  func.func @transform_1(%arg0: i32, %arg1: i32) -> (i32, i32) {
    %c0_i32 = arith.constant 0 : i32
    %c0_i32_0 = arith.constant 0 : i32
    return %c0_i32, %arg1 : i32, i32
  }
  func.func @transform_2(%arg0: i32, %arg1: i32) -> (i32, i32) {
    %c0_i32 = arith.constant 0 : i32
    %c0_i32_0 = arith.constant 0 : i32
    %c0_i32_1 = arith.constant 0 : i32
    return %c0_i32, %c0_i32_0 : i32, i32
  }
  func.func @transform_3(%arg0: i32, %arg1: i32) -> (i32, i32) {
    %c0_i32 = arith.constant 0 : i32
    %c0_i32_0 = arith.constant 0 : i32
    return %c0_i32, %arg0 : i32, i32
  }
}

module attributes {stable_mosaic.version = 11 : i64} {
  func.func @_conv_gemm_kernel(%arg0: i32, %arg1: i32, %arg2: memref<256x128xbf16, #tpu.memory_space<vmem>>, %arg3: memref<32x256xbf16, #tpu.memory_space<vmem>>, %arg4: memref<32x1xf32, #tpu.memory_space<vmem>>, %arg5: memref<32x128xbf16, #tpu.memory_space<vmem>>, %arg6: memref<32x128xf32, #tpu.memory_space<vmem>>) attributes {dimension_semantics = [#tpu.dimension_semantics<parallel>, #tpu.dimension_semantics<arbitrary>], iteration_bounds = array<i64: 1, 1>, scalar_prefetch = 0 : i64, scratch_operands = 1 : i64, tpu.core_type = #tpu.core_type<tc>, window_params = [{transform_indices = @transform_0, window_bounds = array<i64: 256, 128>}, {transform_indices = @transform_1, window_bounds = array<i64: 32, 256>}, {pipeline_mode = #tpu.pipeline_mode<synchronous>, transform_indices = @transform_2, window_bounds = array<i64: 32, 1>}, {transform_indices = @transform_3, window_bounds = array<i64: 32, 128>}]} {
    %c0_i32 = arith.constant 0 : i32
    %0 = arith.cmpi eq, %arg1, %c0_i32 : i32
    %1 = arith.extui %0 : i1 to i32
    %c0_i32_0 = arith.constant 0 : i32
    %2 = arith.cmpi ne, %1, %c0_i32_0 : i32
    scf.if %2 {
      %cst_10 = arith.constant 0.000000e+00 : f32
      %12 = vector.broadcast %cst_10 : f32 to vector<32x128xf32>
      %c0_11 = arith.constant 0 : index
      %c0_12 = arith.constant 0 : index
      %13 = vector.load %arg6[%c0_11, %c0_12] : memref<32x128xf32, #tpu.memory_space<vmem>>, vector<32x128xf32>
      tpu.vector_store %arg6[%c0_11, %c0_12], %12 {strides = array<i32>} : memref<32x128xf32, #tpu.memory_space<vmem>>, vector<32x128xf32>,
    } else {
    }
    %c0 = arith.constant 0 : index
    %c0_1 = arith.constant 0 : index
    %3 = vector.load %arg6[%c0, %c0_1] : memref<32x128xf32, #tpu.memory_space<vmem>>, vector<32x128xf32>
    %c0_2 = arith.constant 0 : index
    %c0_3 = arith.constant 0 : index
    %4 = vector.load %arg3[%c0_2, %c0_3] : memref<32x256xbf16, #tpu.memory_space<vmem>>, vector<32x256xbf16>
    %c0_4 = arith.constant 0 : index
    %c0_5 = arith.constant 0 : index
    %5 = vector.load %arg2[%c0_4, %c0_5] : memref<256x128xbf16, #tpu.memory_space<vmem>>, vector<256x128xbf16>
    %cst = arith.constant dense<0.000000e+00> : vector<32x128xf32>
    %6 = tpu.matmul %4, %5, %cst {dimension_numbers = #tpu.dot_dimension_numbers<[1], [0], [0], [1], [0, 0, 1, 1], [], []>} : vector<32x256xbf16>, vector<256x128xbf16>, vector<32x128xf32> -> vector<32x128xf32>
    %7 = arith.addf %3, %6 : vector<32x128xf32>
    %c0_6 = arith.constant 0 : index
    %c0_7 = arith.constant 0 : index
    %8 = vector.load %arg6[%c0_6, %c0_7] : memref<32x128xf32, #tpu.memory_space<vmem>>, vector<32x128xf32>
    tpu.vector_store %arg6[%c0_6, %c0_7], %7 {strides = array<i32>} : memref<32x128xf32, #tpu.memory_space<vmem>>, vector<32x128xf32>,
    %c0_i32_8 = arith.constant 0 : i32
    %9 = arith.cmpi eq, %arg1, %c0_i32_8 : i32
    %10 = arith.extui %9 : i1 to i32
    %c0_i32_9 = arith.constant 0 : i32
    %11 = arith.cmpi ne, %10, %c0_i32_9 : i32
    scf.if %11 {
      %c0_10 = arith.constant 0 : index
      %c0_11 = arith.constant 0 : index
      %12 = vector.load %arg6[%c0_10, %c0_11] : memref<32x128xf32, #tpu.memory_space<vmem>>, vector<32x128xf32>
      %c0_12 = arith.constant 0 : index
      %c0_13 = arith.constant 0 : index
      %13 = vector.load %arg4[%c0_12, %c0_13] : memref<32x1xf32, #tpu.memory_space<vmem>>, vector<32x1xf32>
      %14 = vector.broadcast %13 : vector<32x1xf32> to vector<32x128xf32>
      %15 = arith.addf %12, %14 : vector<32x128xf32>
      %cst_14 = arith.constant 0.000000e+00 : f32
      %16 = vector.broadcast %cst_14 : f32 to vector<32x128xf32>
      %17 = arith.cmpf ogt, %15, %16 : vector<32x128xf32>
      %cst_15 = arith.constant 2.000000e-01 : f32
      %18 = vector.broadcast %cst_15 : f32 to vector<32x128xf32>
      %19 = arith.mulf %18, %15 : vector<32x128xf32>
      %20 = arith.select %17, %15, %19 : vector<32x128xi1>, vector<32x128xf32>
      %21 = arith.truncf %20 : vector<32x128xf32> to vector<32x128xbf16>
      %c0_16 = arith.constant 0 : index
      %c0_17 = arith.constant 0 : index
      %22 = vector.load %arg5[%c0_16, %c0_17] : memref<32x128xbf16, #tpu.memory_space<vmem>>, vector<32x128xbf16>
      tpu.vector_store %arg5[%c0_16, %c0_17], %21 {strides = array<i32>} : memref<32x128xbf16, #tpu.memory_space<vmem>>, vector<32x128xbf16>,
    } else {
    }
    return
  }
  func.func @transform_0(%arg0: i32, %arg1: i32) -> (i32, i32) {
    %c0_i32 = arith.constant 0 : i32
    return %arg1, %arg0 : i32, i32
  }
  func.func @transform_1(%arg0: i32, %arg1: i32) -> (i32, i32) {
    %c0_i32 = arith.constant 0 : i32
    %c0_i32_0 = arith.constant 0 : i32
    return %c0_i32, %arg1 : i32, i32
  }
  func.func @transform_2(%arg0: i32, %arg1: i32) -> (i32, i32) {
    %c0_i32 = arith.constant 0 : i32
    %c0_i32_0 = arith.constant 0 : i32
    %c0_i32_1 = arith.constant 0 : i32
    return %c0_i32, %c0_i32_0 : i32, i32
  }
  func.func @transform_3(%arg0: i32, %arg1: i32) -> (i32, i32) {
    %c0_i32 = arith.constant 0 : i32
    %c0_i32_0 = arith.constant 0 : i32
    return %c0_i32, %arg0 : i32, i32
  }
}

module attributes {stable_mosaic.version = 11 : i64} {
  func.func @_conv_gemm_kernel(%arg0: i32, %arg1: i32, %arg2: memref<512x128xbf16, #tpu.memory_space<vmem>>, %arg3: memref<64x512xbf16, #tpu.memory_space<vmem>>, %arg4: memref<64x1xf32, #tpu.memory_space<vmem>>, %arg5: memref<64x128xbf16, #tpu.memory_space<vmem>>, %arg6: memref<64x128xf32, #tpu.memory_space<vmem>>) attributes {dimension_semantics = [#tpu.dimension_semantics<parallel>, #tpu.dimension_semantics<arbitrary>], iteration_bounds = array<i64: 1, 1>, scalar_prefetch = 0 : i64, scratch_operands = 1 : i64, tpu.core_type = #tpu.core_type<tc>, window_params = [{transform_indices = @transform_0, window_bounds = array<i64: 512, 128>}, {transform_indices = @transform_1, window_bounds = array<i64: 64, 512>}, {pipeline_mode = #tpu.pipeline_mode<synchronous>, transform_indices = @transform_2, window_bounds = array<i64: 64, 1>}, {transform_indices = @transform_3, window_bounds = array<i64: 64, 128>}]} {
    %c0_i32 = arith.constant 0 : i32
    %0 = arith.cmpi eq, %arg1, %c0_i32 : i32
    %1 = arith.extui %0 : i1 to i32
    %c0_i32_0 = arith.constant 0 : i32
    %2 = arith.cmpi ne, %1, %c0_i32_0 : i32
    scf.if %2 {
      %cst_10 = arith.constant 0.000000e+00 : f32
      %12 = vector.broadcast %cst_10 : f32 to vector<64x128xf32>
      %c0_11 = arith.constant 0 : index
      %c0_12 = arith.constant 0 : index
      %13 = vector.load %arg6[%c0_11, %c0_12] : memref<64x128xf32, #tpu.memory_space<vmem>>, vector<64x128xf32>
      tpu.vector_store %arg6[%c0_11, %c0_12], %12 {strides = array<i32>} : memref<64x128xf32, #tpu.memory_space<vmem>>, vector<64x128xf32>,
    } else {
    }
    %c0 = arith.constant 0 : index
    %c0_1 = arith.constant 0 : index
    %3 = vector.load %arg6[%c0, %c0_1] : memref<64x128xf32, #tpu.memory_space<vmem>>, vector<64x128xf32>
    %c0_2 = arith.constant 0 : index
    %c0_3 = arith.constant 0 : index
    %4 = vector.load %arg3[%c0_2, %c0_3] : memref<64x512xbf16, #tpu.memory_space<vmem>>, vector<64x512xbf16>
    %c0_4 = arith.constant 0 : index
    %c0_5 = arith.constant 0 : index
    %5 = vector.load %arg2[%c0_4, %c0_5] : memref<512x128xbf16, #tpu.memory_space<vmem>>, vector<512x128xbf16>
    %cst = arith.constant dense<0.000000e+00> : vector<64x128xf32>
    %6 = tpu.matmul %4, %5, %cst {dimension_numbers = #tpu.dot_dimension_numbers<[1], [0], [0], [1], [0, 0, 1, 1], [], []>} : vector<64x512xbf16>, vector<512x128xbf16>, vector<64x128xf32> -> vector<64x128xf32>
    %7 = arith.addf %3, %6 : vector<64x128xf32>
    %c0_6 = arith.constant 0 : index
    %c0_7 = arith.constant 0 : index
    %8 = vector.load %arg6[%c0_6, %c0_7] : memref<64x128xf32, #tpu.memory_space<vmem>>, vector<64x128xf32>
    tpu.vector_store %arg6[%c0_6, %c0_7], %7 {strides = array<i32>} : memref<64x128xf32, #tpu.memory_space<vmem>>, vector<64x128xf32>,
    %c0_i32_8 = arith.constant 0 : i32
    %9 = arith.cmpi eq, %arg1, %c0_i32_8 : i32
    %10 = arith.extui %9 : i1 to i32
    %c0_i32_9 = arith.constant 0 : i32
    %11 = arith.cmpi ne, %10, %c0_i32_9 : i32
    scf.if %11 {
      %c0_10 = arith.constant 0 : index
      %c0_11 = arith.constant 0 : index
      %12 = vector.load %arg6[%c0_10, %c0_11] : memref<64x128xf32, #tpu.memory_space<vmem>>, vector<64x128xf32>
      %c0_12 = arith.constant 0 : index
      %c0_13 = arith.constant 0 : index
      %13 = vector.load %arg4[%c0_12, %c0_13] : memref<64x1xf32, #tpu.memory_space<vmem>>, vector<64x1xf32>
      %14 = vector.broadcast %13 : vector<64x1xf32> to vector<64x128xf32>
      %15 = arith.addf %12, %14 : vector<64x128xf32>
      %cst_14 = arith.constant 0.000000e+00 : f32
      %16 = vector.broadcast %cst_14 : f32 to vector<64x128xf32>
      %17 = arith.cmpf ogt, %15, %16 : vector<64x128xf32>
      %cst_15 = arith.constant 2.000000e-01 : f32
      %18 = vector.broadcast %cst_15 : f32 to vector<64x128xf32>
      %19 = arith.mulf %18, %15 : vector<64x128xf32>
      %20 = arith.select %17, %15, %19 : vector<64x128xi1>, vector<64x128xf32>
      %21 = arith.truncf %20 : vector<64x128xf32> to vector<64x128xbf16>
      %c0_16 = arith.constant 0 : index
      %c0_17 = arith.constant 0 : index
      %22 = vector.load %arg5[%c0_16, %c0_17] : memref<64x128xbf16, #tpu.memory_space<vmem>>, vector<64x128xbf16>
      tpu.vector_store %arg5[%c0_16, %c0_17], %21 {strides = array<i32>} : memref<64x128xbf16, #tpu.memory_space<vmem>>, vector<64x128xbf16>,
    } else {
    }
    return
  }
  func.func @transform_0(%arg0: i32, %arg1: i32) -> (i32, i32) {
    %c0_i32 = arith.constant 0 : i32
    return %arg1, %arg0 : i32, i32
  }
  func.func @transform_1(%arg0: i32, %arg1: i32) -> (i32, i32) {
    %c0_i32 = arith.constant 0 : i32
    %c0_i32_0 = arith.constant 0 : i32
    return %c0_i32, %arg1 : i32, i32
  }
  func.func @transform_2(%arg0: i32, %arg1: i32) -> (i32, i32) {
    %c0_i32 = arith.constant 0 : i32
    %c0_i32_0 = arith.constant 0 : i32
    %c0_i32_1 = arith.constant 0 : i32
    return %c0_i32, %c0_i32_0 : i32, i32
  }
  func.func @transform_3(%arg0: i32, %arg1: i32) -> (i32, i32) {
    %c0_i32 = arith.constant 0 : i32
    %c0_i32_0 = arith.constant 0 : i32
    return %c0_i32, %arg0 : i32, i32
  }
}

module attributes {stable_mosaic.version = 11 : i64} {
  func.func @_head_conv_kernel(%arg0: i32, %arg1: i32, %arg2: memref<1024x128xbf16, #tpu.memory_space<vmem>>, %arg3: memref<1024x1xbf16, #tpu.memory_space<vmem>>, %arg4: memref<1x1xf32, #tpu.memory_space<vmem>>, %arg5: memref<1x128xf32, #tpu.memory_space<vmem>>, %arg6: memref<1x128xf32, #tpu.memory_space<vmem>>) attributes {dimension_semantics = [#tpu.dimension_semantics<parallel>, #tpu.dimension_semantics<arbitrary>], iteration_bounds = array<i64: 1, 1>, scalar_prefetch = 0 : i64, scratch_operands = 1 : i64, tpu.core_type = #tpu.core_type<tc>, window_params = [{transform_indices = @transform_0, window_bounds = array<i64: 1024, 128>}, {transform_indices = @transform_1, window_bounds = array<i64: 1024, 1>}, {pipeline_mode = #tpu.pipeline_mode<synchronous>, transform_indices = @transform_2, window_bounds = array<i64: 1, 1>}, {transform_indices = @transform_3, window_bounds = array<i64: 1, 128>}]} {
    %c0_i32 = arith.constant 0 : i32
    %0 = arith.cmpi eq, %arg1, %c0_i32 : i32
    %1 = arith.extui %0 : i1 to i32
    %c0_i32_0 = arith.constant 0 : i32
    %2 = arith.cmpi ne, %1, %c0_i32_0 : i32
    scf.if %2 {
      %cst_10 = arith.constant 0.000000e+00 : f32
      %17 = vector.broadcast %cst_10 : f32 to vector<1x128xf32>
      %c0_11 = arith.constant 0 : index
      %c0_12 = arith.constant 0 : index
      %18 = vector.load %arg6[%c0_11, %c0_12] : memref<1x128xf32, #tpu.memory_space<vmem>>, vector<1x128xf32>
      tpu.vector_store %arg6[%c0_11, %c0_12], %17 {strides = array<i32>} : memref<1x128xf32, #tpu.memory_space<vmem>>, vector<1x128xf32>,
    } else {
    }
    %c0 = arith.constant 0 : index
    %c0_1 = arith.constant 0 : index
    %3 = vector.load %arg2[%c0, %c0_1] : memref<1024x128xbf16, #tpu.memory_space<vmem>>, vector<1024x128xbf16>
    %4 = arith.extf %3 : vector<1024x128xbf16> to vector<1024x128xf32>
    %c0_2 = arith.constant 0 : index
    %c0_3 = arith.constant 0 : index
    %5 = vector.load %arg3[%c0_2, %c0_3] : memref<1024x1xbf16, #tpu.memory_space<vmem>>, vector<1024x1xbf16>
    %6 = arith.extf %5 : vector<1024x1xbf16> to vector<1024x1xf32>
    %7 = vector.broadcast %6 : vector<1024x1xf32> to vector<1024x128xf32>
    %8 = arith.mulf %4, %7 : vector<1024x128xf32>
    %c0_4 = arith.constant 0 : index
    %c0_5 = arith.constant 0 : index
    %9 = vector.load %arg6[%c0_4, %c0_5] : memref<1x128xf32, #tpu.memory_space<vmem>>, vector<1x128xf32>
    %cst = arith.constant dense<0.000000e+00> : vector<128xf32>
    %10 = vector.multi_reduction <add>, %8, %cst [0] : vector<1024x128xf32> to vector<128xf32>
    %11 = vector.shape_cast %10 : vector<128xf32> to vector<1x128xf32>
    %12 = arith.addf %9, %11 : vector<1x128xf32>
    %c0_6 = arith.constant 0 : index
    %c0_7 = arith.constant 0 : index
    %13 = vector.load %arg6[%c0_6, %c0_7] : memref<1x128xf32, #tpu.memory_space<vmem>>, vector<1x128xf32>
    tpu.vector_store %arg6[%c0_6, %c0_7], %12 {strides = array<i32>} : memref<1x128xf32, #tpu.memory_space<vmem>>, vector<1x128xf32>,
    %c0_i32_8 = arith.constant 0 : i32
    %14 = arith.cmpi eq, %arg1, %c0_i32_8 : i32
    %15 = arith.extui %14 : i1 to i32
    %c0_i32_9 = arith.constant 0 : i32
    %16 = arith.cmpi ne, %15, %c0_i32_9 : i32
    scf.if %16 {
      %c0_10 = arith.constant 0 : index
      %c0_11 = arith.constant 0 : index
      %17 = vector.load %arg6[%c0_10, %c0_11] : memref<1x128xf32, #tpu.memory_space<vmem>>, vector<1x128xf32>
      %c0_12 = arith.constant 0 : index
      %c0_13 = arith.constant 0 : index
      %18 = vector.load %arg4[%c0_12, %c0_13] : memref<1x1xf32, #tpu.memory_space<vmem>>, vector<1x1xf32>
      %19 = vector.broadcast %18 : vector<1x1xf32> to vector<1x128xf32>
      %20 = arith.addf %17, %19 : vector<1x128xf32>
      %c0_14 = arith.constant 0 : index
      %c0_15 = arith.constant 0 : index
      %21 = vector.load %arg5[%c0_14, %c0_15] : memref<1x128xf32, #tpu.memory_space<vmem>>, vector<1x128xf32>
      tpu.vector_store %arg5[%c0_14, %c0_15], %20 {strides = array<i32>} : memref<1x128xf32, #tpu.memory_space<vmem>>, vector<1x128xf32>,
    } else {
    }
    return
  }
  func.func @transform_0(%arg0: i32, %arg1: i32) -> (i32, i32) {
    %c0_i32 = arith.constant 0 : i32
    return %arg1, %arg0 : i32, i32
  }
  func.func @transform_1(%arg0: i32, %arg1: i32) -> (i32, i32) {
    %c0_i32 = arith.constant 0 : i32
    %c0_i32_0 = arith.constant 0 : i32
    return %arg1, %c0_i32 : i32, i32
  }
  func.func @transform_2(%arg0: i32, %arg1: i32) -> (i32, i32) {
    %c0_i32 = arith.constant 0 : i32
    %c0_i32_0 = arith.constant 0 : i32
    %c0_i32_1 = arith.constant 0 : i32
    return %c0_i32, %c0_i32_0 : i32, i32
  }
  func.func @transform_3(%arg0: i32, %arg1: i32) -> (i32, i32) {
    %c0_i32 = arith.constant 0 : i32
    %c0_i32_0 = arith.constant 0 : i32
    return %c0_i32, %arg0 : i32, i32
  }
}

module attributes {stable_mosaic.version = 11 : i64} {
  func.func @_conv_gemm_kernel(%arg0: i32, %arg1: i32, %arg2: memref<48x256xbf16, #tpu.memory_space<vmem>>, %arg3: memref<16x48xbf16, #tpu.memory_space<vmem>>, %arg4: memref<16x1xf32, #tpu.memory_space<vmem>>, %arg5: memref<16x256xbf16, #tpu.memory_space<vmem>>, %arg6: memref<16x256xf32, #tpu.memory_space<vmem>>) attributes {dimension_semantics = [#tpu.dimension_semantics<parallel>, #tpu.dimension_semantics<arbitrary>], iteration_bounds = array<i64: 1, 1>, scalar_prefetch = 0 : i64, scratch_operands = 1 : i64, tpu.core_type = #tpu.core_type<tc>, window_params = [{transform_indices = @transform_0, window_bounds = array<i64: 48, 256>}, {transform_indices = @transform_1, window_bounds = array<i64: 16, 48>}, {pipeline_mode = #tpu.pipeline_mode<synchronous>, transform_indices = @transform_2, window_bounds = array<i64: 16, 1>}, {transform_indices = @transform_3, window_bounds = array<i64: 16, 256>}]} {
    %c0_i32 = arith.constant 0 : i32
    %0 = arith.cmpi eq, %arg1, %c0_i32 : i32
    %1 = arith.extui %0 : i1 to i32
    %c0_i32_0 = arith.constant 0 : i32
    %2 = arith.cmpi ne, %1, %c0_i32_0 : i32
    scf.if %2 {
      %cst_10 = arith.constant 0.000000e+00 : f32
      %12 = vector.broadcast %cst_10 : f32 to vector<16x256xf32>
      %c0_11 = arith.constant 0 : index
      %c0_12 = arith.constant 0 : index
      %13 = vector.load %arg6[%c0_11, %c0_12] : memref<16x256xf32, #tpu.memory_space<vmem>>, vector<16x256xf32>
      tpu.vector_store %arg6[%c0_11, %c0_12], %12 {strides = array<i32>} : memref<16x256xf32, #tpu.memory_space<vmem>>, vector<16x256xf32>,
    } else {
    }
    %c0 = arith.constant 0 : index
    %c0_1 = arith.constant 0 : index
    %3 = vector.load %arg6[%c0, %c0_1] : memref<16x256xf32, #tpu.memory_space<vmem>>, vector<16x256xf32>
    %c0_2 = arith.constant 0 : index
    %c0_3 = arith.constant 0 : index
    %4 = vector.load %arg3[%c0_2, %c0_3] : memref<16x48xbf16, #tpu.memory_space<vmem>>, vector<16x48xbf16>
    %c0_4 = arith.constant 0 : index
    %c0_5 = arith.constant 0 : index
    %5 = vector.load %arg2[%c0_4, %c0_5] : memref<48x256xbf16, #tpu.memory_space<vmem>>, vector<48x256xbf16>
    %cst = arith.constant dense<0.000000e+00> : vector<16x256xf32>
    %6 = tpu.matmul %4, %5, %cst {dimension_numbers = #tpu.dot_dimension_numbers<[1], [0], [0], [1], [0, 0, 1, 1], [], []>} : vector<16x48xbf16>, vector<48x256xbf16>, vector<16x256xf32> -> vector<16x256xf32>
    %7 = arith.addf %3, %6 : vector<16x256xf32>
    %c0_6 = arith.constant 0 : index
    %c0_7 = arith.constant 0 : index
    %8 = vector.load %arg6[%c0_6, %c0_7] : memref<16x256xf32, #tpu.memory_space<vmem>>, vector<16x256xf32>
    tpu.vector_store %arg6[%c0_6, %c0_7], %7 {strides = array<i32>} : memref<16x256xf32, #tpu.memory_space<vmem>>, vector<16x256xf32>,
    %c0_i32_8 = arith.constant 0 : i32
    %9 = arith.cmpi eq, %arg1, %c0_i32_8 : i32
    %10 = arith.extui %9 : i1 to i32
    %c0_i32_9 = arith.constant 0 : i32
    %11 = arith.cmpi ne, %10, %c0_i32_9 : i32
    scf.if %11 {
      %c0_10 = arith.constant 0 : index
      %c0_11 = arith.constant 0 : index
      %12 = vector.load %arg6[%c0_10, %c0_11] : memref<16x256xf32, #tpu.memory_space<vmem>>, vector<16x256xf32>
      %c0_12 = arith.constant 0 : index
      %c0_13 = arith.constant 0 : index
      %13 = vector.load %arg4[%c0_12, %c0_13] : memref<16x1xf32, #tpu.memory_space<vmem>>, vector<16x1xf32>
      %14 = vector.broadcast %13 : vector<16x1xf32> to vector<16x256xf32>
      %15 = arith.addf %12, %14 : vector<16x256xf32>
      %cst_14 = arith.constant 0.000000e+00 : f32
      %16 = vector.broadcast %cst_14 : f32 to vector<16x256xf32>
      %17 = arith.cmpf ogt, %15, %16 : vector<16x256xf32>
      %cst_15 = arith.constant 2.000000e-01 : f32
      %18 = vector.broadcast %cst_15 : f32 to vector<16x256xf32>
      %19 = arith.mulf %18, %15 : vector<16x256xf32>
      %20 = arith.select %17, %15, %19 : vector<16x256xi1>, vector<16x256xf32>
      %21 = arith.truncf %20 : vector<16x256xf32> to vector<16x256xbf16>
      %c0_16 = arith.constant 0 : index
      %c0_17 = arith.constant 0 : index
      %22 = vector.load %arg5[%c0_16, %c0_17] : memref<16x256xbf16, #tpu.memory_space<vmem>>, vector<16x256xbf16>
      tpu.vector_store %arg5[%c0_16, %c0_17], %21 {strides = array<i32>} : memref<16x256xbf16, #tpu.memory_space<vmem>>, vector<16x256xbf16>,
    } else {
    }
    return
  }
  func.func @transform_0(%arg0: i32, %arg1: i32) -> (i32, i32) {
    %c0_i32 = arith.constant 0 : i32
    return %arg1, %arg0 : i32, i32
  }
  func.func @transform_1(%arg0: i32, %arg1: i32) -> (i32, i32) {
    %c0_i32 = arith.constant 0 : i32
    %c0_i32_0 = arith.constant 0 : i32
    return %c0_i32, %arg1 : i32, i32
  }
  func.func @transform_2(%arg0: i32, %arg1: i32) -> (i32, i32) {
    %c0_i32 = arith.constant 0 : i32
    %c0_i32_0 = arith.constant 0 : i32
    %c0_i32_1 = arith.constant 0 : i32
    return %c0_i32, %c0_i32_0 : i32, i32
  }
  func.func @transform_3(%arg0: i32, %arg1: i32) -> (i32, i32) {
    %c0_i32 = arith.constant 0 : i32
    %c0_i32_0 = arith.constant 0 : i32
    return %c0_i32, %arg0 : i32, i32
  }
}

module attributes {stable_mosaic.version = 11 : i64} {
  func.func @_conv_gemm_kernel(%arg0: i32, %arg1: i32, %arg2: memref<128x128xbf16, #tpu.memory_space<vmem>>, %arg3: memref<16x128xbf16, #tpu.memory_space<vmem>>, %arg4: memref<16x1xf32, #tpu.memory_space<vmem>>, %arg5: memref<16x128xbf16, #tpu.memory_space<vmem>>, %arg6: memref<16x128xf32, #tpu.memory_space<vmem>>) attributes {dimension_semantics = [#tpu.dimension_semantics<parallel>, #tpu.dimension_semantics<arbitrary>], iteration_bounds = array<i64: 1, 1>, scalar_prefetch = 0 : i64, scratch_operands = 1 : i64, tpu.core_type = #tpu.core_type<tc>, window_params = [{transform_indices = @transform_0, window_bounds = array<i64: 128, 128>}, {transform_indices = @transform_1, window_bounds = array<i64: 16, 128>}, {pipeline_mode = #tpu.pipeline_mode<synchronous>, transform_indices = @transform_2, window_bounds = array<i64: 16, 1>}, {transform_indices = @transform_3, window_bounds = array<i64: 16, 128>}]} {
    %c0_i32 = arith.constant 0 : i32
    %0 = arith.cmpi eq, %arg1, %c0_i32 : i32
    %1 = arith.extui %0 : i1 to i32
    %c0_i32_0 = arith.constant 0 : i32
    %2 = arith.cmpi ne, %1, %c0_i32_0 : i32
    scf.if %2 {
      %cst_10 = arith.constant 0.000000e+00 : f32
      %12 = vector.broadcast %cst_10 : f32 to vector<16x128xf32>
      %c0_11 = arith.constant 0 : index
      %c0_12 = arith.constant 0 : index
      %13 = vector.load %arg6[%c0_11, %c0_12] : memref<16x128xf32, #tpu.memory_space<vmem>>, vector<16x128xf32>
      tpu.vector_store %arg6[%c0_11, %c0_12], %12 {strides = array<i32>} : memref<16x128xf32, #tpu.memory_space<vmem>>, vector<16x128xf32>,
    } else {
    }
    %c0 = arith.constant 0 : index
    %c0_1 = arith.constant 0 : index
    %3 = vector.load %arg6[%c0, %c0_1] : memref<16x128xf32, #tpu.memory_space<vmem>>, vector<16x128xf32>
    %c0_2 = arith.constant 0 : index
    %c0_3 = arith.constant 0 : index
    %4 = vector.load %arg3[%c0_2, %c0_3] : memref<16x128xbf16, #tpu.memory_space<vmem>>, vector<16x128xbf16>
    %c0_4 = arith.constant 0 : index
    %c0_5 = arith.constant 0 : index
    %5 = vector.load %arg2[%c0_4, %c0_5] : memref<128x128xbf16, #tpu.memory_space<vmem>>, vector<128x128xbf16>
    %cst = arith.constant dense<0.000000e+00> : vector<16x128xf32>
    %6 = tpu.matmul %4, %5, %cst {dimension_numbers = #tpu.dot_dimension_numbers<[1], [0], [0], [1], [0, 0, 1, 1], [], []>} : vector<16x128xbf16>, vector<128x128xbf16>, vector<16x128xf32> -> vector<16x128xf32>
    %7 = arith.addf %3, %6 : vector<16x128xf32>
    %c0_6 = arith.constant 0 : index
    %c0_7 = arith.constant 0 : index
    %8 = vector.load %arg6[%c0_6, %c0_7] : memref<16x128xf32, #tpu.memory_space<vmem>>, vector<16x128xf32>
    tpu.vector_store %arg6[%c0_6, %c0_7], %7 {strides = array<i32>} : memref<16x128xf32, #tpu.memory_space<vmem>>, vector<16x128xf32>,
    %c0_i32_8 = arith.constant 0 : i32
    %9 = arith.cmpi eq, %arg1, %c0_i32_8 : i32
    %10 = arith.extui %9 : i1 to i32
    %c0_i32_9 = arith.constant 0 : i32
    %11 = arith.cmpi ne, %10, %c0_i32_9 : i32
    scf.if %11 {
      %c0_10 = arith.constant 0 : index
      %c0_11 = arith.constant 0 : index
      %12 = vector.load %arg6[%c0_10, %c0_11] : memref<16x128xf32, #tpu.memory_space<vmem>>, vector<16x128xf32>
      %c0_12 = arith.constant 0 : index
      %c0_13 = arith.constant 0 : index
      %13 = vector.load %arg4[%c0_12, %c0_13] : memref<16x1xf32, #tpu.memory_space<vmem>>, vector<16x1xf32>
      %14 = vector.broadcast %13 : vector<16x1xf32> to vector<16x128xf32>
      %15 = arith.addf %12, %14 : vector<16x128xf32>
      %cst_14 = arith.constant 0.000000e+00 : f32
      %16 = vector.broadcast %cst_14 : f32 to vector<16x128xf32>
      %17 = arith.cmpf ogt, %15, %16 : vector<16x128xf32>
      %cst_15 = arith.constant 2.000000e-01 : f32
      %18 = vector.broadcast %cst_15 : f32 to vector<16x128xf32>
      %19 = arith.mulf %18, %15 : vector<16x128xf32>
      %20 = arith.select %17, %15, %19 : vector<16x128xi1>, vector<16x128xf32>
      %21 = arith.truncf %20 : vector<16x128xf32> to vector<16x128xbf16>
      %c0_16 = arith.constant 0 : index
      %c0_17 = arith.constant 0 : index
      %22 = vector.load %arg5[%c0_16, %c0_17] : memref<16x128xbf16, #tpu.memory_space<vmem>>, vector<16x128xbf16>
      tpu.vector_store %arg5[%c0_16, %c0_17], %21 {strides = array<i32>} : memref<16x128xbf16, #tpu.memory_space<vmem>>, vector<16x128xbf16>,
    } else {
    }
    return
  }
  func.func @transform_0(%arg0: i32, %arg1: i32) -> (i32, i32) {
    %c0_i32 = arith.constant 0 : i32
    return %arg1, %arg0 : i32, i32
  }
  func.func @transform_1(%arg0: i32, %arg1: i32) -> (i32, i32) {
    %c0_i32 = arith.constant 0 : i32
    %c0_i32_0 = arith.constant 0 : i32
    return %c0_i32, %arg1 : i32, i32
  }
  func.func @transform_2(%arg0: i32, %arg1: i32) -> (i32, i32) {
    %c0_i32 = arith.constant 0 : i32
    %c0_i32_0 = arith.constant 0 : i32
    %c0_i32_1 = arith.constant 0 : i32
    return %c0_i32, %c0_i32_0 : i32, i32
  }
  func.func @transform_3(%arg0: i32, %arg1: i32) -> (i32, i32) {
    %c0_i32 = arith.constant 0 : i32
    %c0_i32_0 = arith.constant 0 : i32
    return %c0_i32, %arg0 : i32, i32
  }
}

module attributes {stable_mosaic.version = 11 : i64} {
  func.func @_conv_gemm_kernel(%arg0: i32, %arg1: i32, %arg2: memref<48x128xbf16, #tpu.memory_space<vmem>>, %arg3: memref<16x48xbf16, #tpu.memory_space<vmem>>, %arg4: memref<16x1xf32, #tpu.memory_space<vmem>>, %arg5: memref<16x128xbf16, #tpu.memory_space<vmem>>, %arg6: memref<16x128xf32, #tpu.memory_space<vmem>>) attributes {dimension_semantics = [#tpu.dimension_semantics<parallel>, #tpu.dimension_semantics<arbitrary>], iteration_bounds = array<i64: 1, 1>, scalar_prefetch = 0 : i64, scratch_operands = 1 : i64, tpu.core_type = #tpu.core_type<tc>, window_params = [{transform_indices = @transform_0, window_bounds = array<i64: 48, 128>}, {transform_indices = @transform_1, window_bounds = array<i64: 16, 48>}, {pipeline_mode = #tpu.pipeline_mode<synchronous>, transform_indices = @transform_2, window_bounds = array<i64: 16, 1>}, {transform_indices = @transform_3, window_bounds = array<i64: 16, 128>}]} {
    %c0_i32 = arith.constant 0 : i32
    %0 = arith.cmpi eq, %arg1, %c0_i32 : i32
    %1 = arith.extui %0 : i1 to i32
    %c0_i32_0 = arith.constant 0 : i32
    %2 = arith.cmpi ne, %1, %c0_i32_0 : i32
    scf.if %2 {
      %cst_10 = arith.constant 0.000000e+00 : f32
      %12 = vector.broadcast %cst_10 : f32 to vector<16x128xf32>
      %c0_11 = arith.constant 0 : index
      %c0_12 = arith.constant 0 : index
      %13 = vector.load %arg6[%c0_11, %c0_12] : memref<16x128xf32, #tpu.memory_space<vmem>>, vector<16x128xf32>
      tpu.vector_store %arg6[%c0_11, %c0_12], %12 {strides = array<i32>} : memref<16x128xf32, #tpu.memory_space<vmem>>, vector<16x128xf32>,
    } else {
    }
    %c0 = arith.constant 0 : index
    %c0_1 = arith.constant 0 : index
    %3 = vector.load %arg6[%c0, %c0_1] : memref<16x128xf32, #tpu.memory_space<vmem>>, vector<16x128xf32>
    %c0_2 = arith.constant 0 : index
    %c0_3 = arith.constant 0 : index
    %4 = vector.load %arg3[%c0_2, %c0_3] : memref<16x48xbf16, #tpu.memory_space<vmem>>, vector<16x48xbf16>
    %c0_4 = arith.constant 0 : index
    %c0_5 = arith.constant 0 : index
    %5 = vector.load %arg2[%c0_4, %c0_5] : memref<48x128xbf16, #tpu.memory_space<vmem>>, vector<48x128xbf16>
    %cst = arith.constant dense<0.000000e+00> : vector<16x128xf32>
    %6 = tpu.matmul %4, %5, %cst {dimension_numbers = #tpu.dot_dimension_numbers<[1], [0], [0], [1], [0, 0, 1, 1], [], []>} : vector<16x48xbf16>, vector<48x128xbf16>, vector<16x128xf32> -> vector<16x128xf32>
    %7 = arith.addf %3, %6 : vector<16x128xf32>
    %c0_6 = arith.constant 0 : index
    %c0_7 = arith.constant 0 : index
    %8 = vector.load %arg6[%c0_6, %c0_7] : memref<16x128xf32, #tpu.memory_space<vmem>>, vector<16x128xf32>
    tpu.vector_store %arg6[%c0_6, %c0_7], %7 {strides = array<i32>} : memref<16x128xf32, #tpu.memory_space<vmem>>, vector<16x128xf32>,
    %c0_i32_8 = arith.constant 0 : i32
    %9 = arith.cmpi eq, %arg1, %c0_i32_8 : i32
    %10 = arith.extui %9 : i1 to i32
    %c0_i32_9 = arith.constant 0 : i32
    %11 = arith.cmpi ne, %10, %c0_i32_9 : i32
    scf.if %11 {
      %c0_10 = arith.constant 0 : index
      %c0_11 = arith.constant 0 : index
      %12 = vector.load %arg6[%c0_10, %c0_11] : memref<16x128xf32, #tpu.memory_space<vmem>>, vector<16x128xf32>
      %c0_12 = arith.constant 0 : index
      %c0_13 = arith.constant 0 : index
      %13 = vector.load %arg4[%c0_12, %c0_13] : memref<16x1xf32, #tpu.memory_space<vmem>>, vector<16x1xf32>
      %14 = vector.broadcast %13 : vector<16x1xf32> to vector<16x128xf32>
      %15 = arith.addf %12, %14 : vector<16x128xf32>
      %cst_14 = arith.constant 0.000000e+00 : f32
      %16 = vector.broadcast %cst_14 : f32 to vector<16x128xf32>
      %17 = arith.cmpf ogt, %15, %16 : vector<16x128xf32>
      %cst_15 = arith.constant 2.000000e-01 : f32
      %18 = vector.broadcast %cst_15 : f32 to vector<16x128xf32>
      %19 = arith.mulf %18, %15 : vector<16x128xf32>
      %20 = arith.select %17, %15, %19 : vector<16x128xi1>, vector<16x128xf32>
      %21 = arith.truncf %20 : vector<16x128xf32> to vector<16x128xbf16>
      %c0_16 = arith.constant 0 : index
      %c0_17 = arith.constant 0 : index
      %22 = vector.load %arg5[%c0_16, %c0_17] : memref<16x128xbf16, #tpu.memory_space<vmem>>, vector<16x128xbf16>
      tpu.vector_store %arg5[%c0_16, %c0_17], %21 {strides = array<i32>} : memref<16x128xbf16, #tpu.memory_space<vmem>>, vector<16x128xbf16>,
    } else {
    }
    return
  }
  func.func @transform_0(%arg0: i32, %arg1: i32) -> (i32, i32) {
    %c0_i32 = arith.constant 0 : i32
    return %arg1, %arg0 : i32, i32
  }
  func.func @transform_1(%arg0: i32, %arg1: i32) -> (i32, i32) {
    %c0_i32 = arith.constant 0 : i32
    %c0_i32_0 = arith.constant 0 : i32
    return %c0_i32, %arg1 : i32, i32
  }
  func.func @transform_2(%arg0: i32, %arg1: i32) -> (i32, i32) {
    %c0_i32 = arith.constant 0 : i32
    %c0_i32_0 = arith.constant 0 : i32
    %c0_i32_1 = arith.constant 0 : i32
    return %c0_i32, %c0_i32_0 : i32, i32
  }
  func.func @transform_3(%arg0: i32, %arg1: i32) -> (i32, i32) {
    %c0_i32 = arith.constant 0 : i32
    %c0_i32_0 = arith.constant 0 : i32
    return %c0_i32, %arg0 : i32, i32
  }
}

</mosaic_0001>

<bundles_post_ra>
// kernel: multiscale_discriminator_forward.15
= control target key start
LH: loop header
LB: loop body
LE: loop exit
PB: predicated region body
PF: predicated region fallthrough
CT: control target
= control target key end

     0   :  { %s812_s12 = smov 0   ;;  %s814_s13 = smov 0   ;;  %s900_s0 = inlined_call_operand.vmem [shape: bf16[48,1024], index: 0, kind: input, shape index: {}]   ;;  %s901_s1 = inlined_call_operand.vmem [shape: bf16[16,48], index: 1, kind: input, shape index: {}]   ;;  %s902_s2 = inlined_call_operand.vmem [shape: f32[16,1], index: 2, kind: input, shape index: {}]   ;;  %s903_s3 = inlined_call_operand.vmem [shape: bf16[16,1024], index: 3, kind: output, shape index: {}]  }
   0x1   :  { %s816_s14 = smov 0   ;;  %s818_s15 = smov 0  }
   0x2   :  { %s820_s16 = smov 0  }
   0x3 LB: > { %s25_s17 = sadd.s32 1, %s785_s15  ;;  %s649_s18 = sadd.s32 4294967295, %s789_s16   ;;  %s789_s16 = sphi %s820_s16, %s13_s16   ;;  %s785_s15 = sphi %s818_s15, %s908_s15   ;;  %s781_s14 = sphi %s816_s14, %s907_s14   ;;  %s777_s13 = sphi %s814_s13, %s906_s13   ;;  %s773_s12 = sphi %s812_s12, %s905_s12  }
   0x4   : > { %p27_p0 = scmp.ge.s32.totalorder %s25_s17, 2  ;;  %p41_p1 = scmp.ne.s32.totalorder %s777_s13, %s773_s12 }
   0x5   : > { %p42_p2 = scmp.eq.s32.totalorder %s789_s16, 0  ;;  %p118_p4 = scmp.eq.s32.totalorder %s649_s18, 1 }
   0x6   : > { %s910_s17 = smov (%p27_p0, %s25_s17), 0  ;;  %s34_s20 = sadd.s32 1, %s777_s13 }
   0x7   : > { %p43_p3 = por %p42_p2, %p41_p1  ;;  %s30_s19 = ssub.s32 %s785_s15, %s910_s17 }
   0x8   : > { %p32_p5 = scmp.eq.s32.totalorder %s30_s19, 0  ;;  %p847_p6 = por %p118_p4, %p41_p1 }
   0x9   : > { %p653_p7 = scmp.ge.s32.totalorder %s789_s16, 2 }
   0xa   : > { %s852_s22 = scalar_select %p32_p5, %s777_s13, %s34_s20  }
   0xb   : > { %150 = sbr.rel (%p653_p7) target bundleno = 28 (0x1c), region = 24 }
  0x12   : > { %153 = sbr.rel (!%p43_p3) target bundleno = 28 (0x1c), region = 28  ;;  %s155_s23 = sand.u32 (%p43_p3), 1, %s777_s13  }
  0x13   : > { %s682_s24 = sshll.u32 (%p43_p3), %s785_s15, 4  ;;  %s688_s25 = smul.u32 (%p43_p3), 96, %s155_s23 }
  0x14   : > { %s163_s28 = scalar_lea.vmem (%p43_p3), %s900_s0, %s682_s24 }
  0x15   : > { %v176_v0 = vld [vmem:[%s163_s28] sm:$0xff] (%p43_p3)  ;;  %v178_v1 = vld [vmem:[%s163_s28 + $0x8] sm:$0xff] (%p43_p3)  ;;  %s157_s29 = scalar_lea.vmem (%p43_p3), [#allocation3], %s688_s25 }
  0x16   : > { %v180_v2 = vld [vmem:[%s163_s28 + $0x20] sm:$0xff] (%p43_p3)  ;;  %v182_v3 = vld [vmem:[%s163_s28 + $0x28] sm:$0xff] (%p43_p3)  ;;  %177 = vst [vmem:[%s157_s29] sm:$0xff] (%p43_p3), %v176_v0  ;;  %179 = vst [vmem:[%s157_s29 + $0x8] sm:$0xff] (%p43_p3), %v178_v1 }
  0x17   : > { %v184_v4 = vld [vmem:[%s163_s28 + $0x40] sm:$0xff] (%p43_p3)  ;;  %v186_v5 = vld [vmem:[%s163_s28 + $0x48] sm:$0xff] (%p43_p3)  ;;  %181 = vst [vmem:[%s157_s29 + $0x10] sm:$0xff] (%p43_p3), %v180_v2  ;;  %183 = vst [vmem:[%s157_s29 + $0x18] sm:$0xff] (%p43_p3), %v182_v3 }
  0x18   : > { %185 = vst [vmem:[%s157_s29 + $0x20] sm:$0xff] (%p43_p3), %v184_v4  ;;  %187 = vst [vmem:[%s157_s29 + $0x28] sm:$0xff] (%p43_p3), %v186_v5  ;;  %v188_v6 = vld [vmem:[%s163_s28 + $0x60] sm:$0xff] (%p43_p3)  ;;  %v190_v7 = vld [vmem:[%s163_s28 + $0x68] sm:$0xff] (%p43_p3) }
  0x19   : > { %v192_v8 = vld [vmem:[%s163_s28 + $0x80] sm:$0xff]  ;;  %189 = vst [vmem:[%s157_s29 + $0x30] sm:$0xff] %v188_v6  ;;  %191 = vst [vmem:[%s157_s29 + $0x38] sm:$0xff] %v190_v7  ;;  %v194_v9 = vld [vmem:[%s163_s28 + $0x88] sm:$0xff] }
  0x1a   : > { %193 = vst [vmem:[%s157_s29 + $0x40] sm:$0xff] %v192_v8  ;;  %v196_v10 = vld [vmem:[%s163_s28 + $0xa0] sm:$0xff]  ;;  %v198_v11 = vld [vmem:[%s163_s28 + $0xa8] sm:$0xff]  ;;  %195 = vst [vmem:[%s157_s29 + $0x48] sm:$0xff] %v194_v9 }
  0x1b   : > { %197 = vst [vmem:[%s157_s29 + $0x50] sm:$0xff] %v196_v10  ;;  %199 = vst [vmem:[%s157_s29 + $0x58] sm:$0xff] %v198_v11 }
  0x1c PF: > { %p656_p8 = scmp.ge.s32.totalorder %s789_s16, 1  ;;  %p204_p9 = scmp.lt.s32.totalorder %s789_s16, 3 }
  0x1e   : > { %p205_p10 = pnand %p656_p8, %p204_p9 }
  0x1f   : > { %s211_s30 = sand.u32 (!%p205_p10), 1, %s773_s12   ;;  %v791_v12 = vmov (!%p205_p10), 0   ;;  %v461_v13 = vld [vmem:[%s902_s2] sm:$0xff] (!%p205_p10)  ;;  %v462_v14 = vld [vmem:[%s902_s2 + $0x8] sm:$0xff] (!%p205_p10)  ;;  %vm344_vm0 = vcmask (!%p205_p10), 392192  }
  0x20   : > { %208 = sbr.rel (%p205_p10) target bundleno = 283 (0x11b), region = 51  ;;  %380 = vmatprep.mubr.bf16.mxu0 (!%p205_p10), %v791_v12  ;;  %423 = vmatprep.mubr.bf16.mxu1 (!%p205_p10), %v791_v12  ;;  %v750_v27 = vld [vmem:[%s901_s1] sm:$0xff] (!%p205_p10)   ;;  %s876_s18 = sshll.u32 (!%p205_p10), %s211_s30, 5 }
  0x21   : > { %s689_s4 = smul.u32 (!%p205_p10), 96, %s211_s30  ;;  %731 = vset.pattern.permute.xlu0 (!%p205_p10), %v791_v12  ;;  %s236_s12 = scalar_lea.vmem (!%p205_p10), [#allocation4], %s876_s18 }
  0x22   : > { %465 = vperm.xlu0 (!%p205_p10), %731, %v461_v13  }
  0x23   : > { %s213_s9 = scalar_lea.vmem (!%p205_p10), [#allocation3], %s689_s4 }
  0x24   : > { %v732_v15 = vld [vmem:[%s213_s9 + $0x4] ss:$16 sps:$4 sm:$0xff] (!%p205_p10)   ;;  %v734_v16 = vld [vmem:[%s213_s9 + $0xc] ss:$16 sps:$4 sm:$0xff] (!%p205_p10)   ;;  %v736_v17 = vld [vmem:[%s213_s9] ss:$16 sps:$4 sm:$0xff] (!%p205_p10)  }
  0x25   : > { %348 = vmatprep.subr.bf16.mxu0 (!%p205_p10), %v732_v15  ;;  %v737_v18 = vld [vmem:[%s213_s9 + $0x8] ss:$16 sps:$4 sm:$0xff] (!%p205_p10)   ;;  %391 = vmatprep.subr.bf16.mxu1 (!%p205_p10), %v734_v16  ;;  %v738_v19 = vld [vmem:[%s213_s9 + $0x24] ss:$16 sps:$4 sm:$0xff] (!%p205_p10)   ;;  %v740_v20 = vld [vmem:[%s213_s9 + $0x2c] ss:$16 sps:$4 sm:$0xff] (!%p205_p10)  }
  0x26   : > { %470 = vperm.xlu0 (!%p205_p10), %731, %v462_v14   ;;  %349 = vmatpush1.bf16.msra.mxu0 (!%p205_p10), %v736_v17  ;;  %v742_v21 = vld [vmem:[%s213_s9 + $0x20] ss:$16 sps:$4 sm:$0xff] (!%p205_p10)   ;;  %v743_v22 = vld [vmem:[%s213_s9 + $0x28] ss:$16 sps:$4 sm:$0xff] (!%p205_p10)   ;;  %v744_v23 = vld [vmem:[%s213_s9 + $0x44] ss:$16 sps:$4 sm:$0xff] (!%p205_p10)  }
  0x27   : > { %392 = vmatpush1.bf16.msra.mxu1 %v737_v18  ;;  %350 = vmatprep.subr.bf16.mxu0 %v738_v19  ;;  %v746_v24 = vld [vmem:[%s213_s9 + $0x4c] ss:$16 sps:$4 sm:$0xff]   ;;  %v748_v25 = vld [vmem:[%s213_s9 + $0x40] ss:$16 sps:$4 sm:$0xff]   ;;  %v749_v26 = vld [vmem:[%s213_s9 + $0x48] ss:$16 sps:$4 sm:$0xff]  }
  0x28   : > { %393 = vmatprep.subr.bf16.mxu1 %v740_v20  ;;  %s687_s19 = sshll.u32 (%p847_p6), %s781_s14, 4 }
  0x29   : > { %s542_s24 = scalar_lea.vmem (%p847_p6), %s903_s3, %s687_s19 }
  0x2a   : > { %351 = vmatpush1.bf16.msra.mxu0 %v742_v21 }
  0x2b   : > { %394 = vmatpush1.bf16.msra.mxu1 %v743_v22  ;;  %352 = vmatprep.subr.bf16.mxu0 %v744_v23 }
  0x2c   : > { %395 = vmatprep.subr.bf16.mxu1 %v746_v24 }
  0x2e   : > { %353 = vmatpush1.bf16.msra.mxu0 %v748_v25 }
  0x2f   : > { %396 = vmatpush1.bf16.msra.mxu1 %v749_v26 }
  0x31   : > { %671 = vmatmul.mubr.msk.bf16.vlgmr.msra.gmra.mrb[0].mxu0 %vm344_vm0, %v750_v27 }
  0x32   : > { %672 = vmatmul.mubr.msk.bf16.vlgmr.msra.gmra.mrb[0].mxu1 %vm344_vm0, %v750_v27 }
  0xa1   : > { %v466_v28 = vpop.permute.xlu0 %465 }
  0xa5   : > { %v471_v41 = vpop.permute.xlu0 %470 }
 0x104   : > { %v382_v29 = vpop.f32.mrb[0].mxu0 }
 0x105   : > { %v425_v30 = vpop.f32.mrb[0].mxu1  ;;  %v473_v31 = vadd.f32 %v466_v28, %v382_v29  ;;  %v384_v33 = vpop.f32.mrb[1].mxu0 }
 0x106   : > { %v475_v32 = vadd.f32 %v466_v28, %v425_v30  ;;  %v427_v34 = vpop.f32.mrb[1].mxu1  ;;  %v474_v35 = vadd.f32 %v466_v28, %v384_v33  ;;  %v386_v37 = vpop.f32.mrb[2].mxu0 }
 0x107   : > { %v476_v36 = vadd.f32 %v466_v28, %v427_v34  ;;  %v429_v38 = vpop.f32.mrb[2].mxu1  ;;  %vm481_vm1 = vcmp.gt.f32.partialorder %v473_v31, 0.0  ;;  %v489_v39 = vmul.f32 0.2, %v473_v31  ;;  %v477_v46 = vadd.f32 %v471_v41, %v386_v37  ;;  %v388_v48 = vpop.f32.mrb[3].mxu0 }
 0x108   : > { %vm483_vm2 = vcmp.gt.f32.partialorder %v475_v32, 0.0  ;;  %v491_v40 = vmul.f32 0.2, %v475_v32  ;;  %vm482_vm3 = vcmp.gt.f32.partialorder %v474_v35, 0.0  ;;  %v490_v42 = vmul.f32 0.2, %v474_v35 }
 0x109   : > { %vm484_vm4 = vcmp.gt.f32.partialorder %v476_v36, 0.0  ;;  %v492_v43 = vmul.f32 0.2, %v476_v36  ;;  %v497_v44 = vsel %vm481_vm1, %v473_v31, %v489_v39  ;;  %v479_v47 = vadd.f32 %v471_v41, %v429_v38  ;;  %v431_v49 = vpop.f32.mrb[3].mxu1 }
 0x10a   : > { %v499_v45 = vsel %vm483_vm2, %v475_v32, %v491_v40  ;;  %v498_v50 = vsel %vm482_vm3, %v474_v35, %v490_v42  ;;  %v478_v52 = vadd.f32 %v471_v41, %v388_v48  ;;  %v480_v53 = vadd.f32 %v471_v41, %v431_v49 }
 0x10b   : > { %v500_v51 = vsel %vm484_vm4, %v476_v36, %v492_v43  ;;  %v683_v54 = vpack.c.bf16 %v498_v50, %v497_v44  ;;  %vm485_vm5 = vcmp.gt.f32.partialorder %v477_v46, 0.0  ;;  %v493_v56 = vmul.f32 0.2, %v477_v46 }
 0x10c   : > { %v684_v55 = vpack.c.bf16 %v500_v51, %v499_v45  ;;  %vm487_vm6 = vcmp.gt.f32.partialorder %v479_v47, 0.0  ;;  %v495_v57 = vmul.f32 0.2, %v479_v47  ;;  %vm486_vm7 = vcmp.gt.f32.partialorder %v478_v52, 0.0  ;;  %539 = sbr.rel (!%p847_p6) target bundleno = 283 (0x11b), region = 67 }
 0x10d   : > { %v494_v58 = vmul.f32 0.2, %v478_v52  ;;  %529 = vst [vmem:[%s236_s12] sm:$0xff] %v683_v54  ;;  %v501_v59 = vsel %vm485_vm5, %v477_v46, %v493_v56  ;;  %vm488_vm8 = vcmp.gt.f32.partialorder %v480_v53, 0.0  ;;  %v496_v60 = vmul.f32 0.2, %v480_v53 }
 0x10e   : > { %530 = vst [vmem:[%s236_s12 + $0x8] sm:$0xff] %v684_v55  ;;  %v503_v61 = vsel %vm487_vm6, %v479_v47, %v495_v57 }
 0x10f   : > { %v502_v62 = vsel %vm486_vm7, %v478_v52, %v494_v58  ;;  %v504_v0 = vsel %vm488_vm8, %v480_v53, %v496_v60 }
 0x110   : > { %v685_v63 = vpack.c.bf16 %v502_v62, %v501_v59  ;;  %v686_v1 = vpack.c.bf16 %v504_v0, %v503_v61 }
 0x112   : > { %531 = vst [vmem:[%s236_s12 + $0x10] sm:$0xff] %v685_v63  ;;  %532 = vst [vmem:[%s236_s12 + $0x18] sm:$0xff] %v686_v1 }
 0x114   : > { %v555_v2 = vld [vmem:[%s236_s12] sm:$0xff] }
 0x115   : > { %v557_v3 = vld [vmem:[%s236_s12 + $0x8] sm:$0xff]  ;;  %556 = vst [vmem:[%s542_s24] sm:$0xff] %v555_v2 }
 0x116   : > { %558 = vst [vmem:[%s542_s24 + $0x8] sm:$0xff] %v557_v3 }
 0x119   : > { %v559_v4 = vld [vmem:[%s236_s12 + $0x10] sm:$0xff]  ;;  %v561_v5 = vld [vmem:[%s236_s12 + $0x18] sm:$0xff] }
 0x11a   : > { %560 = vst [vmem:[%s542_s24 + $0x20] sm:$0xff] %v559_v4  ;;  %562 = vst [vmem:[%s542_s24 + $0x28] sm:$0xff] %v561_v5 }
 0x11b PF: > { %s13_s16 = sadd.s32 1, %s789_s16   ;;  %s905_s12 = smov %s777_s13 }
 0x11c   : > { %p10_p11 = scmp.ge.s32.totalorder %s13_s16, 4   ;;  %s906_s13 = smov %s852_s22 }
 0x11d   : > { %s907_s14 = smov %s785_s15  ;;  %s908_s15 = smov %s910_s17 }
 0x11e   :  { %12 = sbr.rel (!%p10_p11) target bundleno = 3 (0x3), region = 124 }

// kernel: multiscale_discriminator_forward.16
= control target key start
LH: loop header
LB: loop body
LE: loop exit
PB: predicated region body
PF: predicated region fallthrough
CT: control target
= control target key end

     0   :  { %v283_v1 = vmov 0   ;;  %s367_s0 = inlined_call_operand.vmem [shape: bf16[128,256], index: 0, kind: input, shape index: {}]   ;;  %s368_s2 = inlined_call_operand.vmem [shape: f32[16,1], index: 2, kind: input, shape index: {}]   ;;  %s369_s1 = inlined_call_operand.vmem [shape: bf16[16,128], index: 1, kind: input, shape index: {}]   ;;  %s370_s3 = inlined_call_operand.vmem [shape: bf16[16,256], index: 3, kind: output, shape index: {}]  }
   0x1   :  { %v258_v0 = vld [vmem:[%s367_s0 + $0x4] ss:$8 sps:$4 sm:$0xff]   ;;  %163 = vmatprep.mubr.bf16.mxu0 %v283_v1  ;;  %257 = vset.pattern.permute.xlu0 %v283_v1  ;;  %v260_v2 = vld [vmem:[%s367_s0] ss:$8 sps:$4 sm:$0xff]   ;;  %v261_v3 = vld [vmem:[%s367_s0 + $0x14] ss:$8 sps:$4 sm:$0xff]  }
   0x2   :  { %131 = vmatprep.subr.bf16.mxu0 %v258_v0  ;;  %v263_v4 = vld [vmem:[%s367_s0 + $0x10] ss:$8 sps:$4 sm:$0xff]   ;;  %v264_v5 = vld [vmem:[%s367_s0 + $0x24] ss:$8 sps:$4 sm:$0xff]   ;;  %v266_v6 = vld [vmem:[%s367_s0 + $0x20] ss:$8 sps:$4 sm:$0xff]  }
   0x3   :  { %132 = vmatpush1.bf16.msra.mxu0 %v260_v2  ;;  %v267_v7 = vld [vmem:[%s367_s0 + $0x34] ss:$8 sps:$4 sm:$0xff]   ;;  %v269_v8 = vld [vmem:[%s367_s0 + $0x30] ss:$8 sps:$4 sm:$0xff]   ;;  %v189_v9 = vld [vmem:[%s368_s2] sm:$0xff] }
   0x4   :  { %133 = vmatprep.subr.bf16.mxu0 %v261_v3  ;;  %v270_v10 = vld [vmem:[%s367_s0 + $0x44] ss:$8 sps:$4 sm:$0xff]   ;;  %193 = vperm.xlu0 %257, %v189_v9   ;;  %v272_v12 = vld [vmem:[%s367_s0 + $0x40] ss:$8 sps:$4 sm:$0xff]   ;;  %v273_v13 = vld [vmem:[%s367_s0 + $0x54] ss:$8 sps:$4 sm:$0xff]  }
   0x5   :  { %v190_v11 = vld [vmem:[%s368_s2 + $0x8] sm:$0xff]  ;;  %v275_v14 = vld [vmem:[%s367_s0 + $0x50] ss:$8 sps:$4 sm:$0xff]   ;;  %v279_v17 = vld [vmem:[%s367_s0 + $0x74] ss:$8 sps:$4 sm:$0xff]  }
   0x6   :  { %v276_v15 = vld [vmem:[%s367_s0 + $0x64] ss:$8 sps:$4 sm:$0xff]   ;;  %v278_v16 = vld [vmem:[%s367_s0 + $0x60] ss:$8 sps:$4 sm:$0xff]   ;;  %v281_v18 = vld [vmem:[%s367_s0 + $0x70] ss:$8 sps:$4 sm:$0xff]  }
   0x7   :  { %134 = vmatpush1.bf16.msra.mxu0 %v263_v4  ;;  %v282_v19 = vld [vmem:[%s369_s1] sm:$0xff]  }
   0x8   :  { %135 = vmatprep.subr.bf16.mxu0 %v264_v5  ;;  %198 = vperm.xlu0 %257, %v190_v11  }
   0xb   :  { %136 = vmatpush1.bf16.msra.mxu0 %v266_v6 }
   0xc   :  { %137 = vmatprep.subr.bf16.mxu0 %v267_v7 }
   0xf   :  { %138 = vmatpush1.bf16.msra.mxu0 %v269_v8 }
  0x10   :  { %139 = vmatprep.subr.bf16.mxu0 %v270_v10 }
  0x13   :  { %140 = vmatpush1.bf16.msra.mxu0 %v272_v12 }
  0x14   :  { %141 = vmatprep.subr.bf16.mxu0 %v273_v13 }
  0x17   :  { %142 = vmatpush1.bf16.msra.mxu0 %v275_v14 }
  0x18   :  { %143 = vmatprep.subr.bf16.mxu0 %v276_v15 }
  0x1b   :  { %144 = vmatpush1.bf16.msra.mxu0 %v278_v16 }
  0x1c   :  { %145 = vmatprep.subr.bf16.mxu0 %v279_v17 }
  0x1f   :  { %146 = vmatpush1.bf16.msra.mxu0 %v281_v18 }
  0x22   :  { %164 = vmatmul.mubr.bf16.vlgmr.msra.gmra.mrb[0].mxu0 %v282_v19 }
  0x83   :  { %v194_v20 = vpop.permute.xlu0 %193 }
  0x87   :  { %v199_v24 = vpop.permute.xlu0 %198 }
  0xf5   :  { %v165_v21 = vpop.f32.mrb[0].mxu0 }
  0xf6   :  { %v201_v22 = vadd.f32 %v194_v20, %v165_v21  ;;  %v167_v23 = vpop.f32.mrb[1].mxu0 }
  0xf7   :  { %v202_v25 = vadd.f32 %v194_v20, %v167_v23  ;;  %v169_v26 = vpop.f32.mrb[2].mxu0 }
  0xf8   :  { %vm205_vm0 = vcmp.gt.f32.partialorder %v201_v22, 0.0  ;;  %v209_v27 = vmul.f32 0.2, %v201_v22  ;;  %v203_v28 = vadd.f32 %v199_v24, %v169_v26  ;;  %v171_v29 = vpop.f32.mrb[3].mxu0 }
  0xf9   :  { %vm206_vm1 = vcmp.gt.f32.partialorder %v202_v25, 0.0  ;;  %v210_v30 = vmul.f32 0.2, %v202_v25  ;;  %v204_v31 = vadd.f32 %v199_v24, %v171_v29 }
  0xfa   :  { %v213_v32 = vsel %vm205_vm0, %v201_v22, %v209_v27  ;;  %vm207_vm2 = vcmp.gt.f32.partialorder %v203_v28, 0.0  ;;  %v211_v33 = vmul.f32 0.2, %v203_v28 }
  0xfb   :  { %v214_v34 = vsel %vm206_vm1, %v202_v25, %v210_v30  ;;  %vm208_vm3 = vcmp.gt.f32.partialorder %v204_v31, 0.0  ;;  %v212_v35 = vmul.f32 0.2, %v204_v31 }
  0xfc   :  { %v254_v36 = vpack.c.bf16 %v214_v34, %v213_v32  ;;  %v215_v37 = vsel %vm207_vm2, %v203_v28, %v211_v33 }
  0xfd   :  { %v216_v38 = vsel %vm208_vm3, %v204_v31, %v212_v35 }
  0xfe   :  { %229 = vst [vmem:[%s370_s3] sm:$0xff] %v254_v36  ;;  %v255_v39 = vpack.c.bf16 %v216_v38, %v215_v37 }
 0x100   :  { %230 = vst [vmem:[%s370_s3 + $0x8] sm:$0xff] %v255_v39 }

// kernel: multiscale_discriminator_forward.17
= control target key start
LH: loop header
LB: loop body
LE: loop exit
PB: predicated region body
PF: predicated region fallthrough
CT: control target
= control target key end

     0   :  { %v415_v1 = vmov 0   ;;  %s514_s0 = inlined_call_operand.vmem [shape: bf16[256,128], index: 0, kind: input, shape index: {}]   ;;  %s515_s1 = inlined_call_operand.vmem [shape: bf16[32,256], index: 1, kind: input, shape index: {}]   ;;  %s516_s2 = inlined_call_operand.vmem [shape: f32[32,1], index: 2, kind: input, shape index: {}]   ;;  %s517_s3 = inlined_call_operand.vmem [shape: bf16[32,128], index: 3, kind: output, shape index: {}]  }
   0x1   :  { %v393_v0 = vld [vmem:[%s514_s0 + $0x40] sm:$0xff]   ;;  %392 = vset.pattern.permute.xlu1 %v415_v1  ;;  %391 = vset.pattern.permute.xlu0 %v415_v1  ;;  %v395_v3 = vld [vmem:[%s514_s0 + $0x48] sm:$0xff]   ;;  %v397_v5 = vld [vmem:[%s514_s0 + $0x50] sm:$0xff]  }
   0x2   :  { %v394_v2 = vld [vmem:[%s514_s0] sm:$0xff]   ;;  %346 = vmatprep.subr.bf16.mxu0 %v393_v0  ;;  %374 = vmatprep.subr.bf16.mxu1 %v393_v0  ;;  %v396_v4 = vld [vmem:[%s514_s0 + $0x8] sm:$0xff]   ;;  %v398_v6 = vld [vmem:[%s514_s0 + $0x10] sm:$0xff]  }
   0x3   :  { %347 = vmatpush3.bf16.msra.mxu0 %v394_v2  ;;  %382 = vmatpush3.bf16.msra.mxu1 %v394_v2  ;;  %v399_v7 = vld [vmem:[%s514_s0 + $0x58] sm:$0xff]   ;;  %v401_v9 = vld [vmem:[%s514_s0 + $0x60] sm:$0xff]   ;;  %v403_v11 = vld [vmem:[%s514_s0 + $0x68] sm:$0xff]  }
   0x4   :  { %348 = vmatprep.subr.bf16.mxu0 %v395_v3  ;;  %375 = vmatprep.subr.bf16.mxu1 %v395_v3  ;;  %v400_v8 = vld [vmem:[%s514_s0 + $0x18] sm:$0xff]   ;;  %v402_v10 = vld [vmem:[%s514_s0 + $0x20] sm:$0xff]   ;;  %v404_v14 = vld [vmem:[%s514_s0 + $0x28] sm:$0xff]  }
   0x5   :  { %v411_v12 = vld [vmem:[%s515_s1 + $0x4] ss:$8 sps:$4 sm:$0xff]   ;;  %v414_v13 = vld [vmem:[%s515_s1 + $0x14] ss:$8 sps:$4 sm:$0xff]   ;;  %v409_v23 = vld [vmem:[%s515_s1] ss:$8 sps:$4 sm:$0xff]  }
   0x6   :  { %v245_v15 = vld [vmem:[%s516_s2 + $0x10] sm:$0xff]  ;;  %v243_v16 = vld [vmem:[%s516_s2] sm:$0xff]  ;;  %211 = vmatprep.mubr.bf16.mxu0 %v411_v12  ;;  %219 = vmatprep.mubr.bf16.mxu1 %v414_v13  ;;  %v246_v19 = vld [vmem:[%s516_s2 + $0x18] sm:$0xff] }
   0x7   :  { %349 = vmatpush3.bf16.msra.mxu0 %v396_v4  ;;  %383 = vmatpush3.bf16.msra.mxu1 %v396_v4  ;;  %v405_v17 = vld [vmem:[%s514_s0 + $0x70] sm:$0xff]   ;;  %v244_v20 = vld [vmem:[%s516_s2 + $0x8] sm:$0xff]  ;;  %v407_v21 = vld [vmem:[%s514_s0 + $0x78] sm:$0xff]  }
   0x8   :  { %350 = vmatprep.subr.bf16.mxu0 %v397_v5  ;;  %376 = vmatprep.subr.bf16.mxu1 %v397_v5  ;;  %v406_v18 = vld [vmem:[%s514_s0 + $0x30] sm:$0xff]   ;;  %v408_v22 = vld [vmem:[%s514_s0 + $0x38] sm:$0xff]  }
   0x9   :  { %259 = vperm.xlu1 %392, %v245_v15   ;;  %249 = vperm.xlu0 %391, %v243_v16   ;;  %v412_v24 = vld [vmem:[%s515_s1 + $0x10] ss:$8 sps:$4 sm:$0xff]  }
   0xb   :  { %351 = vmatpush3.bf16.msra.mxu0 %v398_v6  ;;  %384 = vmatpush3.bf16.msra.mxu1 %v398_v6 }
   0xc   :  { %352 = vmatprep.subr.bf16.mxu0 %v399_v7  ;;  %377 = vmatprep.subr.bf16.mxu1 %v399_v7 }
   0xd   :  { %264 = vperm.xlu1 %392, %v246_v19   ;;  %254 = vperm.xlu0 %391, %v244_v20  }
   0xf   :  { %353 = vmatpush3.bf16.msra.mxu0 %v400_v8  ;;  %385 = vmatpush3.bf16.msra.mxu1 %v400_v8 }
  0x10   :  { %354 = vmatprep.subr.bf16.mxu0 %v401_v9  ;;  %378 = vmatprep.subr.bf16.mxu1 %v401_v9 }
  0x13   :  { %355 = vmatpush3.bf16.msra.mxu0 %v402_v10  ;;  %386 = vmatpush3.bf16.msra.mxu1 %v402_v10 }
  0x14   :  { %356 = vmatprep.subr.bf16.mxu0 %v403_v11  ;;  %379 = vmatprep.subr.bf16.mxu1 %v403_v11 }
  0x17   :  { %357 = vmatpush3.bf16.msra.mxu0 %v404_v14  ;;  %387 = vmatpush3.bf16.msra.mxu1 %v404_v14 }
  0x18   :  { %358 = vmatprep.subr.bf16.mxu0 %v405_v17  ;;  %380 = vmatprep.subr.bf16.mxu1 %v405_v17 }
  0x1b   :  { %359 = vmatpush3.bf16.msra.mxu0 %v406_v18  ;;  %388 = vmatpush3.bf16.msra.mxu1 %v406_v18 }
  0x1c   :  { %360 = vmatprep.subr.bf16.mxu0 %v407_v21  ;;  %381 = vmatprep.subr.bf16.mxu1 %v407_v21 }
  0x1f   :  { %361 = vmatpush3.bf16.msra.mxu0 %v408_v22  ;;  %389 = vmatpush3.bf16.msra.mxu1 %v408_v22 }
  0x22   :  { %212 = vmatmul.mubr.bf16.vlgmr.msra.gmra.mrb[0].mxu0 %v409_v23  ;;  %220 = vmatmul.mubr.bf16.vlgmr.msra.gmra.mrb[0].mxu1 %v412_v24 }
  0x88   :  { %v260_v25 = vpop.permute.xlu1 %259  ;;  %v250_v26 = vpop.permute.xlu0 %249 }
  0x8c   :  { %v265_v41 = vpop.permute.xlu1 %264  ;;  %v255_v42 = vpop.permute.xlu0 %254 }
  0xf5   :  { %v362_v27 = vpop.f32.mrb[0].mxu0  ;;  %v368_v28 = vpop.f32.mrb[0].mxu1 }
  0xf6   :  { %v363_v29 = vpop.f32.mrb[1].mxu0  ;;  %v369_v30 = vpop.f32.mrb[1].mxu1 }
  0xf7   :  { %v364_v31 = vadd.f32 %v363_v29, %v362_v27  ;;  %v370_v32 = vadd.f32 %v369_v30, %v368_v28  ;;  %v365_v33 = vpop.f32.mrb[2].mxu0  ;;  %v371_v34 = vpop.f32.mrb[2].mxu1 }
  0xf8   :  { %v366_v35 = vpop.f32.mrb[3].mxu0  ;;  %v372_v36 = vpop.f32.mrb[3].mxu1 }
  0xf9   :  { %v267_v37 = vadd.f32 %v364_v31, %v250_v26  ;;  %v269_v38 = vadd.f32 %v370_v32, %v260_v25  ;;  %v367_v39 = vadd.f32 %v366_v35, %v365_v33  ;;  %v373_v40 = vadd.f32 %v372_v36, %v371_v34 }
  0xfb   :  { %v275_v43 = vmul.f32 0.2, %v267_v37  ;;  %v277_v44 = vmul.f32 0.2, %v269_v38  ;;  %v268_v45 = vadd.f32 %v367_v39, %v255_v42  ;;  %v270_v46 = vadd.f32 %v373_v40, %v265_v41 }
  0xfc   :  { %vm271_vm0 = vcmp.gt.f32.partialorder %v267_v37, 0.0  ;;  %vm273_vm1 = vcmp.gt.f32.partialorder %v269_v38, 0.0 }
  0xfd   :  { %vm272_vm2 = vcmp.gt.f32.partialorder %v268_v45, 0.0  ;;  %v276_v47 = vmul.f32 0.2, %v268_v45  ;;  %vm274_vm3 = vcmp.gt.f32.partialorder %v270_v46, 0.0  ;;  %v278_v48 = vmul.f32 0.2, %v270_v46 }
  0xfe   :  { %v279_v49 = vsel %vm271_vm0, %v267_v37, %v275_v43  ;;  %v281_v50 = vsel %vm273_vm1, %v269_v38, %v277_v44 }
  0xff   :  { %v280_v51 = vsel %vm272_vm2, %v268_v45, %v276_v47  ;;  %v282_v52 = vsel %vm274_vm3, %v270_v46, %v278_v48 }
 0x100   :  { %v338_v53 = vpack.c.bf16 %v280_v51, %v279_v49  ;;  %v343_v54 = vpack.c.bf16 %v282_v52, %v281_v50 }
 0x102   :  { %339 = vst [vmem:[%s517_s3] sm:$0xff] %v338_v53   ;;  %345 = vst [vmem:[%s517_s3 + $0x8] sm:$0xff] %v343_v54  }

// kernel: multiscale_discriminator_forward.18
= control target key start
LH: loop header
LB: loop body
LE: loop exit
PB: predicated region body
PF: predicated region fallthrough
CT: control target
= control target key end

     0   :  { %v894_v1 = vmov 0   ;;  %s1095_s0 = inlined_call_operand.vmem [shape: bf16[512,128], index: 0, kind: input, shape index: {}]   ;;  %s1096_s1 = inlined_call_operand.vmem [shape: bf16[64,512], index: 1, kind: input, shape index: {}]   ;;  %s1097_s2 = inlined_call_operand.vmem [shape: f32[64,1], index: 2, kind: input, shape index: {}]   ;;  %s1098_s3 = inlined_call_operand.vmem [shape: bf16[64,128], index: 3, kind: output, shape index: {}]  }
   0x1   :  { %v838_v0 = vld [vmem:[%s1095_s0 + $0x40] sm:$0xff]   ;;  %836 = vset.pattern.permute.xlu0 %v894_v1  ;;  %837 = vset.pattern.permute.xlu1 %v894_v1  ;;  %v842_v5 = vld [vmem:[%s1095_s0 + $0x48] sm:$0xff]   ;;  %v846_v9 = vld [vmem:[%s1095_s0 + $0x50] sm:$0xff]  }
   0x2   :  { %v839_v2 = vld [vmem:[%s1095_s0 + $0xc0] sm:$0xff]   ;;  %755 = vmatprep.subr.bf16.mxu0 %v838_v0  ;;  %v843_v6 = vld [vmem:[%s1095_s0 + $0xc8] sm:$0xff]   ;;  %v847_v10 = vld [vmem:[%s1095_s0 + $0xd0] sm:$0xff]  }
   0x3   :  { %v840_v3 = vld [vmem:[%s1095_s0] sm:$0xff]   ;;  %795 = vmatprep.subr.bf16.mxu1 %v839_v2  ;;  %v844_v7 = vld [vmem:[%s1095_s0 + $0x8] sm:$0xff]   ;;  %v848_v11 = vld [vmem:[%s1095_s0 + $0x10] sm:$0xff]  }
   0x4   :  { %v841_v4 = vld [vmem:[%s1095_s0 + $0x80] sm:$0xff]   ;;  %756 = vmatpush3.bf16.msra.mxu0 %v840_v3  ;;  %v845_v8 = vld [vmem:[%s1095_s0 + $0x88] sm:$0xff]   ;;  %v849_v12 = vld [vmem:[%s1095_s0 + $0x90] sm:$0xff]  }
   0x5   :  { %796 = vmatpush3.bf16.msra.mxu1 %v841_v4  ;;  %757 = vmatprep.subr.bf16.mxu0 %v842_v5  ;;  %v850_v13 = vld [vmem:[%s1095_s0 + $0x58] sm:$0xff]   ;;  %v854_v17 = vld [vmem:[%s1095_s0 + $0x60] sm:$0xff]   ;;  %v858_v21 = vld [vmem:[%s1095_s0 + $0x68] sm:$0xff]  }
   0x6   :  { %797 = vmatprep.subr.bf16.mxu1 %v843_v6  ;;  %v851_v14 = vld [vmem:[%s1095_s0 + $0xd8] sm:$0xff]   ;;  %v855_v18 = vld [vmem:[%s1095_s0 + $0xe0] sm:$0xff]   ;;  %v859_v22 = vld [vmem:[%s1095_s0 + $0xe8] sm:$0xff]  }
   0x7   :  { %v852_v15 = vld [vmem:[%s1095_s0 + $0x18] sm:$0xff]   ;;  %v856_v19 = vld [vmem:[%s1095_s0 + $0x20] sm:$0xff]   ;;  %v860_v23 = vld [vmem:[%s1095_s0 + $0x28] sm:$0xff]  }
   0x8   :  { %758 = vmatpush3.bf16.msra.mxu0 %v844_v7  ;;  %v853_v16 = vld [vmem:[%s1095_s0 + $0x98] sm:$0xff]   ;;  %v857_v20 = vld [vmem:[%s1095_s0 + $0xa0] sm:$0xff]   ;;  %v861_v24 = vld [vmem:[%s1095_s0 + $0xa8] sm:$0xff]  }
   0x9   :  { %798 = vmatpush3.bf16.msra.mxu1 %v845_v8  ;;  %759 = vmatprep.subr.bf16.mxu0 %v846_v9  ;;  %v862_v25 = vld [vmem:[%s1095_s0 + $0x70] sm:$0xff]   ;;  %v866_v29 = vld [vmem:[%s1095_s0 + $0x78] sm:$0xff]   ;;  %v544_v43 = vld [vmem:[%s1097_s2] sm:$0xff] }
   0xa   :  { %799 = vmatprep.subr.bf16.mxu1 %v847_v10  ;;  %v863_v26 = vld [vmem:[%s1095_s0 + $0xf0] sm:$0xff]   ;;  %v867_v30 = vld [vmem:[%s1095_s0 + $0xf8] sm:$0xff]   ;;  %554 = vperm.xlu0 %836, %v544_v43   ;;  %v545_v45 = vld [vmem:[%s1097_s2 + $0x8] sm:$0xff] }
   0xb   :  { %v864_v27 = vld [vmem:[%s1095_s0 + $0x30] sm:$0xff]   ;;  %v868_v31 = vld [vmem:[%s1095_s0 + $0x38] sm:$0xff]   ;;  %v548_v48 = vld [vmem:[%s1097_s2 + $0x20] sm:$0xff] }
   0xc   :  { %760 = vmatpush3.bf16.msra.mxu0 %v848_v11  ;;  %v865_v28 = vld [vmem:[%s1095_s0 + $0xb0] sm:$0xff]   ;;  %v869_v32 = vld [vmem:[%s1095_s0 + $0xb8] sm:$0xff]   ;;  %v549_v51 = vld [vmem:[%s1097_s2 + $0x28] sm:$0xff] }
   0xd   :  { %800 = vmatpush3.bf16.msra.mxu1 %v849_v12  ;;  %761 = vmatprep.subr.bf16.mxu0 %v850_v13  ;;  %v870_v33 = vld [vmem:[%s1096_s1] ss:$16 sps:$4 sm:$0xff]   ;;  %v872_v34 = vld [vmem:[%s1096_s1 + $0x4] ss:$16 sps:$4 sm:$0xff]   ;;  %v873_v35 = vld [vmem:[%s1096_s1 + $0x8] ss:$16 sps:$4 sm:$0xff]  }
   0xe   :  { %801 = vmatprep.subr.bf16.mxu1 %v851_v14  ;;  %v875_v36 = vld [vmem:[%s1096_s1 + $0xc] ss:$16 sps:$4 sm:$0xff]   ;;  %419 = vmatprep.mubr.bf16.mxu0 %v872_v34  ;;  %v876_v37 = vld [vmem:[%s1096_s1 + $0x24] ss:$16 sps:$4 sm:$0xff]   ;;  %v880_v39 = vld [vmem:[%s1096_s1 + $0x20] ss:$16 sps:$4 sm:$0xff]  }
   0xf   :  { %484 = vmatprep.mubr.bf16.mxu1 %v875_v36  ;;  %v878_v38 = vld [vmem:[%s1096_s1 + $0x2c] ss:$16 sps:$4 sm:$0xff]   ;;  %v881_v40 = vld [vmem:[%s1096_s1 + $0x28] ss:$16 sps:$4 sm:$0xff]   ;;  %v882_v41 = vld [vmem:[%s1096_s1 + $0x44] ss:$16 sps:$4 sm:$0xff]   ;;  %559 = vperm.xlu0 %836, %v545_v45  }
  0x10   :  { %762 = vmatpush3.bf16.msra.mxu0 %v852_v15  ;;  %v884_v42 = vld [vmem:[%s1096_s1 + $0x4c] ss:$16 sps:$4 sm:$0xff]   ;;  %v546_v44 = vld [vmem:[%s1097_s2 + $0x10] sm:$0xff]  ;;  %v887_v49 = vld [vmem:[%s1096_s1 + $0x48] ss:$16 sps:$4 sm:$0xff]  }
  0x11   :  { %802 = vmatpush3.bf16.msra.mxu1 %v853_v16  ;;  %763 = vmatprep.subr.bf16.mxu0 %v854_v17  ;;  %v547_v46 = vld [vmem:[%s1097_s2 + $0x18] sm:$0xff]  ;;  %v886_v47 = vld [vmem:[%s1096_s1 + $0x40] ss:$16 sps:$4 sm:$0xff]   ;;  %v888_v50 = vld [vmem:[%s1096_s1 + $0x64] ss:$16 sps:$4 sm:$0xff]  }
  0x12   :  { %803 = vmatprep.subr.bf16.mxu1 %v855_v18  ;;  %564 = vperm.xlu1 %837, %v546_v44   ;;  %v890_v52 = vld [vmem:[%s1096_s1 + $0x6c] ss:$16 sps:$4 sm:$0xff]   ;;  %v550_v53 = vld [vmem:[%s1097_s2 + $0x30] sm:$0xff]  ;;  %v893_v56 = vld [vmem:[%s1096_s1 + $0x68] ss:$16 sps:$4 sm:$0xff]  }
  0x13   :  { %574 = vperm.xlu0 %836, %v548_v48   ;;  %v551_v54 = vld [vmem:[%s1097_s2 + $0x38] sm:$0xff]  ;;  %v892_v55 = vld [vmem:[%s1096_s1 + $0x60] ss:$16 sps:$4 sm:$0xff]  }
  0x14   :  { %764 = vmatpush3.bf16.msra.mxu0 %v856_v19 }
  0x15   :  { %804 = vmatpush3.bf16.msra.mxu1 %v857_v20  ;;  %765 = vmatprep.subr.bf16.mxu0 %v858_v21 }
  0x16   :  { %805 = vmatprep.subr.bf16.mxu1 %v859_v22  ;;  %569 = vperm.xlu1 %837, %v547_v46  }
  0x17   :  { %584 = vperm.xlu0 %836, %v550_v53  }
  0x18   :  { %766 = vmatpush3.bf16.msra.mxu0 %v860_v23 }
  0x19   :  { %806 = vmatpush3.bf16.msra.mxu1 %v861_v24  ;;  %767 = vmatprep.subr.bf16.mxu0 %v862_v25 }
  0x1a   :  { %807 = vmatprep.subr.bf16.mxu1 %v863_v26  ;;  %579 = vperm.xlu1 %837, %v549_v51  }
  0x1c   :  { %768 = vmatpush3.bf16.msra.mxu0 %v864_v27 }
  0x1d   :  { %808 = vmatpush3.bf16.msra.mxu1 %v865_v28  ;;  %769 = vmatprep.subr.bf16.mxu0 %v866_v29 }
  0x1e   :  { %809 = vmatprep.subr.bf16.mxu1 %v867_v30  ;;  %589 = vperm.xlu1 %837, %v551_v54  }
  0x20   :  { %770 = vmatpush3.bf16.msra.mxu0 %v868_v31 }
  0x21   :  { %810 = vmatpush3.bf16.msra.mxu1 %v869_v32 }
  0x23   :  { %420 = vmatmul.mubr.bf16.vlgmr.msra.gmra.mrb[0].mxu0 %v870_v33 }
  0x24   :  { %485 = vmatmul.mubr.bf16.vlgmr.msra.gmra.mrb[0].mxu1 %v873_v35  ;;  %427 = vmatprep.mubr.bf16.mxu0 %v876_v37 }
  0x25   :  { %492 = vmatprep.mubr.bf16.mxu1 %v878_v38 }
  0x2b   :  { %428 = vmatmul.mubr.bf16.gmra.mrb[4].mxu0 %v880_v39 }
  0x2c   :  { %493 = vmatmul.mubr.bf16.gmra.mrb[4].mxu1 %v881_v40  ;;  %435 = vmatprep.mubr.bf16.mxu0 %v882_v41 }
  0x2d   :  { %500 = vmatprep.mubr.bf16.mxu1 %v884_v42 }
  0x33   :  { %436 = vmatmul.mubr.bf16.gmra.mrb[8].mxu0 %v886_v47 }
  0x34   :  { %501 = vmatmul.mubr.bf16.gmra.mrb[8].mxu1 %v887_v49  ;;  %443 = vmatprep.mubr.bf16.mxu0 %v888_v50 }
  0x35   :  { %508 = vmatprep.mubr.bf16.mxu1 %v890_v52 }
  0x3b   :  { %444 = vmatmul.mubr.bf16.gmra.mrb[12].mxu0 %v892_v55 }
  0x3c   :  { %509 = vmatmul.mubr.bf16.gmra.mrb[12].mxu1 %v893_v56 }
  0x89   :  { %v555_v58 = vpop.permute.xlu0 %554 }
  0x8e   :  { %v560_v7 = vpop.permute.xlu0 %559 }
  0x91   :  { %v565_v10 = vpop.permute.xlu1 %564 }
  0x92   :  { %v575_v52 = vpop.permute.xlu0 %574 }
  0x95   :  { %v570_v32 = vpop.permute.xlu1 %569 }
  0x99   :  { %v580_v55 = vpop.permute.xlu1 %579 }
  0xf6   :  { %v771_v57 = vpop.f32.mrb[0].mxu0 }
  0xf7   :  { %v811_v59 = vpop.f32.mrb[0].mxu1  ;;  %v772_v60 = vpop.f32.mrb[1].mxu0 }
  0xf8   :  { %v773_v61 = vadd.f32 %v772_v60, %v771_v57  ;;  %v812_v62 = vpop.f32.mrb[1].mxu1  ;;  %v774_v63 = vpop.f32.mrb[2].mxu0 }
  0xf9   :  { %v813_v0 = vadd.f32 %v812_v62, %v811_v59  ;;  %v814_v1 = vpop.f32.mrb[2].mxu1  ;;  %v775_v2 = vpop.f32.mrb[3].mxu0 }
  0xfa   :  { %v776_v3 = vadd.f32 %v775_v2, %v774_v63  ;;  %v815_v4 = vpop.f32.mrb[3].mxu1 }
  0xfb   :  { %v487_v5 = vadd.f32 %v813_v0, %v773_v61  ;;  %v816_v6 = vadd.f32 %v815_v4, %v814_v1 }
  0xfd   :  { %v592_v8 = vadd.f32 %v555_v58, %v487_v5  ;;  %v490_v9 = vadd.f32 %v816_v6, %v776_v3 }
  0xfe   :  { %v777_v11 = vpop.f32.mrb[4].mxu0 }
  0xff   :  { %v608_v12 = vmul.f32 0.2, %v592_v8  ;;  %v593_v13 = vadd.f32 %v560_v7, %v490_v9  ;;  %v817_v14 = vpop.f32.mrb[4].mxu1  ;;  %v778_v15 = vpop.f32.mrb[5].mxu0  ;;  %vm600_vm0 = vcmp.gt.f32.partialorder %v592_v8, 0.0 }
 0x100   :  { %v779_v16 = vadd.f32 %v778_v15, %v777_v11  ;;  %v818_v17 = vpop.f32.mrb[5].mxu1  ;;  %v780_v18 = vpop.f32.mrb[6].mxu0 }
 0x101   :  { %vm601_vm1 = vcmp.gt.f32.partialorder %v593_v13, 0.0  ;;  %v609_v19 = vmul.f32 0.2, %v593_v13  ;;  %v819_v20 = vadd.f32 %v818_v17, %v817_v14  ;;  %v820_v21 = vpop.f32.mrb[6].mxu1  ;;  %v781_v22 = vpop.f32.mrb[7].mxu0  ;;  %v616_v25 = vsel %vm600_vm0, %v592_v8, %v608_v12 }
 0x102   :  { %v782_v23 = vadd.f32 %v781_v22, %v780_v18  ;;  %v821_v24 = vpop.f32.mrb[7].mxu1  ;;  %v590_v14 = vpop.permute.xlu1 %589 }
 0x103   :  { %v617_v26 = vsel %vm601_vm1, %v593_v13, %v609_v19  ;;  %v495_v27 = vadd.f32 %v819_v20, %v779_v16  ;;  %v822_v28 = vadd.f32 %v821_v24, %v820_v21 }
 0x104   :  { %v735_v29 = vpack.c.bf16 %v617_v26, %v616_v25 }
 0x105   :  { %v594_v30 = vadd.f32 %v565_v10, %v495_v27  ;;  %v498_v31 = vadd.f32 %v822_v28, %v782_v23  ;;  %v585_v10 = vpop.permute.xlu0 %584 }
 0x106   :  { %736 = vst [vmem:[%s1098_s3] sm:$0xff] %v735_v29   ;;  %v783_v33 = vpop.f32.mrb[8].mxu0 }
 0x107   :  { %v610_v34 = vmul.f32 0.2, %v594_v30  ;;  %v595_v35 = vadd.f32 %v570_v32, %v498_v31  ;;  %v823_v36 = vpop.f32.mrb[8].mxu1  ;;  %v784_v37 = vpop.f32.mrb[9].mxu0  ;;  %vm602_vm2 = vcmp.gt.f32.partialorder %v594_v30, 0.0 }
 0x108   :  { %v785_v38 = vadd.f32 %v784_v37, %v783_v33  ;;  %v824_v39 = vpop.f32.mrb[9].mxu1  ;;  %v786_v40 = vpop.f32.mrb[10].mxu0 }
 0x109   :  { %vm603_vm3 = vcmp.gt.f32.partialorder %v595_v35, 0.0  ;;  %v611_v41 = vmul.f32 0.2, %v595_v35  ;;  %v825_v42 = vadd.f32 %v824_v39, %v823_v36  ;;  %v826_v43 = vpop.f32.mrb[10].mxu1  ;;  %v787_v44 = vpop.f32.mrb[11].mxu0  ;;  %v618_v47 = vsel %vm602_vm2, %v594_v30, %v610_v34 }
 0x10a   :  { %v788_v45 = vadd.f32 %v787_v44, %v786_v40  ;;  %v827_v46 = vpop.f32.mrb[11].mxu1 }
 0x10b   :  { %v619_v48 = vsel %vm603_vm3, %v595_v35, %v611_v41  ;;  %v503_v49 = vadd.f32 %v825_v42, %v785_v38  ;;  %v828_v50 = vadd.f32 %v827_v46, %v826_v43 }
 0x10c   :  { %v740_v51 = vpack.c.bf16 %v619_v48, %v618_v47 }
 0x10d   :  { %v596_v53 = vadd.f32 %v575_v52, %v503_v49  ;;  %v506_v54 = vadd.f32 %v828_v50, %v788_v45 }
 0x10e   :  { %752 = vst [vmem:[%s1098_s3 + $0x8] sm:$0xff] %v740_v51   ;;  %v789_v56 = vpop.f32.mrb[12].mxu0 }
 0x10f   :  { %v612_v57 = vmul.f32 0.2, %v596_v53  ;;  %v597_v58 = vadd.f32 %v580_v55, %v506_v54  ;;  %v829_v59 = vpop.f32.mrb[12].mxu1  ;;  %v790_v60 = vpop.f32.mrb[13].mxu0  ;;  %vm604_vm4 = vcmp.gt.f32.partialorder %v596_v53, 0.0 }
 0x110   :  { %v791_v61 = vadd.f32 %v790_v60, %v789_v56  ;;  %v830_v62 = vpop.f32.mrb[13].mxu1  ;;  %v792_v63 = vpop.f32.mrb[14].mxu0 }
 0x111   :  { %vm605_vm5 = vcmp.gt.f32.partialorder %v597_v58, 0.0  ;;  %v613_v0 = vmul.f32 0.2, %v597_v58  ;;  %v831_v1 = vadd.f32 %v830_v62, %v829_v59  ;;  %v832_v2 = vpop.f32.mrb[14].mxu1  ;;  %v793_v3 = vpop.f32.mrb[15].mxu0  ;;  %v620_v6 = vsel %vm604_vm4, %v596_v53, %v612_v57 }
 0x112   :  { %v794_v4 = vadd.f32 %v793_v3, %v792_v63  ;;  %v833_v5 = vpop.f32.mrb[15].mxu1 }
 0x113   :  { %v621_v7 = vsel %vm605_vm5, %v597_v58, %v613_v0  ;;  %v511_v8 = vadd.f32 %v831_v1, %v791_v61  ;;  %v834_v9 = vadd.f32 %v833_v5, %v832_v2 }
 0x114   :  { %v745_v11 = vpack.c.bf16 %v621_v7, %v620_v6 }
 0x115   :  { %v598_v12 = vadd.f32 %v585_v10, %v511_v8  ;;  %v514_v13 = vadd.f32 %v834_v9, %v794_v4 }
 0x116   :  { %753 = vst [vmem:[%s1098_s3 + $0x10] sm:$0xff] %v745_v11  }
 0x117   :  { %v614_v15 = vmul.f32 0.2, %v598_v12  ;;  %v599_v16 = vadd.f32 %v590_v14, %v514_v13  ;;  %vm606_vm6 = vcmp.gt.f32.partialorder %v598_v12, 0.0 }
 0x119   :  { %vm607_vm7 = vcmp.gt.f32.partialorder %v599_v16, 0.0  ;;  %v615_v17 = vmul.f32 0.2, %v599_v16  ;;  %v622_v18 = vsel %vm606_vm6, %v598_v12, %v614_v15 }
 0x11b   :  { %v623_v19 = vsel %vm607_vm7, %v599_v16, %v615_v17 }
 0x11c   :  { %v750_v20 = vpack.c.bf16 %v623_v19, %v622_v18 }
 0x11e   :  { %754 = vst [vmem:[%s1098_s3 + $0x18] sm:$0xff] %v750_v20  }

// kernel: multiscale_discriminator_forward.19
= control target key start
LH: loop header
LB: loop body
LE: loop exit
PB: predicated region body
PF: predicated region fallthrough
CT: control target
= control target key end

     0   :  { %v2104_v0 = vmov 0   ;;  %s2516_s1 = inlined_call_operand.vmem [shape: bf16[1024,1], index: 1, kind: input, shape index: {}]   ;;  %s2517_s2 = inlined_call_operand.<no memory space> [shape: f32[1,1], index: 2, kind: input, shape index: {}]   ;;  %s2518_s0 = inlined_call_operand.vmem [shape: bf16[1024,128], index: 0, kind: input, shape index: {}]   ;;  %s2519_s3 = inlined_call_operand.vmem [shape: f32[1,128], index: 3, kind: output, shape index: {}]  }
   0x1   :  { %2103 = vset.pattern.permute.xlu1 %v2104_v0  ;;  %v2032_v1 = vld [vmem:[%s2516_s1 + $0x8] sm:$0xff]   ;;  %2097 = vset.pattern.permute.xlu0 %v2104_v0  ;;  %v1714_v2 = vld [vmem:[%s2516_s1] sm:$0xff]   ;;  %v2033_v3 = vld [vmem:[%s2516_s1 + $0x10] sm:$0xff]  }
   0x2   :  { %v1720_v4 = vunpack.c.h.bf16 %v2032_v1  ;;  %v1715_v5 = vunpack.c.l.bf16 %v1714_v2  ;;  %v1716_v6 = vunpack.c.h.bf16 %v1714_v2  ;;  %v1723_v8 = vunpack.c.l.bf16 %v2033_v3  ;;  %v2034_v9 = vld [vmem:[%s2516_s1 + $0x18] sm:$0xff]   ;;  %v2035_v12 = vld [vmem:[%s2516_s1 + $0x20] sm:$0xff]   ;;  %v2036_v15 = vld [vmem:[%s2516_s1 + $0x28] sm:$0xff]  }
   0x3   :  { %v1719_v10 = vunpack.c.l.bf16 %v2032_v1  ;;  %v1727_v11 = vunpack.c.l.bf16 %v2034_v9  ;;  %v1724_v13 = vunpack.c.h.bf16 %v2033_v3  ;;  %v1731_v14 = vunpack.c.l.bf16 %v2035_v12  ;;  %v2037_v18 = vld [vmem:[%s2516_s1 + $0x30] sm:$0xff]   ;;  %v2038_v21 = vld [vmem:[%s2516_s1 + $0x38] sm:$0xff]   ;;  %v2039_v24 = vld [vmem:[%s2516_s1 + $0x40] sm:$0xff]  }
   0x4   :  { %550 = vperm.xlu1 %2103, %v1720_v4   ;;  %v2098_v7 = vpack.i.bf16 %v1716_v6, %v1715_v5  ;;  %v1728_v16 = vunpack.c.h.bf16 %v2034_v9  ;;  %v1735_v17 = vunpack.c.l.bf16 %v2036_v15  ;;  %v1732_v19 = vunpack.c.h.bf16 %v2035_v12  ;;  %v2040_v27 = vld [vmem:[%s2516_s1 + $0x48] sm:$0xff]   ;;  %v2041_v30 = vld [vmem:[%s2516_s1 + $0x50] sm:$0xff]   ;;  %v2042_v33 = vld [vmem:[%s2516_s1 + $0x58] sm:$0xff]  }
   0x5   :  { %v1739_v20 = vunpack.c.l.bf16 %v2037_v18  ;;  %v1736_v22 = vunpack.c.h.bf16 %v2036_v15  ;;  %v1743_v23 = vunpack.c.l.bf16 %v2038_v21  ;;  %v1740_v25 = vunpack.c.h.bf16 %v2037_v18  ;;  %v2043_v36 = vld [vmem:[%s2516_s1 + $0x60] sm:$0xff]   ;;  %v2044_v39 = vld [vmem:[%s2516_s1 + $0x68] sm:$0xff]   ;;  %v2045_v42 = vld [vmem:[%s2516_s1 + $0x70] sm:$0xff]  }
   0x6   :  { %2099 = vperm.xlu0 %2097, %v2098_v7   ;;  %v1747_v26 = vunpack.c.l.bf16 %v2039_v24  ;;  %v1744_v28 = vunpack.c.h.bf16 %v2038_v21  ;;  %v1751_v29 = vunpack.c.l.bf16 %v2040_v27  ;;  %v1748_v31 = vunpack.c.h.bf16 %v2039_v24  ;;  %v2046_v45 = vld [vmem:[%s2516_s1 + $0x78] sm:$0xff]   ;;  %v2047_v48 = vld [vmem:[%s2516_s1 + $0x80] sm:$0xff]   ;;  %v2048_v51 = vld [vmem:[%s2516_s1 + $0x88] sm:$0xff]  }
   0x7   :  { %v1755_v32 = vunpack.c.l.bf16 %v2041_v30  ;;  %v1752_v34 = vunpack.c.h.bf16 %v2040_v27  ;;  %v1759_v35 = vunpack.c.l.bf16 %v2042_v33  ;;  %v1756_v37 = vunpack.c.h.bf16 %v2041_v30  ;;  %v2049_v54 = vld [vmem:[%s2516_s1 + $0x90] sm:$0xff]   ;;  %v2050_v57 = vld [vmem:[%s2516_s1 + $0x98] sm:$0xff]   ;;  %v2051_v60 = vld [vmem:[%s2516_s1 + $0xa0] sm:$0xff]  }
   0x8   :  { %555 = vperm.xlu1 %2103, %v1723_v8   ;;  %v1763_v38 = vunpack.c.l.bf16 %v2043_v36  ;;  %v1760_v40 = vunpack.c.h.bf16 %v2042_v33  ;;  %v1767_v41 = vunpack.c.l.bf16 %v2044_v39  ;;  %v1764_v43 = vunpack.c.h.bf16 %v2043_v36  ;;  %v2052_v63 = vld [vmem:[%s2516_s1 + $0xa8] sm:$0xff]   ;;  %v2053_v2 = vld [vmem:[%s2516_s1 + $0xb0] sm:$0xff]   ;;  %v2054_v5 = vld [vmem:[%s2516_s1 + $0xb8] sm:$0xff]  }
   0x9   :  { %v1771_v44 = vunpack.c.l.bf16 %v2045_v42  ;;  %v1768_v46 = vunpack.c.h.bf16 %v2044_v39  ;;  %v1775_v47 = vunpack.c.l.bf16 %v2046_v45  ;;  %v1772_v49 = vunpack.c.h.bf16 %v2045_v42  ;;  %v2055_v8 = vld [vmem:[%s2516_s1 + $0xc0] sm:$0xff]   ;;  %v2064_v36 = vld [vmem:[%s2516_s1 + $0x108] sm:$0xff]  }
   0xa   :  { %545 = vperm.xlu0 %2097, %v1719_v10   ;;  %v1779_v50 = vunpack.c.l.bf16 %v2047_v48  ;;  %v1776_v52 = vunpack.c.h.bf16 %v2046_v45  ;;  %v1783_v53 = vunpack.c.l.bf16 %v2048_v51  ;;  %v1780_v55 = vunpack.c.h.bf16 %v2047_v48  ;;  %v2063_v33 = vld [vmem:[%s2516_s1 + $0x100] sm:$0xff]   ;;  %v2066_v48 = vld [vmem:[%s2516_s1 + $0x118] sm:$0xff]  }
   0xb   :  { %v1787_v56 = vunpack.c.l.bf16 %v2049_v54  ;;  %v1784_v58 = vunpack.c.h.bf16 %v2048_v51  ;;  %v1791_v59 = vunpack.c.l.bf16 %v2050_v57  ;;  %v1788_v61 = vunpack.c.h.bf16 %v2049_v54  ;;  %v1458_v39 = vld [vmem:[%s2518_s0] sm:$0xff]   ;;  %v1970_v54 = vld [vmem:[%s2518_s0 + $0x10] sm:$0xff]  }
   0xc   :  { %565 = vperm.xlu1 %2103, %v1727_v11   ;;  %v1795_v62 = vunpack.c.l.bf16 %v2051_v60  ;;  %v1792_v0 = vunpack.c.h.bf16 %v2050_v57  ;;  %v1799_v1 = vunpack.c.l.bf16 %v2052_v63  ;;  %v1796_v3 = vunpack.c.h.bf16 %v2051_v60  ;;  %v2056_v11 = vld [vmem:[%s2516_s1 + $0xc8] sm:$0xff]   ;;  %v2067_v60 = vld [vmem:[%s2516_s1 + $0x120] sm:$0xff]  }
   0xd   :  { %v1803_v4 = vunpack.c.l.bf16 %v2053_v2  ;;  %v1800_v6 = vunpack.c.h.bf16 %v2052_v63  ;;  %v1807_v7 = vunpack.c.l.bf16 %v2054_v5  ;;  %v1804_v9 = vunpack.c.h.bf16 %v2053_v2  ;;  %v1971_v2 = vld [vmem:[%s2518_s0 + $0x18] sm:$0xff]  }
   0xe   :  { %560 = vperm.xlu0 %2097, %v1724_v13   ;;  %v1811_v10 = vunpack.c.l.bf16 %v2055_v8  ;;  %v1808_v12 = vunpack.c.h.bf16 %v2054_v5  ;;  %v1815_v13 = vunpack.c.l.bf16 %v2056_v11  ;;  %v1812_v15 = vunpack.c.h.bf16 %v2055_v8  ;;  %v2068_v8 = vld [vmem:[%s2516_s1 + $0x128] sm:$0xff]  }
   0xf   :  { %v1816_v18 = vunpack.c.h.bf16 %v2056_v11  ;;  %v1460_v45 = vunpack.c.h.bf16 %v1458_v39  ;;  %v1468_v5 = vunpack.c.h.bf16 %v1970_v54  ;;  %v1471_v11 = vunpack.c.l.bf16 %v1971_v2 }
  0x10   :  { %575 = vperm.xlu1 %2103, %v1731_v14   ;;  %v2057_v14 = vld [vmem:[%s2516_s1 + $0xd0] sm:$0xff]  }
  0x11   :  { %v1820_v21 = vunpack.c.h.bf16 %v2057_v14 }
  0x12   :  { %570 = vperm.xlu0 %2097, %v1728_v16   ;;  %v1819_v16 = vunpack.c.l.bf16 %v2057_v14  ;;  %v1972_v14 = vld [vmem:[%s2518_s0 + $0x20] sm:$0xff]  }
  0x14   :  { %585 = vperm.xlu1 %2103, %v1735_v17   ;;  %v2058_v17 = vld [vmem:[%s2516_s1 + $0xd8] sm:$0xff]  }
  0x15   :  { %v1824_v24 = vunpack.c.h.bf16 %v2058_v17 }
  0x16   :  { %580 = vperm.xlu0 %2097, %v1732_v19   ;;  %v1823_v19 = vunpack.c.l.bf16 %v2058_v17  ;;  %v1472_v17 = vunpack.c.h.bf16 %v1971_v2 }
  0x18   :  { %595 = vperm.xlu1 %2103, %v1739_v20   ;;  %v2059_v20 = vld [vmem:[%s2516_s1 + $0xe0] sm:$0xff]  }
  0x19   :  { %v1828_v27 = vunpack.c.h.bf16 %v2059_v20 }
  0x1a   :  { %590 = vperm.xlu0 %2097, %v1736_v22   ;;  %v1827_v22 = vunpack.c.l.bf16 %v2059_v20  ;;  %v2069_v20 = vld [vmem:[%s2516_s1 + $0x130] sm:$0xff]  }
  0x1c   :  { %605 = vperm.xlu1 %2103, %v1743_v23   ;;  %v2060_v23 = vld [vmem:[%s2516_s1 + $0xe8] sm:$0xff]  }
  0x1d   :  { %v1832_v30 = vunpack.c.h.bf16 %v2060_v23 }
  0x1e   :  { %600 = vperm.xlu0 %2097, %v1740_v25   ;;  %v1831_v25 = vunpack.c.l.bf16 %v2060_v23  ;;  %v1475_v23 = vunpack.c.l.bf16 %v1972_v14 }
  0x20   :  { %615 = vperm.xlu1 %2103, %v1747_v26   ;;  %v2061_v26 = vld [vmem:[%s2516_s1 + $0xf0] sm:$0xff]  }
  0x22   :  { %610 = vperm.xlu0 %2097, %v1744_v28   ;;  %v1835_v28 = vunpack.c.l.bf16 %v2061_v26 }
  0x24   :  { %625 = vperm.xlu1 %2103, %v1751_v29   ;;  %v2062_v29 = vld [vmem:[%s2516_s1 + $0xf8] sm:$0xff]  }
  0x26   :  { %620 = vperm.xlu0 %2097, %v1748_v31   ;;  %v8_v31 = vstv %s2517_s2 }
  0x27   :  { %9 = vst [vmem:[#allocation3] sm:$0x1] %v8_v31 }
  0x28   :  { %635 = vperm.xlu1 %2103, %v1755_v32   ;;  %v1839_v32 = vunpack.c.l.bf16 %v2062_v29 }
  0x2a   :  { %630 = vperm.xlu0 %2097, %v1752_v34   ;;  %v1836_v34 = vunpack.c.h.bf16 %v2061_v26  ;;  %v1973_v26 = vld [vmem:[%s2518_s0 + $0x28] sm:$0xff]  }
  0x2c   :  { %645 = vperm.xlu1 %2103, %v1759_v35   ;;  %v1843_v35 = vunpack.c.l.bf16 %v2063_v33 }
  0x2e   :  { %640 = vperm.xlu0 %2097, %v1756_v37   ;;  %v1840_v37 = vunpack.c.h.bf16 %v2062_v29  ;;  %v1476_v29 = vunpack.c.h.bf16 %v1972_v14 }
  0x30   :  { %655 = vperm.xlu1 %2103, %v1763_v38   ;;  %v1847_v38 = vunpack.c.l.bf16 %v2064_v36 }
  0x32   :  { %650 = vperm.xlu0 %2097, %v1760_v40   ;;  %v2065_v40 = vld [vmem:[%s2516_s1 + $0x110] sm:$0xff]  }
  0x34   :  { %665 = vperm.xlu1 %2103, %v1767_v41   ;;  %v1844_v41 = vunpack.c.h.bf16 %v2063_v33 }
  0x36   :  { %660 = vperm.xlu0 %2097, %v1764_v43   ;;  %v1969_v43 = vld [vmem:[%s2518_s0 + $0x8] sm:$0xff]  }
  0x37   :  { %v1463_v51 = vunpack.c.l.bf16 %v1969_v43 }
  0x38   :  { %675 = vperm.xlu1 %2103, %v1771_v44   ;;  %v1459_v44 = vunpack.c.l.bf16 %v1458_v39 }
  0x3a   :  { %670 = vperm.xlu0 %2097, %v1768_v46   ;;  %v1851_v46 = vunpack.c.l.bf16 %v2065_v40 }
  0x3c   :  { %685 = vperm.xlu1 %2103, %v1775_v47  }
  0x3e   :  { %680 = vperm.xlu0 %2097, %v1772_v49  }
  0x40   :  { %695 = vperm.xlu1 %2103, %v1779_v50  }
  0x42   :  { %690 = vperm.xlu0 %2097, %v1776_v52   ;;  %v1848_v52 = vunpack.c.h.bf16 %v2064_v36  ;;  %v1864_v36 = vunpack.c.h.bf16 %v2068_v8 }
  0x44   :  { %705 = vperm.xlu1 %2103, %v1783_v53  }
  0x46   :  { %700 = vperm.xlu0 %2097, %v1780_v55   ;;  %v1464_v55 = vunpack.c.h.bf16 %v1969_v43 }
  0x48   :  { %715 = vperm.xlu1 %2103, %v1787_v56  }
  0x4a   :  { %710 = vperm.xlu0 %2097, %v1784_v58   ;;  %v1855_v58 = vunpack.c.l.bf16 %v2066_v48 }
  0x4c   :  { %725 = vperm.xlu1 %2103, %v1791_v59  }
  0x4e   :  { %720 = vperm.xlu0 %2097, %v1788_v61  }
  0x50   :  { %735 = vperm.xlu1 %2103, %v1795_v62   ;;  %v1467_v62 = vunpack.c.l.bf16 %v1970_v54 }
  0x52   :  { %730 = vperm.xlu0 %2097, %v1792_v0   ;;  %v1852_v0 = vunpack.c.h.bf16 %v2065_v40 }
  0x54   :  { %745 = vperm.xlu1 %2103, %v1799_v1  }
  0x56   :  { %740 = vperm.xlu0 %2097, %v1796_v3  }
  0x58   :  { %755 = vperm.xlu1 %2103, %v1803_v4  }
  0x5a   :  { %750 = vperm.xlu0 %2097, %v1800_v6   ;;  %v1859_v6 = vunpack.c.l.bf16 %v2067_v60 }
  0x5c   :  { %765 = vperm.xlu1 %2103, %v1807_v7  }
  0x5e   :  { %760 = vperm.xlu0 %2097, %v1804_v9  }
  0x60   :  { %775 = vperm.xlu1 %2103, %v1811_v10  }
  0x62   :  { %770 = vperm.xlu0 %2097, %v1808_v12   ;;  %v1856_v12 = vunpack.c.h.bf16 %v2066_v48  ;;  %v1868_v48 = vunpack.c.h.bf16 %v2069_v20 }
  0x64   :  { %785 = vperm.xlu1 %2103, %v1815_v13  }
  0x66   :  { %780 = vperm.xlu0 %2097, %v1812_v15  }
  0x68   :  { %795 = vperm.xlu1 %2103, %v1819_v16  }
  0x6a   :  { %790 = vperm.xlu0 %2097, %v1816_v18   ;;  %v1863_v18 = vunpack.c.l.bf16 %v2068_v8 }
  0x6c   :  { %805 = vperm.xlu1 %2103, %v1823_v19  }
  0x6e   :  { %800 = vperm.xlu0 %2097, %v1820_v21  }
  0x70   :  { %815 = vperm.xlu1 %2103, %v1827_v22  }
  0x72   :  { %810 = vperm.xlu0 %2097, %v1824_v24   ;;  %v1860_v24 = vunpack.c.h.bf16 %v2067_v60 }
  0x74   :  { %825 = vperm.xlu1 %2103, %v1831_v25  }
  0x76   :  { %820 = vperm.xlu0 %2097, %v1828_v27  }
  0x78   :  { %835 = vperm.xlu1 %2103, %v1835_v28  }
  0x7a   :  { %830 = vperm.xlu0 %2097, %v1832_v30   ;;  %v1867_v30 = vunpack.c.l.bf16 %v2069_v20 }
  0x7c   :  { %845 = vperm.xlu1 %2103, %v1839_v32   ;;  %v2070_v32 = vld [vmem:[%s2516_s1 + $0x138] sm:$0xff]  }
  0x7d   :  { %v1872_v60 = vunpack.c.h.bf16 %v2070_v32 }
  0x7e   :  { %840 = vperm.xlu0 %2097, %v1836_v34  }
  0x80   :  { %855 = vperm.xlu1 %2103, %v1843_v35   ;;  %v1479_v35 = vunpack.c.l.bf16 %v1973_v26 }
  0x82   :  { %850 = vperm.xlu0 %2097, %v1840_v37  }
  0x83   :  { %v551_v42 = vpop.permute.xlu1 %550 }
  0x84   :  { %865 = vperm.xlu1 %2103, %v1847_v38   ;;  %v1176_v3 = vmul.f32 %v1464_v55, %v551_v42  ;;  %v1974_v38 = vld [vmem:[%s2518_s0 + $0x30] sm:$0xff]   ;;  %v1871_v42 = vunpack.c.l.bf16 %v2070_v32 }
  0x85   :  { %v2100_v47 = vpop.permute.xlu0 %2099 }
  0x86   :  { %v2102_v49 = vunpack.i.h.bf16 %v2100_v47  ;;  %v2101_v50 = vunpack.i.l.bf16 %v2100_v47  ;;  %860 = vperm.xlu0 %2097, %v1844_v41   ;;  %v1480_v41 = vunpack.c.h.bf16 %v1973_v26  ;;  %v1483_v47 = vunpack.c.l.bf16 %v1974_v38 }
  0x87   :  { %v556_v53 = vpop.permute.xlu1 %555 }
  0x88   :  { %v1173_v56 = vmul.f32 %v2101_v50, %v1459_v44  ;;  %v1174_v57 = vmul.f32 %v2102_v49, %v1460_v45  ;;  %875 = vperm.xlu1 %2103, %v1851_v46   ;;  %v1177_v9 = vmul.f32 %v1467_v62, %v556_v53  ;;  %v2071_v44 = vld [vmem:[%s2516_s1 + $0x140] sm:$0xff]   ;;  %v1975_v50 = vld [vmem:[%s2518_s0 + $0x38] sm:$0xff]   ;;  %v1484_v53 = vunpack.c.h.bf16 %v1974_v38 }
  0x89   :  { %v546_v59 = vpop.permute.xlu0 %545  ;;  %v1875_v54 = vunpack.c.l.bf16 %v2071_v44  ;;  %v1976_v62 = vld [vmem:[%s2518_s0 + $0x40] sm:$0xff]   ;;  %v1876_v8 = vunpack.c.h.bf16 %v2071_v44 }
  0x8a   :  { %v1302_v61 = vadd.f32 %v1174_v57, %v1173_v56  ;;  %v1175_v63 = vmul.f32 %v1463_v51, %v546_v59  ;;  %870 = vperm.xlu0 %2097, %v1848_v52   ;;  %v2072_v56 = vld [vmem:[%s2516_s1 + $0x148] sm:$0xff]   ;;  %v1487_v59 = vunpack.c.l.bf16 %v1975_v50 }
  0x8b   :  { %v566_v1 = vpop.permute.xlu1 %565  ;;  %v1879_v2 = vunpack.c.l.bf16 %v2072_v56  ;;  %v1880_v20 = vunpack.c.h.bf16 %v2072_v56 }
  0x8c   :  { %v1303_v4 = vadd.f32 %v1302_v61, %v1175_v63  ;;  %885 = vperm.xlu1 %2103, %v1855_v58   ;;  %v1179_v21 = vmul.f32 %v1471_v11, %v566_v1  ;;  %v1488_v1 = vunpack.c.h.bf16 %v1975_v50 }
  0x8d   :  { %v561_v7 = vpop.permute.xlu0 %560 }
  0x8e   :  { %v1304_v10 = vadd.f32 %v1303_v4, %v1176_v3  ;;  %880 = vperm.xlu0 %2097, %v1852_v0   ;;  %v1178_v16 = vmul.f32 %v1468_v5, %v561_v7  ;;  %v2073_v4 = vld [vmem:[%s2516_s1 + $0x150] sm:$0xff]   ;;  %v1491_v7 = vunpack.c.l.bf16 %v1976_v62 }
  0x8f   :  { %v576_v13 = vpop.permute.xlu1 %575  ;;  %v1883_v14 = vunpack.c.l.bf16 %v2073_v4  ;;  %v1884_v32 = vunpack.c.h.bf16 %v2073_v4 }
  0x90   :  { %v1305_v15 = vadd.f32 %v1304_v10, %v1177_v9  ;;  %895 = vperm.xlu1 %2103, %v1859_v6   ;;  %v1181_v33 = vmul.f32 %v1475_v23, %v576_v13  ;;  %v1977_v10 = vld [vmem:[%s2518_s0 + $0x48] sm:$0xff]   ;;  %v1492_v13 = vunpack.c.h.bf16 %v1976_v62 }
  0x91   :  { %v571_v19 = vpop.permute.xlu0 %570 }
  0x92   :  { %v1306_v22 = vadd.f32 %v1305_v15, %v1178_v16  ;;  %890 = vperm.xlu0 %2097, %v1856_v12   ;;  %v1180_v28 = vmul.f32 %v1472_v17, %v571_v19  ;;  %v2074_v16 = vld [vmem:[%s2516_s1 + $0x158] sm:$0xff]   ;;  %v1495_v19 = vunpack.c.l.bf16 %v1977_v10 }
  0x93   :  { %v586_v25 = vpop.permute.xlu1 %585  ;;  %v1887_v26 = vunpack.c.l.bf16 %v2074_v16  ;;  %v1888_v44 = vunpack.c.h.bf16 %v2074_v16 }
  0x94   :  { %v1307_v27 = vadd.f32 %v1306_v22, %v1179_v21  ;;  %905 = vperm.xlu1 %2103, %v1863_v18   ;;  %v1183_v45 = vmul.f32 %v1479_v35, %v586_v25  ;;  %v1978_v22 = vld [vmem:[%s2518_s0 + $0x50] sm:$0xff]   ;;  %v1496_v25 = vunpack.c.h.bf16 %v1977_v10 }
  0x95   :  { %v581_v31 = vpop.permute.xlu0 %580 }
  0x96   :  { %v1308_v34 = vadd.f32 %v1307_v27, %v1180_v28  ;;  %900 = vperm.xlu0 %2097, %v1860_v24   ;;  %v1182_v40 = vmul.f32 %v1476_v29, %v581_v31  ;;  %v2075_v28 = vld [vmem:[%s2516_s1 + $0x160] sm:$0xff]   ;;  %v1499_v31 = vunpack.c.l.bf16 %v1978_v22 }
  0x97   :  { %v596_v37 = vpop.permute.xlu1 %595  ;;  %v1891_v38 = vunpack.c.l.bf16 %v2075_v28  ;;  %v1892_v56 = vunpack.c.h.bf16 %v2075_v28 }
  0x98   :  { %v1309_v39 = vadd.f32 %v1308_v34, %v1181_v33  ;;  %915 = vperm.xlu1 %2103, %v1867_v30   ;;  %v1185_v57 = vmul.f32 %v1483_v47, %v596_v37  ;;  %v1979_v34 = vld [vmem:[%s2518_s0 + $0x58] sm:$0xff]   ;;  %v1500_v37 = vunpack.c.h.bf16 %v1978_v22 }
  0x99   :  { %v591_v43 = vpop.permute.xlu0 %590 }
  0x9a   :  { %v1310_v46 = vadd.f32 %v1309_v39, %v1182_v40  ;;  %910 = vperm.xlu0 %2097, %v1864_v36   ;;  %v1184_v52 = vmul.f32 %v1480_v41, %v591_v43  ;;  %v2076_v40 = vld [vmem:[%s2516_s1 + $0x168] sm:$0xff]   ;;  %v1503_v43 = vunpack.c.l.bf16 %v1979_v34 }
  0x9b   :  { %v606_v49 = vpop.permute.xlu1 %605  ;;  %v1895_v50 = vunpack.c.l.bf16 %v2076_v40  ;;  %v1896_v4 = vunpack.c.h.bf16 %v2076_v40 }
  0x9c   :  { %v1311_v51 = vadd.f32 %v1310_v46, %v1183_v45  ;;  %925 = vperm.xlu1 %2103, %v1871_v42   ;;  %v1187_v5 = vmul.f32 %v1487_v59, %v606_v49  ;;  %v1980_v46 = vld [vmem:[%s2518_s0 + $0x60] sm:$0xff]   ;;  %v1504_v49 = vunpack.c.h.bf16 %v1979_v34 }
  0x9d   :  { %v601_v55 = vpop.permute.xlu0 %600 }
  0x9e   :  { %v1312_v58 = vadd.f32 %v1311_v51, %v1184_v52  ;;  %920 = vperm.xlu0 %2097, %v1868_v48   ;;  %v1186_v0 = vmul.f32 %v1484_v53, %v601_v55  ;;  %v2077_v52 = vld [vmem:[%s2516_s1 + $0x170] sm:$0xff]   ;;  %v1507_v55 = vunpack.c.l.bf16 %v1980_v46 }
  0x9f   :  { %v616_v61 = vpop.permute.xlu1 %615  ;;  %v1899_v62 = vunpack.c.l.bf16 %v2077_v52  ;;  %v1900_v16 = vunpack.c.h.bf16 %v2077_v52 }
  0xa0   :  { %v1313_v63 = vadd.f32 %v1312_v58, %v1185_v57  ;;  %935 = vperm.xlu1 %2103, %v1875_v54   ;;  %v1189_v17 = vmul.f32 %v1491_v7, %v616_v61  ;;  %v1981_v58 = vld [vmem:[%s2518_s0 + $0x68] sm:$0xff]   ;;  %v1508_v61 = vunpack.c.h.bf16 %v1980_v46 }
  0xa1   :  { %v611_v3 = vpop.permute.xlu0 %610 }
  0xa2   :  { %v1314_v6 = vadd.f32 %v1313_v63, %v1186_v0  ;;  %930 = vperm.xlu0 %2097, %v1872_v60   ;;  %v1188_v12 = vmul.f32 %v1488_v1, %v611_v3  ;;  %v2078_v0 = vld [vmem:[%s2516_s1 + $0x178] sm:$0xff]   ;;  %v1511_v3 = vunpack.c.l.bf16 %v1981_v58 }
  0xa3   :  { %v626_v9 = vpop.permute.xlu1 %625  ;;  %v1903_v10 = vunpack.c.l.bf16 %v2078_v0  ;;  %v1904_v28 = vunpack.c.h.bf16 %v2078_v0 }
  0xa4   :  { %v1315_v11 = vadd.f32 %v1314_v6, %v1187_v5  ;;  %945 = vperm.xlu1 %2103, %v1879_v2   ;;  %v1191_v29 = vmul.f32 %v1495_v19, %v626_v9  ;;  %v1982_v6 = vld [vmem:[%s2518_s0 + $0x70] sm:$0xff]   ;;  %v1512_v9 = vunpack.c.h.bf16 %v1981_v58 }
  0xa5   :  { %v621_v15 = vpop.permute.xlu0 %620 }
  0xa6   :  { %v1316_v18 = vadd.f32 %v1315_v11, %v1188_v12  ;;  %940 = vperm.xlu0 %2097, %v1876_v8   ;;  %v1190_v24 = vmul.f32 %v1492_v13, %v621_v15  ;;  %v2079_v12 = vld [vmem:[%s2516_s1 + $0x180] sm:$0xff]   ;;  %v1515_v15 = vunpack.c.l.bf16 %v1982_v6 }
  0xa7   :  { %v636_v21 = vpop.permute.xlu1 %635  ;;  %v1907_v22 = vunpack.c.l.bf16 %v2079_v12  ;;  %v1908_v40 = vunpack.c.h.bf16 %v2079_v12 }
  0xa8   :  { %v1317_v23 = vadd.f32 %v1316_v18, %v1189_v17  ;;  %955 = vperm.xlu1 %2103, %v1883_v14   ;;  %v1193_v41 = vmul.f32 %v1499_v31, %v636_v21  ;;  %v1983_v18 = vld [vmem:[%s2518_s0 + $0x78] sm:$0xff]   ;;  %v1516_v21 = vunpack.c.h.bf16 %v1982_v6 }
  0xa9   :  { %v631_v27 = vpop.permute.xlu0 %630 }
  0xaa   :  { %v1318_v30 = vadd.f32 %v1317_v23, %v1190_v24  ;;  %950 = vperm.xlu0 %2097, %v1880_v20   ;;  %v1192_v36 = vmul.f32 %v1496_v25, %v631_v27  ;;  %v2080_v24 = vld [vmem:[%s2516_s1 + $0x188] sm:$0xff]   ;;  %v1519_v27 = vunpack.c.l.bf16 %v1983_v18 }
  0xab   :  { %v646_v33 = vpop.permute.xlu1 %645  ;;  %v1911_v34 = vunpack.c.l.bf16 %v2080_v24  ;;  %v1912_v52 = vunpack.c.h.bf16 %v2080_v24 }
  0xac   :  { %v1319_v35 = vadd.f32 %v1318_v30, %v1191_v29  ;;  %965 = vperm.xlu1 %2103, %v1887_v26   ;;  %v1195_v53 = vmul.f32 %v1503_v43, %v646_v33  ;;  %v1984_v30 = vld [vmem:[%s2518_s0 + $0x80] sm:$0xff]   ;;  %v1520_v33 = vunpack.c.h.bf16 %v1983_v18 }
  0xad   :  { %v641_v39 = vpop.permute.xlu0 %640 }
  0xae   :  { %v1320_v42 = vadd.f32 %v1319_v35, %v1192_v36  ;;  %960 = vperm.xlu0 %2097, %v1884_v32   ;;  %v1194_v48 = vmul.f32 %v1500_v37, %v641_v39  ;;  %v2081_v36 = vld [vmem:[%s2516_s1 + $0x190] sm:$0xff]   ;;  %v1523_v39 = vunpack.c.l.bf16 %v1984_v30 }
  0xaf   :  { %v656_v45 = vpop.permute.xlu1 %655  ;;  %v1915_v46 = vunpack.c.l.bf16 %v2081_v36  ;;  %v1916_v0 = vunpack.c.h.bf16 %v2081_v36 }
  0xb0   :  { %v1321_v47 = vadd.f32 %v1320_v42, %v1193_v41  ;;  %975 = vperm.xlu1 %2103, %v1891_v38   ;;  %v1197_v1 = vmul.f32 %v1507_v55, %v656_v45  ;;  %v1985_v42 = vld [vmem:[%s2518_s0 + $0x88] sm:$0xff]   ;;  %v1524_v45 = vunpack.c.h.bf16 %v1984_v30 }
  0xb1   :  { %v651_v51 = vpop.permute.xlu0 %650 }
  0xb2   :  { %v1322_v54 = vadd.f32 %v1321_v47, %v1194_v48  ;;  %970 = vperm.xlu0 %2097, %v1888_v44   ;;  %v1196_v60 = vmul.f32 %v1504_v49, %v651_v51  ;;  %v2082_v48 = vld [vmem:[%s2516_s1 + $0x198] sm:$0xff]   ;;  %v1527_v51 = vunpack.c.l.bf16 %v1985_v42 }
  0xb3   :  { %v666_v57 = vpop.permute.xlu1 %665  ;;  %v1919_v58 = vunpack.c.l.bf16 %v2082_v48  ;;  %v1920_v12 = vunpack.c.h.bf16 %v2082_v48 }
  0xb4   :  { %v1323_v59 = vadd.f32 %v1322_v54, %v1195_v53  ;;  %985 = vperm.xlu1 %2103, %v1895_v50   ;;  %v1199_v13 = vmul.f32 %v1511_v3, %v666_v57  ;;  %v1986_v54 = vld [vmem:[%s2518_s0 + $0x90] sm:$0xff]   ;;  %v1528_v57 = vunpack.c.h.bf16 %v1985_v42 }
  0xb5   :  { %v661_v63 = vpop.permute.xlu0 %660 }
  0xb6   :  { %v1324_v2 = vadd.f32 %v1323_v59, %v1196_v60  ;;  %980 = vperm.xlu0 %2097, %v1892_v56   ;;  %v1198_v8 = vmul.f32 %v1508_v61, %v661_v63  ;;  %v2083_v60 = vld [vmem:[%s2516_s1 + $0x1a0] sm:$0xff]   ;;  %v1531_v63 = vunpack.c.l.bf16 %v1986_v54 }
  0xb7   :  { %v676_v5 = vpop.permute.xlu1 %675  ;;  %v1923_v6 = vunpack.c.l.bf16 %v2083_v60  ;;  %v1924_v24 = vunpack.c.h.bf16 %v2083_v60 }
  0xb8   :  { %v1325_v7 = vadd.f32 %v1324_v2, %v1197_v1  ;;  %995 = vperm.xlu1 %2103, %v1899_v62   ;;  %v1201_v25 = vmul.f32 %v1515_v15, %v676_v5  ;;  %v1987_v2 = vld [vmem:[%s2518_s0 + $0x98] sm:$0xff]   ;;  %v1532_v5 = vunpack.c.h.bf16 %v1986_v54 }
  0xb9   :  { %v671_v11 = vpop.permute.xlu0 %670 }
  0xba   :  { %v1326_v14 = vadd.f32 %v1325_v7, %v1198_v8  ;;  %990 = vperm.xlu0 %2097, %v1896_v4   ;;  %v1200_v20 = vmul.f32 %v1512_v9, %v671_v11  ;;  %v2084_v8 = vld [vmem:[%s2516_s1 + $0x1a8] sm:$0xff]   ;;  %v1535_v11 = vunpack.c.l.bf16 %v1987_v2 }
  0xbb   :  { %v686_v17 = vpop.permute.xlu1 %685  ;;  %v1927_v18 = vunpack.c.l.bf16 %v2084_v8  ;;  %v1928_v36 = vunpack.c.h.bf16 %v2084_v8 }
  0xbc   :  { %v1327_v19 = vadd.f32 %v1326_v14, %v1199_v13  ;;  %1005 = vperm.xlu1 %2103, %v1903_v10   ;;  %v1203_v37 = vmul.f32 %v1519_v27, %v686_v17  ;;  %v1988_v14 = vld [vmem:[%s2518_s0 + $0xa0] sm:$0xff]   ;;  %v1536_v17 = vunpack.c.h.bf16 %v1987_v2 }
  0xbd   :  { %v681_v23 = vpop.permute.xlu0 %680 }
  0xbe   :  { %v1328_v26 = vadd.f32 %v1327_v19, %v1200_v20  ;;  %1000 = vperm.xlu0 %2097, %v1900_v16   ;;  %v1202_v32 = vmul.f32 %v1516_v21, %v681_v23  ;;  %v2085_v20 = vld [vmem:[%s2516_s1 + $0x1b0] sm:$0xff]   ;;  %v1539_v23 = vunpack.c.l.bf16 %v1988_v14 }
  0xbf   :  { %v696_v29 = vpop.permute.xlu1 %695  ;;  %v1931_v30 = vunpack.c.l.bf16 %v2085_v20  ;;  %v1932_v48 = vunpack.c.h.bf16 %v2085_v20 }
  0xc0   :  { %v1329_v31 = vadd.f32 %v1328_v26, %v1201_v25  ;;  %1015 = vperm.xlu1 %2103, %v1907_v22   ;;  %v1205_v49 = vmul.f32 %v1523_v39, %v696_v29  ;;  %v1989_v26 = vld [vmem:[%s2518_s0 + $0xa8] sm:$0xff]   ;;  %v1540_v29 = vunpack.c.h.bf16 %v1988_v14 }
  0xc1   :  { %v691_v35 = vpop.permute.xlu0 %690 }
  0xc2   :  { %v1330_v38 = vadd.f32 %v1329_v31, %v1202_v32  ;;  %1010 = vperm.xlu0 %2097, %v1904_v28   ;;  %v1204_v44 = vmul.f32 %v1520_v33, %v691_v35  ;;  %v2086_v32 = vld [vmem:[%s2516_s1 + $0x1b8] sm:$0xff]   ;;  %v1543_v35 = vunpack.c.l.bf16 %v1989_v26 }
  0xc3   :  { %v706_v41 = vpop.permute.xlu1 %705  ;;  %v1935_v42 = vunpack.c.l.bf16 %v2086_v32  ;;  %v1936_v60 = vunpack.c.h.bf16 %v2086_v32 }
  0xc4   :  { %v1331_v43 = vadd.f32 %v1330_v38, %v1203_v37  ;;  %1025 = vperm.xlu1 %2103, %v1911_v34   ;;  %v1207_v61 = vmul.f32 %v1527_v51, %v706_v41  ;;  %v1990_v38 = vld [vmem:[%s2518_s0 + $0xb0] sm:$0xff]   ;;  %v1544_v41 = vunpack.c.h.bf16 %v1989_v26 }
  0xc5   :  { %v701_v47 = vpop.permute.xlu0 %700 }
  0xc6   :  { %v1332_v50 = vadd.f32 %v1331_v43, %v1204_v44  ;;  %1020 = vperm.xlu0 %2097, %v1908_v40   ;;  %v1206_v56 = vmul.f32 %v1524_v45, %v701_v47  ;;  %v2087_v44 = vld [vmem:[%s2516_s1 + $0x1c0] sm:$0xff]   ;;  %v1547_v47 = vunpack.c.l.bf16 %v1990_v38 }
  0xc7   :  { %v716_v53 = vpop.permute.xlu1 %715  ;;  %v1939_v54 = vunpack.c.l.bf16 %v2087_v44  ;;  %v1940_v8 = vunpack.c.h.bf16 %v2087_v44 }
  0xc8   :  { %v1333_v55 = vadd.f32 %v1332_v50, %v1205_v49  ;;  %1035 = vperm.xlu1 %2103, %v1915_v46   ;;  %v1209_v9 = vmul.f32 %v1531_v63, %v716_v53  ;;  %v1991_v50 = vld [vmem:[%s2518_s0 + $0xb8] sm:$0xff]   ;;  %v1548_v53 = vunpack.c.h.bf16 %v1990_v38 }
  0xc9   :  { %v711_v59 = vpop.permute.xlu0 %710 }
  0xca   :  { %v1334_v62 = vadd.f32 %v1333_v55, %v1206_v56  ;;  %1030 = vperm.xlu0 %2097, %v1912_v52   ;;  %v1208_v4 = vmul.f32 %v1528_v57, %v711_v59  ;;  %v2088_v56 = vld [vmem:[%s2516_s1 + $0x1c8] sm:$0xff]   ;;  %v1551_v59 = vunpack.c.l.bf16 %v1991_v50 }
  0xcb   :  { %v726_v1 = vpop.permute.xlu1 %725  ;;  %v1943_v2 = vunpack.c.l.bf16 %v2088_v56  ;;  %v1944_v20 = vunpack.c.h.bf16 %v2088_v56 }
  0xcc   :  { %v1335_v3 = vadd.f32 %v1334_v62, %v1207_v61  ;;  %1045 = vperm.xlu1 %2103, %v1919_v58   ;;  %v1211_v21 = vmul.f32 %v1535_v11, %v726_v1  ;;  %v1992_v62 = vld [vmem:[%s2518_s0 + $0xc0] sm:$0xff]   ;;  %v1552_v1 = vunpack.c.h.bf16 %v1991_v50 }
  0xcd   :  { %v721_v7 = vpop.permute.xlu0 %720 }
  0xce   :  { %v1336_v10 = vadd.f32 %v1335_v3, %v1208_v4  ;;  %1040 = vperm.xlu0 %2097, %v1916_v0   ;;  %v1210_v16 = vmul.f32 %v1532_v5, %v721_v7  ;;  %v2089_v4 = vld [vmem:[%s2516_s1 + $0x1d0] sm:$0xff]   ;;  %v1555_v7 = vunpack.c.l.bf16 %v1992_v62 }
  0xcf   :  { %v736_v13 = vpop.permute.xlu1 %735  ;;  %v1947_v14 = vunpack.c.l.bf16 %v2089_v4  ;;  %v1948_v32 = vunpack.c.h.bf16 %v2089_v4 }
  0xd0   :  { %v1337_v15 = vadd.f32 %v1336_v10, %v1209_v9  ;;  %1055 = vperm.xlu1 %2103, %v1923_v6   ;;  %v1213_v33 = vmul.f32 %v1539_v23, %v736_v13  ;;  %v1993_v10 = vld [vmem:[%s2518_s0 + $0xc8] sm:$0xff]   ;;  %v1556_v13 = vunpack.c.h.bf16 %v1992_v62 }
  0xd1   :  { %v731_v19 = vpop.permute.xlu0 %730 }
  0xd2   :  { %v1338_v22 = vadd.f32 %v1337_v15, %v1210_v16  ;;  %1050 = vperm.xlu0 %2097, %v1920_v12   ;;  %v1212_v28 = vmul.f32 %v1536_v17, %v731_v19  ;;  %v2090_v16 = vld [vmem:[%s2516_s1 + $0x1d8] sm:$0xff]   ;;  %v1559_v19 = vunpack.c.l.bf16 %v1993_v10 }
  0xd3   :  { %v746_v25 = vpop.permute.xlu1 %745  ;;  %v1951_v26 = vunpack.c.l.bf16 %v2090_v16  ;;  %v1952_v44 = vunpack.c.h.bf16 %v2090_v16 }
  0xd4   :  { %v1339_v27 = vadd.f32 %v1338_v22, %v1211_v21  ;;  %1065 = vperm.xlu1 %2103, %v1927_v18   ;;  %v1215_v45 = vmul.f32 %v1543_v35, %v746_v25  ;;  %v1994_v22 = vld [vmem:[%s2518_s0 + $0xd0] sm:$0xff]   ;;  %v1560_v25 = vunpack.c.h.bf16 %v1993_v10 }
  0xd5   :  { %v741_v31 = vpop.permute.xlu0 %740 }
  0xd6   :  { %v1340_v34 = vadd.f32 %v1339_v27, %v1212_v28  ;;  %1060 = vperm.xlu0 %2097, %v1924_v24   ;;  %v1214_v40 = vmul.f32 %v1540_v29, %v741_v31  ;;  %v2091_v28 = vld [vmem:[%s2516_s1 + $0x1e0] sm:$0xff]   ;;  %v1563_v31 = vunpack.c.l.bf16 %v1994_v22 }
  0xd7   :  { %v756_v37 = vpop.permute.xlu1 %755  ;;  %v1955_v38 = vunpack.c.l.bf16 %v2091_v28  ;;  %v1956_v56 = vunpack.c.h.bf16 %v2091_v28  ;;  %v2000_v28 = vld [vmem:[%s2518_s0 + $0x100] sm:$0xff]  }
  0xd8   :  { %v1341_v39 = vadd.f32 %v1340_v34, %v1213_v33  ;;  %1075 = vperm.xlu1 %2103, %v1931_v30   ;;  %v1217_v57 = vmul.f32 %v1547_v47, %v756_v37  ;;  %v1995_v34 = vld [vmem:[%s2518_s0 + $0xd8] sm:$0xff]   ;;  %v1564_v37 = vunpack.c.h.bf16 %v1994_v22  ;;  %v1441_v22 = vld [vmem:[#allocation3] sm:$0x1] }
  0xd9   :  { %v751_v43 = vpop.permute.xlu0 %750 }
  0xda   :  { %v1342_v46 = vadd.f32 %v1341_v39, %v1214_v40  ;;  %1070 = vperm.xlu0 %2097, %v1928_v36   ;;  %v1216_v52 = vmul.f32 %v1544_v41, %v751_v43  ;;  %v2092_v40 = vld [vmem:[%s2516_s1 + $0x1e8] sm:$0xff]   ;;  %v1567_v43 = vunpack.c.l.bf16 %v1995_v34 }
  0xdb   :  { %v766_v49 = vpop.permute.xlu1 %765  ;;  %v1959_v50 = vunpack.c.l.bf16 %v2092_v40  ;;  %v1960_v4 = vunpack.c.h.bf16 %v2092_v40 }
  0xdc   :  { %v1343_v51 = vadd.f32 %v1342_v46, %v1215_v45  ;;  %1085 = vperm.xlu1 %2103, %v1935_v42   ;;  %v1219_v5 = vmul.f32 %v1551_v59, %v766_v49  ;;  %v1996_v46 = vld [vmem:[%s2518_s0 + $0xe0] sm:$0xff]   ;;  %v1568_v49 = vunpack.c.h.bf16 %v1995_v34 }
  0xdd   :  { %v761_v55 = vpop.permute.xlu0 %760 }
  0xde   :  { %v1344_v58 = vadd.f32 %v1343_v51, %v1216_v52  ;;  %1080 = vperm.xlu0 %2097, %v1932_v48   ;;  %v1218_v0 = vmul.f32 %v1548_v53, %v761_v55  ;;  %v2093_v52 = vld [vmem:[%s2516_s1 + $0x1f0] sm:$0xff]   ;;  %v1571_v55 = vunpack.c.l.bf16 %v1996_v46 }
  0xdf   :  { %v776_v61 = vpop.permute.xlu1 %775  ;;  %v1963_v62 = vunpack.c.l.bf16 %v2093_v52 }
  0xe0   :  { %v1345_v63 = vadd.f32 %v1344_v58, %v1217_v57  ;;  %1095 = vperm.xlu1 %2103, %v1939_v54   ;;  %v1221_v17 = vmul.f32 %v1555_v7, %v776_v61  ;;  %v1997_v58 = vld [vmem:[%s2518_s0 + $0xe8] sm:$0xff]   ;;  %v1572_v61 = vunpack.c.h.bf16 %v1996_v46 }
  0xe1   :  { %v771_v3 = vpop.permute.xlu0 %770 }
  0xe2   :  { %v1346_v6 = vadd.f32 %v1345_v63, %v1218_v0  ;;  %1090 = vperm.xlu0 %2097, %v1936_v60   ;;  %v1220_v12 = vmul.f32 %v1552_v1, %v771_v3  ;;  %v2094_v0 = vld [vmem:[%s2516_s1 + $0x1f8] sm:$0xff]   ;;  %v1575_v3 = vunpack.c.l.bf16 %v1997_v58 }
  0xe3   :  { %v786_v9 = vpop.permute.xlu1 %785  ;;  %v1967_v10 = vunpack.c.l.bf16 %v2094_v0 }
  0xe4   :  { %v1347_v11 = vadd.f32 %v1346_v6, %v1219_v5  ;;  %1105 = vperm.xlu1 %2103, %v1943_v2   ;;  %v1223_v29 = vmul.f32 %v1559_v19, %v786_v9  ;;  %v1998_v6 = vld [vmem:[%s2518_s0 + $0xf0] sm:$0xff]   ;;  %v1576_v9 = vunpack.c.h.bf16 %v1997_v58 }
  0xe5   :  { %v781_v15 = vpop.permute.xlu0 %780 }
  0xe6   :  { %v1348_v18 = vadd.f32 %v1347_v11, %v1220_v12  ;;  %1100 = vperm.xlu0 %2097, %v1940_v8   ;;  %v1222_v24 = vmul.f32 %v1556_v13, %v781_v15  ;;  %v1964_v15 = vunpack.c.h.bf16 %v2093_v52 }
  0xe7   :  { %v796_v21 = vpop.permute.xlu1 %795 }
  0xe8   :  { %v1349_v23 = vadd.f32 %v1348_v18, %v1221_v17  ;;  %1115 = vperm.xlu1 %2103, %v1947_v14   ;;  %v1225_v41 = vmul.f32 %v1563_v31, %v796_v21  ;;  %v1579_v14 = vunpack.c.l.bf16 %v1998_v6  ;;  %v1999_v17 = vld [vmem:[%s2518_s0 + $0xf8] sm:$0xff]  }
  0xe9   :  { %v791_v27 = vpop.permute.xlu0 %790  ;;  %v1584_v31 = vunpack.c.h.bf16 %v1999_v17 }
  0xea   :  { %v1350_v30 = vadd.f32 %v1349_v23, %v1222_v24  ;;  %1110 = vperm.xlu0 %2097, %v1944_v20   ;;  %v1224_v36 = vmul.f32 %v1560_v25, %v791_v27  ;;  %v1580_v20 = vunpack.c.h.bf16 %v1998_v6  ;;  %v1583_v25 = vunpack.c.l.bf16 %v1999_v17 }
  0xeb   :  { %v806_v33 = vpop.permute.xlu1 %805 }
  0xec   :  { %v1351_v35 = vadd.f32 %v1350_v30, %v1223_v29  ;;  %1125 = vperm.xlu1 %2103, %v1951_v26   ;;  %v1227_v53 = vmul.f32 %v1567_v43, %v806_v33  ;;  %v1968_v26 = vunpack.c.h.bf16 %v2094_v0 }
  0xed   :  { %v801_v39 = vpop.permute.xlu0 %800 }
  0xee   :  { %v1352_v42 = vadd.f32 %v1351_v35, %v1224_v36  ;;  %1120 = vperm.xlu0 %2097, %v1948_v32   ;;  %v1226_v48 = vmul.f32 %v1564_v37, %v801_v39  ;;  %v1587_v35 = vunpack.c.l.bf16 %v2000_v28  ;;  %v2001_v37 = vld [vmem:[%s2518_s0 + $0x108] sm:$0xff]  }
  0xef   :  { %v816_v45 = vpop.permute.xlu1 %815 }
  0xf0   :  { %v1353_v47 = vadd.f32 %v1352_v42, %v1225_v41  ;;  %1135 = vperm.xlu1 %2103, %v1955_v38   ;;  %v1229_v1 = vmul.f32 %v1571_v55, %v816_v45  ;;  %v2105_v38 = vmov 0.0   ;;  %v1588_v41 = vunpack.c.h.bf16 %v2000_v28  ;;  %v2007_v28 = vld [vmem:[%s2518_s0 + $0x138] sm:$0xff]  }
  0xf1   :  { %v811_v51 = vpop.permute.xlu0 %810  ;;  %20 = vst [vmem:[#allocation2] sm:$0x1] %v2105_v38  ;;  %v1591_v45 = vunpack.c.l.bf16 %v2001_v37 }
  0xf2   :  { %v1354_v54 = vadd.f32 %v1353_v47, %v1226_v48  ;;  %1130 = vperm.xlu0 %2097, %v1952_v44   ;;  %v1228_v60 = vmul.f32 %v1568_v49, %v811_v51  ;;  %v2002_v47 = vld [vmem:[%s2518_s0 + $0x110] sm:$0xff]  }
  0xf3   :  { %v826_v57 = vpop.permute.xlu1 %825 }
  0xf4   :  { %v1355_v59 = vadd.f32 %v1354_v54, %v1227_v53  ;;  %1145 = vperm.xlu1 %2103, %v1959_v50   ;;  %v1231_v12 = vmul.f32 %v1575_v3, %v826_v57  ;;  %v1592_v50 = vunpack.c.h.bf16 %v2001_v37  ;;  %v1595_v54 = vunpack.c.l.bf16 %v2002_v47  ;;  %v2008_v37 = vld [vmem:[%s2518_s0 + $0x140] sm:$0xff]  }
  0xf5   :  { %v821_v63 = vpop.permute.xlu0 %820 }
  0xf6   :  { %v1356_v2 = vadd.f32 %v1355_v59, %v1228_v60  ;;  %1140 = vperm.xlu0 %2097, %v1956_v56   ;;  %v1230_v8 = vmul.f32 %v1572_v61, %v821_v63  ;;  %v2003_v56 = vld [vmem:[%s2518_s0 + $0x118] sm:$0xff]   ;;  %v1596_v59 = vunpack.c.h.bf16 %v2002_v47 }
  0xf7   :  { %v836_v5 = vpop.permute.xlu1 %835  ;;  %v1599_v63 = vunpack.c.l.bf16 %v2003_v56 }
  0xf8   :  { %v1357_v7 = vadd.f32 %v1356_v2, %v1229_v1  ;;  %1155 = vperm.xlu1 %2103, %v1963_v62   ;;  %v1233_v23 = vmul.f32 %v1579_v14, %v836_v5  ;;  %v2004_v1 = vld [vmem:[%s2518_s0 + $0x120] sm:$0xff]  }
  0xf9   :  { %v831_v11 = vpop.permute.xlu0 %830 }
  0xfa   :  { %v1358_v13 = vadd.f32 %v1357_v7, %v1230_v8  ;;  %1150 = vperm.xlu0 %2097, %v1960_v4   ;;  %v1232_v19 = vmul.f32 %v1576_v9, %v831_v11  ;;  %v1600_v4 = vunpack.c.h.bf16 %v2003_v56  ;;  %v1603_v8 = vunpack.c.l.bf16 %v2004_v1 }
  0xfb   :  { %v846_v16 = vpop.permute.xlu1 %845 }
  0xfc   :  { %v1359_v18 = vadd.f32 %v1358_v13, %v1231_v12  ;;  %1165 = vperm.xlu1 %2103, %v1967_v10   ;;  %v1235_v33 = vmul.f32 %v1583_v25, %v846_v16  ;;  %v2005_v10 = vld [vmem:[%s2518_s0 + $0x128] sm:$0xff]   ;;  %v1604_v13 = vunpack.c.h.bf16 %v2004_v1 }
  0xfd   :  { %v841_v21 = vpop.permute.xlu0 %840  ;;  %v1607_v17 = vunpack.c.l.bf16 %v2005_v10 }
  0xfe   :  { %v1360_v24 = vadd.f32 %v1359_v18, %v1232_v19  ;;  %1160 = vperm.xlu0 %2097, %v1964_v15   ;;  %v1234_v30 = vmul.f32 %v1580_v20, %v841_v21  ;;  %v2006_v19 = vld [vmem:[%s2518_s0 + $0x130] sm:$0xff]  }
  0xff   :  { %v856_v27 = vpop.permute.xlu1 %855 }
 0x100   :  { %v1361_v29 = vadd.f32 %v1360_v24, %v1233_v23  ;;  %1444 = vperm.xlu1 %2103, %v1441_v22   ;;  %v1237_v43 = vmul.f32 %v1587_v35, %v856_v27  ;;  %v1608_v22 = vunpack.c.h.bf16 %v2005_v10  ;;  %v1615_v35 = vunpack.c.l.bf16 %v2007_v28 }
 0x101   :  { %v851_v32 = vpop.permute.xlu0 %850 }
 0x102   :  { %v1362_v34 = vadd.f32 %v1361_v29, %v1234_v30  ;;  %1170 = vperm.xlu0 %2097, %v1968_v26   ;;  %v1236_v40 = vmul.f32 %v1584_v31, %v851_v32  ;;  %v1611_v26 = vunpack.c.l.bf16 %v2006_v19  ;;  %v1612_v31 = vunpack.c.h.bf16 %v2006_v19 }
 0x103   :  { %v866_v36 = vpop.permute.xlu1 %865 }
 0x104   :  { %v1363_v39 = vadd.f32 %v1362_v34, %v1235_v33  ;;  %v1239_v52 = vmul.f32 %v1591_v45, %v866_v36 }
 0x105   :  { %v861_v42 = vpop.permute.xlu0 %860 }
 0x106   :  { %v1364_v44 = vadd.f32 %v1363_v39, %v1236_v40  ;;  %v1238_v49 = vmul.f32 %v1588_v41, %v861_v42  ;;  %v1616_v40 = vunpack.c.h.bf16 %v2007_v28 }
 0x107   :  { %v876_v46 = vpop.permute.xlu1 %875 }
 0x108   :  { %v1365_v48 = vadd.f32 %v1364_v44, %v1237_v43  ;;  %v1241_v61 = vmul.f32 %v1595_v54, %v876_v46  ;;  %v1619_v44 = vunpack.c.l.bf16 %v2008_v37  ;;  %v2009_v46 = vld [vmem:[%s2518_s0 + $0x148] sm:$0xff]  }
 0x109   :  { %v871_v51 = vpop.permute.xlu0 %870 }
 0x10a   :  { %v1366_v53 = vadd.f32 %v1365_v48, %v1238_v49  ;;  %v1240_v58 = vmul.f32 %v1592_v50, %v871_v51  ;;  %v1620_v49 = vunpack.c.h.bf16 %v2008_v37 }
 0x10b   :  { %v886_v55 = vpop.permute.xlu1 %885 }
 0x10c   :  { %v1367_v57 = vadd.f32 %v1366_v53, %v1239_v52  ;;  %v1243_v6 = vmul.f32 %v1599_v63, %v886_v55  ;;  %v1623_v53 = vunpack.c.l.bf16 %v2009_v46  ;;  %v2010_v55 = vld [vmem:[%s2518_s0 + $0x150] sm:$0xff]  }
 0x10d   :  { %v881_v60 = vpop.permute.xlu0 %880 }
 0x10e   :  { %v1368_v62 = vadd.f32 %v1367_v57, %v1240_v58  ;;  %v1242_v2 = vmul.f32 %v1596_v59, %v881_v60  ;;  %v1624_v58 = vunpack.c.h.bf16 %v2009_v46 }
 0x10f   :  { %v896_v0 = vpop.permute.xlu1 %895 }
 0x110   :  { %v1369_v3 = vadd.f32 %v1368_v62, %v1241_v61  ;;  %v1245_v15 = vmul.f32 %v1603_v8, %v896_v0  ;;  %v1627_v62 = vunpack.c.l.bf16 %v2010_v55  ;;  %v2011_v0 = vld [vmem:[%s2518_s0 + $0x158] sm:$0xff]  }
 0x111   :  { %v891_v5 = vpop.permute.xlu0 %890 }
 0x112   :  { %v1370_v7 = vadd.f32 %v1369_v3, %v1242_v2  ;;  %v1244_v11 = vmul.f32 %v1600_v4, %v891_v5  ;;  %v1628_v3 = vunpack.c.h.bf16 %v2010_v55 }
 0x113   :  { %v906_v9 = vpop.permute.xlu1 %905 }
 0x114   :  { %v1371_v12 = vadd.f32 %v1370_v7, %v1243_v6  ;;  %v1247_v24 = vmul.f32 %v1607_v17, %v906_v9  ;;  %v1631_v7 = vunpack.c.l.bf16 %v2011_v0  ;;  %v2012_v9 = vld [vmem:[%s2518_s0 + $0x160] sm:$0xff]  }
 0x115   :  { %v901_v14 = vpop.permute.xlu0 %900 }
 0x116   :  { %v1372_v16 = vadd.f32 %v1371_v12, %v1244_v11  ;;  %v1246_v20 = vmul.f32 %v1604_v13, %v901_v14  ;;  %v1632_v12 = vunpack.c.h.bf16 %v2011_v0 }
 0x117   :  { %v916_v18 = vpop.permute.xlu1 %915 }
 0x118   :  { %v1373_v21 = vadd.f32 %v1372_v16, %v1245_v15  ;;  %v1249_v33 = vmul.f32 %v1611_v26, %v916_v18  ;;  %v1635_v16 = vunpack.c.l.bf16 %v2012_v9  ;;  %v2013_v18 = vld [vmem:[%s2518_s0 + $0x168] sm:$0xff]  }
 0x119   :  { %v911_v23 = vpop.permute.xlu0 %910 }
 0x11a   :  { %v1374_v25 = vadd.f32 %v1373_v21, %v1246_v20  ;;  %v1248_v29 = vmul.f32 %v1608_v22, %v911_v23  ;;  %v1636_v21 = vunpack.c.h.bf16 %v2012_v9 }
 0x11b   :  { %v926_v27 = vpop.permute.xlu1 %925 }
 0x11c   :  { %v1375_v30 = vadd.f32 %v1374_v25, %v1247_v24  ;;  %v1251_v42 = vmul.f32 %v1615_v35, %v926_v27  ;;  %v1639_v25 = vunpack.c.l.bf16 %v2013_v18  ;;  %v2014_v27 = vld [vmem:[%s2518_s0 + $0x170] sm:$0xff]  }
 0x11d   :  { %v921_v32 = vpop.permute.xlu0 %920 }
 0x11e   :  { %v1376_v34 = vadd.f32 %v1375_v30, %v1248_v29  ;;  %v1250_v38 = vmul.f32 %v1612_v31, %v921_v32  ;;  %v1640_v30 = vunpack.c.h.bf16 %v2013_v18 }
 0x11f   :  { %v936_v36 = vpop.permute.xlu1 %935 }
 0x120   :  { %v1377_v39 = vadd.f32 %v1376_v34, %v1249_v33  ;;  %v1253_v51 = vmul.f32 %v1619_v44, %v936_v36  ;;  %v1643_v34 = vunpack.c.l.bf16 %v2014_v27  ;;  %v2015_v36 = vld [vmem:[%s2518_s0 + $0x178] sm:$0xff]  }
 0x121   :  { %v931_v41 = vpop.permute.xlu0 %930 }
 0x122   :  { %v1378_v43 = vadd.f32 %v1377_v39, %v1250_v38  ;;  %v1252_v47 = vmul.f32 %v1616_v40, %v931_v41  ;;  %v1644_v39 = vunpack.c.h.bf16 %v2014_v27 }
 0x123   :  { %v946_v45 = vpop.permute.xlu1 %945 }
 0x124   :  { %v1379_v48 = vadd.f32 %v1378_v43, %v1251_v42  ;;  %v1255_v60 = vmul.f32 %v1623_v53, %v946_v45  ;;  %v1647_v43 = vunpack.c.l.bf16 %v2015_v36  ;;  %v2016_v45 = vld [vmem:[%s2518_s0 + $0x180] sm:$0xff]  }
 0x125   :  { %v941_v50 = vpop.permute.xlu0 %940 }
 0x126   :  { %v1380_v52 = vadd.f32 %v1379_v48, %v1252_v47  ;;  %v1254_v56 = vmul.f32 %v1620_v49, %v941_v50  ;;  %v1648_v48 = vunpack.c.h.bf16 %v2015_v36 }
 0x127   :  { %v956_v54 = vpop.permute.xlu1 %955 }
 0x128   :  { %v1381_v57 = vadd.f32 %v1380_v52, %v1253_v51  ;;  %v1257_v5 = vmul.f32 %v1627_v62, %v956_v54  ;;  %v1651_v52 = vunpack.c.l.bf16 %v2016_v45  ;;  %v2017_v54 = vld [vmem:[%s2518_s0 + $0x188] sm:$0xff]  }
 0x129   :  { %v951_v59 = vpop.permute.xlu0 %950 }
 0x12a   :  { %v1382_v61 = vadd.f32 %v1381_v57, %v1254_v56  ;;  %v1256_v1 = vmul.f32 %v1624_v58, %v951_v59  ;;  %v1652_v57 = vunpack.c.h.bf16 %v2016_v45 }
 0x12b   :  { %v966_v63 = vpop.permute.xlu1 %965 }
 0x12c   :  { %v1383_v2 = vadd.f32 %v1382_v61, %v1255_v60  ;;  %v1259_v14 = vmul.f32 %v1631_v7, %v966_v63  ;;  %v1655_v61 = vunpack.c.l.bf16 %v2017_v54  ;;  %v2018_v63 = vld [vmem:[%s2518_s0 + $0x190] sm:$0xff]  }
 0x12d   :  { %v961_v4 = vpop.permute.xlu0 %960 }
 0x12e   :  { %v1384_v6 = vadd.f32 %v1383_v2, %v1256_v1  ;;  %v1258_v10 = vmul.f32 %v1628_v3, %v961_v4  ;;  %v1656_v2 = vunpack.c.h.bf16 %v2017_v54 }
 0x12f   :  { %v976_v8 = vpop.permute.xlu1 %975 }
 0x130   :  { %v1385_v11 = vadd.f32 %v1384_v6, %v1257_v5  ;;  %v1261_v23 = vmul.f32 %v1635_v16, %v976_v8  ;;  %v1659_v6 = vunpack.c.l.bf16 %v2018_v63  ;;  %v2019_v8 = vld [vmem:[%s2518_s0 + $0x198] sm:$0xff]  }
 0x131   :  { %v971_v13 = vpop.permute.xlu0 %970 }
 0x132   :  { %v1386_v15 = vadd.f32 %v1385_v11, %v1258_v10  ;;  %v1260_v19 = vmul.f32 %v1632_v12, %v971_v13  ;;  %v1660_v11 = vunpack.c.h.bf16 %v2018_v63 }
 0x133   :  { %v986_v17 = vpop.permute.xlu1 %985 }
 0x134   :  { %v1387_v20 = vadd.f32 %v1386_v15, %v1259_v14  ;;  %v1263_v32 = vmul.f32 %v1639_v25, %v986_v17  ;;  %v1663_v15 = vunpack.c.l.bf16 %v2019_v8  ;;  %v2020_v17 = vld [vmem:[%s2518_s0 + $0x1a0] sm:$0xff]  }
 0x135   :  { %v981_v22 = vpop.permute.xlu0 %980 }
 0x136   :  { %v1388_v24 = vadd.f32 %v1387_v20, %v1260_v19  ;;  %v1262_v28 = vmul.f32 %v1636_v21, %v981_v22  ;;  %v1664_v20 = vunpack.c.h.bf16 %v2019_v8 }
 0x137   :  { %v996_v26 = vpop.permute.xlu1 %995 }
 0x138   :  { %v1389_v29 = vadd.f32 %v1388_v24, %v1261_v23  ;;  %v1265_v41 = vmul.f32 %v1643_v34, %v996_v26  ;;  %v1667_v24 = vunpack.c.l.bf16 %v2020_v17  ;;  %v2021_v26 = vld [vmem:[%s2518_s0 + $0x1a8] sm:$0xff]  }
 0x139   :  { %v991_v31 = vpop.permute.xlu0 %990 }
 0x13a   :  { %v1390_v33 = vadd.f32 %v1389_v29, %v1262_v28  ;;  %v1264_v37 = vmul.f32 %v1640_v30, %v991_v31  ;;  %v1668_v29 = vunpack.c.h.bf16 %v2020_v17 }
 0x13b   :  { %v1006_v35 = vpop.permute.xlu1 %1005 }
 0x13c   :  { %v1391_v38 = vadd.f32 %v1390_v33, %v1263_v32  ;;  %v1267_v50 = vmul.f32 %v1647_v43, %v1006_v35  ;;  %v1671_v33 = vunpack.c.l.bf16 %v2021_v26  ;;  %v2022_v35 = vld [vmem:[%s2518_s0 + $0x1b0] sm:$0xff]  }
 0x13d   :  { %v1001_v40 = vpop.permute.xlu0 %1000 }
 0x13e   :  { %v1392_v42 = vadd.f32 %v1391_v38, %v1264_v37  ;;  %v1266_v46 = vmul.f32 %v1644_v39, %v1001_v40  ;;  %v1672_v38 = vunpack.c.h.bf16 %v2021_v26 }
 0x13f   :  { %v1016_v44 = vpop.permute.xlu1 %1015 }
 0x140   :  { %v1393_v47 = vadd.f32 %v1392_v42, %v1265_v41  ;;  %v1269_v59 = vmul.f32 %v1651_v52, %v1016_v44  ;;  %v1675_v42 = vunpack.c.l.bf16 %v2022_v35  ;;  %v2023_v44 = vld [vmem:[%s2518_s0 + $0x1b8] sm:$0xff]  }
 0x141   :  { %v1011_v49 = vpop.permute.xlu0 %1010 }
 0x142   :  { %v1394_v51 = vadd.f32 %v1393_v47, %v1266_v46  ;;  %v1268_v55 = vmul.f32 %v1648_v48, %v1011_v49  ;;  %v1676_v47 = vunpack.c.h.bf16 %v2022_v35 }
 0x143   :  { %v1026_v53 = vpop.permute.xlu1 %1025 }
 0x144   :  { %v1395_v56 = vadd.f32 %v1394_v51, %v1267_v50  ;;  %v1271_v4 = vmul.f32 %v1655_v61, %v1026_v53  ;;  %v1679_v51 = vunpack.c.l.bf16 %v2023_v44  ;;  %v2024_v53 = vld [vmem:[%s2518_s0 + $0x1c0] sm:$0xff]  }
 0x145   :  { %v1021_v58 = vpop.permute.xlu0 %1020 }
 0x146   :  { %v1396_v60 = vadd.f32 %v1395_v56, %v1268_v55  ;;  %v1270_v0 = vmul.f32 %v1652_v57, %v1021_v58  ;;  %v1680_v56 = vunpack.c.h.bf16 %v2023_v44 }
 0x147   :  { %v1036_v62 = vpop.permute.xlu1 %1035 }
 0x148   :  { %v1397_v1 = vadd.f32 %v1396_v60, %v1269_v59  ;;  %v1273_v13 = vmul.f32 %v1659_v6, %v1036_v62  ;;  %v1683_v60 = vunpack.c.l.bf16 %v2024_v53  ;;  %v2025_v62 = vld [vmem:[%s2518_s0 + $0x1c8] sm:$0xff]  }
 0x149   :  { %v1031_v3 = vpop.permute.xlu0 %1030 }
 0x14a   :  { %v1398_v5 = vadd.f32 %v1397_v1, %v1270_v0  ;;  %v1272_v9 = vmul.f32 %v1656_v2, %v1031_v3  ;;  %v1684_v1 = vunpack.c.h.bf16 %v2024_v53 }
 0x14b   :  { %v1046_v7 = vpop.permute.xlu1 %1045 }
 0x14c   :  { %v1399_v10 = vadd.f32 %v1398_v5, %v1271_v4  ;;  %v1275_v22 = vmul.f32 %v1663_v15, %v1046_v7  ;;  %v1687_v5 = vunpack.c.l.bf16 %v2025_v62  ;;  %v2026_v7 = vld [vmem:[%s2518_s0 + $0x1d0] sm:$0xff]  }
 0x14d   :  { %v1041_v12 = vpop.permute.xlu0 %1040 }
 0x14e   :  { %v1400_v14 = vadd.f32 %v1399_v10, %v1272_v9  ;;  %v1274_v18 = vmul.f32 %v1660_v11, %v1041_v12  ;;  %v1688_v10 = vunpack.c.h.bf16 %v2025_v62 }
 0x14f   :  { %v1056_v16 = vpop.permute.xlu1 %1055 }
 0x150   :  { %v1401_v19 = vadd.f32 %v1400_v14, %v1273_v13  ;;  %v1277_v31 = vmul.f32 %v1667_v24, %v1056_v16  ;;  %v1691_v14 = vunpack.c.l.bf16 %v2026_v7  ;;  %v2027_v16 = vld [vmem:[%s2518_s0 + $0x1d8] sm:$0xff]  }
 0x151   :  { %v1051_v21 = vpop.permute.xlu0 %1050 }
 0x152   :  { %v1402_v23 = vadd.f32 %v1401_v19, %v1274_v18  ;;  %v1276_v27 = vmul.f32 %v1664_v20, %v1051_v21  ;;  %v1692_v19 = vunpack.c.h.bf16 %v2026_v7 }
 0x153   :  { %v1066_v25 = vpop.permute.xlu1 %1065 }
 0x154   :  { %v1403_v28 = vadd.f32 %v1402_v23, %v1275_v22  ;;  %v1279_v40 = vmul.f32 %v1671_v33, %v1066_v25  ;;  %v1695_v23 = vunpack.c.l.bf16 %v2027_v16  ;;  %v2028_v25 = vld [vmem:[%s2518_s0 + $0x1e0] sm:$0xff]  }
 0x155   :  { %v1061_v30 = vpop.permute.xlu0 %1060 }
 0x156   :  { %v1404_v32 = vadd.f32 %v1403_v28, %v1276_v27  ;;  %v1278_v36 = vmul.f32 %v1668_v29, %v1061_v30  ;;  %v1696_v28 = vunpack.c.h.bf16 %v2027_v16 }
 0x157   :  { %v1076_v34 = vpop.permute.xlu1 %1075 }
 0x158   :  { %v1405_v37 = vadd.f32 %v1404_v32, %v1277_v31  ;;  %v1281_v49 = vmul.f32 %v1675_v42, %v1076_v34  ;;  %v1699_v32 = vunpack.c.l.bf16 %v2028_v25  ;;  %v2029_v34 = vld [vmem:[%s2518_s0 + $0x1e8] sm:$0xff]   ;;  %v2030_v42 = vld [vmem:[%s2518_s0 + $0x1f0] sm:$0xff]  }
 0x159   :  { %v1071_v39 = vpop.permute.xlu0 %1070 }
 0x15a   :  { %v1406_v41 = vadd.f32 %v1405_v37, %v1278_v36  ;;  %v1280_v45 = vmul.f32 %v1672_v38, %v1071_v39  ;;  %v1700_v37 = vunpack.c.h.bf16 %v2028_v25 }
 0x15b   :  { %v1086_v43 = vpop.permute.xlu1 %1085 }
 0x15c   :  { %v1407_v46 = vadd.f32 %v1406_v41, %v1279_v40  ;;  %v1283_v58 = vmul.f32 %v1679_v51, %v1086_v43  ;;  %v1703_v41 = vunpack.c.l.bf16 %v2029_v34  ;;  %v2031_v51 = vld [vmem:[%s2518_s0 + $0x1f8] sm:$0xff]  }
 0x15d   :  { %v1081_v48 = vpop.permute.xlu0 %1080  ;;  %v1712_v62 = vunpack.c.h.bf16 %v2031_v51 }
 0x15e   :  { %v1408_v50 = vadd.f32 %v1407_v46, %v1280_v45  ;;  %v1282_v54 = vmul.f32 %v1676_v47, %v1081_v48  ;;  %v1704_v45 = vunpack.c.h.bf16 %v2029_v34 }
 0x15f   :  { %v1096_v52 = vpop.permute.xlu1 %1095 }
 0x160   :  { %v1409_v55 = vadd.f32 %v1408_v50, %v1281_v49  ;;  %v1285_v3 = vmul.f32 %v1683_v60, %v1096_v52  ;;  %v1707_v50 = vunpack.c.l.bf16 %v2030_v42 }
 0x161   :  { %v1091_v57 = vpop.permute.xlu0 %1090 }
 0x162   :  { %v1410_v59 = vadd.f32 %v1409_v55, %v1282_v54  ;;  %v1284_v63 = vmul.f32 %v1680_v56, %v1091_v57  ;;  %v1708_v54 = vunpack.c.h.bf16 %v2030_v42 }
 0x163   :  { %v1106_v61 = vpop.permute.xlu1 %1105 }
 0x164   :  { %v1411_v0 = vadd.f32 %v1410_v59, %v1283_v58  ;;  %v1287_v12 = vmul.f32 %v1687_v5, %v1106_v61  ;;  %v1711_v58 = vunpack.c.l.bf16 %v2031_v51 }
 0x165   :  { %v1101_v2 = vpop.permute.xlu0 %1100 }
 0x166   :  { %v1412_v4 = vadd.f32 %v1411_v0, %v1284_v63  ;;  %v1286_v8 = vmul.f32 %v1684_v1, %v1101_v2 }
 0x167   :  { %v1116_v6 = vpop.permute.xlu1 %1115 }
 0x168   :  { %v1413_v9 = vadd.f32 %v1412_v4, %v1285_v3  ;;  %v1289_v21 = vmul.f32 %v1691_v14, %v1116_v6 }
 0x169   :  { %v1111_v11 = vpop.permute.xlu0 %1110 }
 0x16a   :  { %v1414_v13 = vadd.f32 %v1413_v9, %v1286_v8  ;;  %v1288_v17 = vmul.f32 %v1688_v10, %v1111_v11  ;;  %v1447_v9 = vlaneseq  ;;  %v1301_v11 = vld [vmem:[#allocation2] sm:$0x1] }
 0x16b   :  { %v1126_v15 = vpop.permute.xlu1 %1125 }
 0x16c   :  { %v1415_v18 = vadd.f32 %v1414_v13, %v1287_v12  ;;  %v1291_v30 = vmul.f32 %v1695_v23, %v1126_v15  ;;  %v1448_v13 = vshrl.u32 %v1447_v9, 7 }
 0x16d   :  { %v1121_v20 = vpop.permute.xlu0 %1120 }
 0x16e   :  { %v1416_v22 = vadd.f32 %v1415_v18, %v1288_v17  ;;  %v1290_v26 = vmul.f32 %v1692_v19, %v1121_v20  ;;  %v1449_v15 = vsub.s32 0, %v1448_v13 }
 0x16f   :  { %v1136_v24 = vpop.permute.xlu1 %1135 }
 0x170   :  { %v1417_v27 = vadd.f32 %v1416_v22, %v1289_v21  ;;  %v1293_v39 = vmul.f32 %v1699_v32, %v1136_v24 }
 0x171   :  { %v1131_v29 = vpop.permute.xlu0 %1130 }
 0x172   :  { %v1418_v31 = vadd.f32 %v1417_v27, %v1290_v26  ;;  %v1292_v35 = vmul.f32 %v1696_v28, %v1131_v29 }
 0x173   :  { %v1146_v33 = vpop.permute.xlu1 %1145 }
 0x174   :  { %v1419_v36 = vadd.f32 %v1418_v31, %v1291_v30  ;;  %v1295_v48 = vmul.f32 %v1703_v41, %v1146_v33 }
 0x175   :  { %v1141_v38 = vpop.permute.xlu0 %1140 }
 0x176   :  { %v1420_v40 = vadd.f32 %v1419_v36, %v1292_v35  ;;  %v1294_v43 = vmul.f32 %v1700_v37, %v1141_v38 }
 0x177   :  { %v1156_v46 = vpop.permute.xlu1 %1155 }
 0x178   :  { %v1421_v44 = vadd.f32 %v1420_v40, %v1293_v39  ;;  %v1297_v56 = vmul.f32 %v1707_v50, %v1156_v46 }
 0x179   :  { %v1151_v47 = vpop.permute.xlu0 %1150 }
 0x17a   :  { %v1422_v49 = vadd.f32 %v1421_v44, %v1294_v43  ;;  %v1296_v52 = vmul.f32 %v1704_v45, %v1151_v47 }
 0x17b   :  { %v1166_v59 = vpop.permute.xlu1 %1165 }
 0x17c   :  { %v1423_v53 = vadd.f32 %v1422_v49, %v1295_v48  ;;  %v1299_v0 = vmul.f32 %v1711_v58, %v1166_v59 }
 0x17d   :  { %v1161_v55 = vpop.permute.xlu0 %1160 }
 0x17e   :  { %v1424_v57 = vadd.f32 %v1423_v53, %v1296_v52  ;;  %v1298_v60 = vmul.f32 %v1708_v54, %v1161_v55 }
 0x17f   :  { %v1445_v16 = vpop.permute.xlu1 %1444 }
 0x180   :  { %v1425_v61 = vadd.f32 %v1424_v57, %v1297_v56  ;;  %v1450_v17 = vrot.slane %v1445_v16, %v1449_v15 }
 0x181   :  { %v1171_v63 = vpop.permute.xlu0 %1170 }
 0x182   :  { %v1426_v1 = vadd.f32 %v1425_v61, %v1298_v60  ;;  %v1300_v2 = vmul.f32 %v1712_v62, %v1171_v63 }
 0x184   :  { %v1427_v3 = vadd.f32 %v1426_v1, %v1299_v0 }
 0x186   :  { %v1428_v4 = vadd.f32 %v1427_v3, %v1300_v2 }
 0x188   :  { %v1429_v5 = vrot.slane %v1428_v4, 4 }
 0x18a   :  { %v1430_v6 = vadd.f32 %v1429_v5, %v1428_v4 }
 0x18c   :  { %v1431_v7 = vrot.slane %v1430_v6, 2 }
 0x18e   :  { %v1432_v8 = vadd.f32 %v1431_v7, %v1430_v6 }
 0x190   :  { %v1433_v10 = vrot.slane %v1432_v8, 1 }
 0x192   :  { %v1434_v12 = vadd.f32 %v1433_v10, %v1432_v8 }
 0x194   :  { %v1435_v14 = vadd.f32 %v1434_v12, %v1301_v11 }
 0x196   :  { %1436 = vst [vmem:[#allocation2] sm:$0x1] %v1435_v14 }
 0x19d   :  { %v1440_v18 = vld [vmem:[#allocation2] sm:$0x1] }
 0x19e   :  { %v1451_v19 = vadd.f32 %v1450_v17, %v1440_v18 }
 0x1a0   :  { %1452 = vst [vmem:[%s2519_s3] sm:$0x1] %v1451_v19 }

// kernel: multiscale_discriminator_forward.20
= control target key start
LH: loop header
LB: loop body
LE: loop exit
PB: predicated region body
PF: predicated region fallthrough
CT: control target
= control target key end

     0   :  { %v202_v1 = vmov 0   ;;  %vm70_vm0 = vcmask 392192   ;;  %s256_s0 = inlined_call_operand.vmem [shape: bf16[48,256], index: 0, kind: input, shape index: {}]   ;;  %s257_s2 = inlined_call_operand.vmem [shape: f32[16,1], index: 2, kind: input, shape index: {}]   ;;  %s258_s1 = inlined_call_operand.vmem [shape: bf16[16,48], index: 1, kind: input, shape index: {}]   ;;  %s259_s3 = inlined_call_operand.vmem [shape: bf16[16,256], index: 3, kind: output, shape index: {}]  }
   0x1   :  { %v192_v0 = vld [vmem:[%s256_s0 + $0x4] ss:$8 sps:$4 sm:$0xff]   ;;  %106 = vmatprep.mubr.bf16.mxu0 %v202_v1  ;;  %191 = vset.pattern.permute.xlu0 %v202_v1  ;;  %v194_v2 = vld [vmem:[%s256_s0] ss:$8 sps:$4 sm:$0xff]   ;;  %v195_v3 = vld [vmem:[%s256_s0 + $0x14] ss:$8 sps:$4 sm:$0xff]  }
   0x2   :  { %74 = vmatprep.subr.bf16.mxu0 %v192_v0  ;;  %v197_v4 = vld [vmem:[%s256_s0 + $0x10] ss:$8 sps:$4 sm:$0xff]   ;;  %v198_v5 = vld [vmem:[%s256_s0 + $0x24] ss:$8 sps:$4 sm:$0xff]   ;;  %v200_v7 = vld [vmem:[%s256_s0 + $0x20] ss:$8 sps:$4 sm:$0xff]  }
   0x3   :  { %75 = vmatpush1.bf16.msra.mxu0 %v194_v2  ;;  %v132_v6 = vld [vmem:[%s257_s2] sm:$0xff]  ;;  %v133_v8 = vld [vmem:[%s257_s2 + $0x8] sm:$0xff] }
   0x4   :  { %76 = vmatprep.subr.bf16.mxu0 %v195_v3  ;;  %136 = vperm.xlu0 %191, %v132_v6   ;;  %v201_v9 = vld [vmem:[%s258_s1] sm:$0xff]  }
   0x7   :  { %77 = vmatpush1.bf16.msra.mxu0 %v197_v4 }
   0x8   :  { %78 = vmatprep.subr.bf16.mxu0 %v198_v5  ;;  %141 = vperm.xlu0 %191, %v133_v8  }
   0xb   :  { %79 = vmatpush1.bf16.msra.mxu0 %v200_v7 }
   0xe   :  { %185 = vmatmul.mubr.msk.bf16.vlgmr.msra.gmra.mrb[0].mxu0 %vm70_vm0, %v201_v9 }
  0x83   :  { %v137_v10 = vpop.permute.xlu0 %136 }
  0x87   :  { %v142_v14 = vpop.permute.xlu0 %141 }
  0xe1   :  { %v108_v11 = vpop.f32.mrb[0].mxu0 }
  0xe2   :  { %v144_v12 = vadd.f32 %v137_v10, %v108_v11  ;;  %v110_v13 = vpop.f32.mrb[1].mxu0 }
  0xe3   :  { %v145_v15 = vadd.f32 %v137_v10, %v110_v13  ;;  %v112_v16 = vpop.f32.mrb[2].mxu0 }
  0xe4   :  { %vm148_vm1 = vcmp.gt.f32.partialorder %v144_v12, 0.0  ;;  %v152_v17 = vmul.f32 0.2, %v144_v12  ;;  %v146_v18 = vadd.f32 %v142_v14, %v112_v16  ;;  %v114_v19 = vpop.f32.mrb[3].mxu0 }
  0xe5   :  { %vm149_vm2 = vcmp.gt.f32.partialorder %v145_v15, 0.0  ;;  %v153_v20 = vmul.f32 0.2, %v145_v15  ;;  %v147_v21 = vadd.f32 %v142_v14, %v114_v19 }
  0xe6   :  { %v156_v22 = vsel %vm148_vm1, %v144_v12, %v152_v17  ;;  %vm150_vm3 = vcmp.gt.f32.partialorder %v146_v18, 0.0  ;;  %v154_v23 = vmul.f32 0.2, %v146_v18 }
  0xe7   :  { %v157_v24 = vsel %vm149_vm2, %v145_v15, %v153_v20  ;;  %vm151_vm4 = vcmp.gt.f32.partialorder %v147_v21, 0.0  ;;  %v155_v25 = vmul.f32 0.2, %v147_v21 }
  0xe8   :  { %v188_v26 = vpack.c.bf16 %v157_v24, %v156_v22  ;;  %v158_v27 = vsel %vm150_vm3, %v146_v18, %v154_v23 }
  0xe9   :  { %v159_v28 = vsel %vm151_vm4, %v147_v21, %v155_v25 }
  0xea   :  { %172 = vst [vmem:[%s259_s3] sm:$0xff] %v188_v26  ;;  %v189_v29 = vpack.c.bf16 %v159_v28, %v158_v27 }
  0xec   :  { %173 = vst [vmem:[%s259_s3 + $0x8] sm:$0xff] %v189_v29 }

// kernel: multiscale_discriminator_forward.21
= control target key start
LH: loop header
LB: loop body
LE: loop exit
PB: predicated region body
PF: predicated region fallthrough
CT: control target
= control target key end

     0   :  { %v239_v0 = vmov 0.0   ;;  %vm240_vm0 = vmmov 0   ;;  %v241_v2 = vmov 0   ;;  %s298_s0 = inlined_call_operand.vmem [shape: bf16[128,128], index: 0, kind: input, shape index: {}]   ;;  %s299_s2 = inlined_call_operand.vmem [shape: f32[16,1], index: 2, kind: input, shape index: {}]   ;;  %s300_s1 = inlined_call_operand.vmem [shape: bf16[16,128], index: 1, kind: input, shape index: {}]   ;;  %s301_s3 = inlined_call_operand.vmem [shape: bf16[16,128], index: 3, kind: output, shape index: {}]  }
   0x1   :  { %206 = vmatprep.subr.bf16.mxu0 %v239_v0  ;;  %v230_v1 = vld [vmem:[%s298_s0] sm:$0xff]   ;;  %222 = vmatprep.mubr.msk.bf16.mxu0 %vm240_vm0, %v239_v0  ;;  %v231_v3 = vld [vmem:[%s298_s0 + $0x8] sm:$0xff]   ;;  %v232_v4 = vld [vmem:[%s298_s0 + $0x10] sm:$0xff]  }
   0x2   :  { %229 = vset.pattern.permute.xlu0 %v241_v2  ;;  %207 = vmatpush3.bf16.msra.mxu0 %v230_v1  ;;  %v145_v5 = vld [vmem:[%s299_s2] sm:$0xff]  ;;  %v233_v6 = vld [vmem:[%s298_s0 + $0x18] sm:$0xff]   ;;  %v146_v7 = vld [vmem:[%s299_s2 + $0x8] sm:$0xff] }
   0x3   :  { %208 = vmatprep.subr.bf16.mxu0 %v239_v0  ;;  %149 = vperm.xlu0 %229, %v145_v5   ;;  %v234_v8 = vld [vmem:[%s298_s0 + $0x20] sm:$0xff]   ;;  %v235_v9 = vld [vmem:[%s298_s0 + $0x28] sm:$0xff]   ;;  %v236_v10 = vld [vmem:[%s298_s0 + $0x30] sm:$0xff]  }
   0x4   :  { %v237_v11 = vld [vmem:[%s298_s0 + $0x38] sm:$0xff]   ;;  %v238_v12 = vld [vmem:[%s300_s1] sm:$0xff]  }
   0x6   :  { %209 = vmatpush3.bf16.msra.mxu0 %v231_v3 }
   0x7   :  { %210 = vmatprep.subr.bf16.mxu0 %v239_v0  ;;  %154 = vperm.xlu0 %229, %v146_v7  }
   0xa   :  { %211 = vmatpush3.bf16.msra.mxu0 %v232_v4 }
   0xb   :  { %212 = vmatprep.subr.bf16.mxu0 %v239_v0 }
   0xe   :  { %213 = vmatpush3.bf16.msra.mxu0 %v233_v6 }
   0xf   :  { %214 = vmatprep.subr.bf16.mxu0 %v239_v0 }
  0x12   :  { %215 = vmatpush3.bf16.msra.mxu0 %v234_v8 }
  0x13   :  { %216 = vmatprep.subr.bf16.mxu0 %v239_v0 }
  0x16   :  { %217 = vmatpush3.bf16.msra.mxu0 %v235_v9 }
  0x17   :  { %218 = vmatprep.subr.bf16.mxu0 %v239_v0 }
  0x1a   :  { %219 = vmatpush3.bf16.msra.mxu0 %v236_v10 }
  0x1b   :  { %220 = vmatprep.subr.bf16.mxu0 %v239_v0 }
  0x1e   :  { %221 = vmatpush3.bf16.msra.mxu0 %v237_v11 }
  0x21   :  { %223 = vmatmul.mubr.bf16.vlgmr.msra.gmra.mrb[0].mxu0 %v238_v12 }
  0x82   :  { %v150_v13 = vpop.permute.xlu0 %149 }
  0x86   :  { %v155_v17 = vpop.permute.xlu0 %154 }
  0xf4   :  { %v129_v14 = vpop.f32.mrb[0].mxu0 }
  0xf5   :  { %v157_v15 = vadd.f32 %v150_v13, %v129_v14  ;;  %v224_v16 = vpop.f32.mrb[1].mxu0 }
  0xf6   :  { %v132_v18 = vpop.f32.mrb[2].mxu0 }
  0xf7   :  { %v161_v19 = vmul.f32 0.2, %v157_v15  ;;  %v158_v20 = vadd.f32 %v155_v17, %v132_v18  ;;  %v225_v21 = vpop.f32.mrb[3].mxu0  ;;  %vm159_vm1 = vcmp.gt.f32.partialorder %v157_v15, 0.0 }
  0xf9   :  { %vm160_vm2 = vcmp.gt.f32.partialorder %v158_v20, 0.0  ;;  %v162_v22 = vmul.f32 0.2, %v158_v20  ;;  %v163_v23 = vsel %vm159_vm1, %v157_v15, %v161_v19 }
  0xfb   :  { %v164_v24 = vsel %vm160_vm2, %v158_v20, %v162_v22 }
  0xfc   :  { %v195_v25 = vpack.c.bf16 %v164_v24, %v163_v23 }
  0xfe   :  { %196 = vst [vmem:[%s301_s3] sm:$0xff] %v195_v25  }

// kernel: multiscale_discriminator_forward.25
= control target key start
LH: loop header
LB: loop body
LE: loop exit
PB: predicated region body
PF: predicated region fallthrough
CT: control target
= control target key end

     0   :  { %v178_v0 = vmov 0.0   ;;  %vm179_vm0 = vmmov 0   ;;  %v180_v2 = vmov 0   ;;  %vm54_vm1 = vcmask 392192   ;;  %s222_s0 = inlined_call_operand.vmem [shape: bf16[48,128], index: 0, kind: input, shape index: {}]   ;;  %s223_s2 = inlined_call_operand.vmem [shape: f32[16,1], index: 2, kind: input, shape index: {}]   ;;  %s224_s1 = inlined_call_operand.vmem [shape: bf16[16,48], index: 1, kind: input, shape index: {}]   ;;  %s225_s3 = inlined_call_operand.vmem [shape: bf16[16,128], index: 3, kind: output, shape index: {}]  }
   0x1   :  { %160 = vmatprep.subr.bf16.mxu0 %v178_v0  ;;  %v174_v1 = vld [vmem:[%s222_s0] sm:$0xff]   ;;  %166 = vmatprep.mubr.msk.bf16.mxu0 %vm179_vm0, %v178_v0  ;;  %v175_v3 = vld [vmem:[%s222_s0 + $0x8] sm:$0xff]   ;;  %v176_v5 = vld [vmem:[%s222_s0 + $0x10] sm:$0xff]  }
   0x2   :  { %173 = vset.pattern.permute.xlu0 %v180_v2  ;;  %161 = vmatpush3.bf16.msra.mxu0 %v174_v1  ;;  %v108_v4 = vld [vmem:[%s223_s2] sm:$0xff]  ;;  %v109_v6 = vld [vmem:[%s223_s2 + $0x8] sm:$0xff] }
   0x3   :  { %162 = vmatprep.subr.bf16.mxu0 %v178_v0  ;;  %112 = vperm.xlu0 %173, %v108_v4   ;;  %v177_v7 = vld [vmem:[%s224_s1] sm:$0xff]  }
   0x6   :  { %163 = vmatpush3.bf16.msra.mxu0 %v175_v3 }
   0x7   :  { %164 = vmatprep.subr.bf16.mxu0 %v178_v0  ;;  %117 = vperm.xlu0 %173, %v109_v6  }
   0xa   :  { %165 = vmatpush3.bf16.msra.mxu0 %v176_v5 }
   0xd   :  { %167 = vmatmul.mubr.msk.bf16.vlgmr.msra.gmra.mrb[0].mxu0 %vm54_vm1, %v177_v7 }
  0x82   :  { %v113_v8 = vpop.permute.xlu0 %112 }
  0x86   :  { %v118_v12 = vpop.permute.xlu0 %117 }
  0xe0   :  { %v92_v9 = vpop.f32.mrb[0].mxu0 }
  0xe1   :  { %v120_v10 = vadd.f32 %v113_v8, %v92_v9  ;;  %v168_v11 = vpop.f32.mrb[1].mxu0 }
  0xe2   :  { %v95_v13 = vpop.f32.mrb[2].mxu0 }
  0xe3   :  { %v124_v14 = vmul.f32 0.2, %v120_v10  ;;  %v121_v15 = vadd.f32 %v118_v12, %v95_v13  ;;  %v169_v16 = vpop.f32.mrb[3].mxu0  ;;  %vm122_vm2 = vcmp.gt.f32.partialorder %v120_v10, 0.0 }
  0xe5   :  { %vm123_vm3 = vcmp.gt.f32.partialorder %v121_v15, 0.0  ;;  %v125_v17 = vmul.f32 0.2, %v121_v15  ;;  %v126_v18 = vsel %vm122_vm2, %v120_v10, %v124_v14 }
  0xe7   :  { %v127_v19 = vsel %vm123_vm3, %v121_v15, %v125_v17 }
  0xe8   :  { %v154_v20 = vpack.c.bf16 %v127_v19, %v126_v18 }
  0xea   :  { %155 = vst [vmem:[%s225_s3] sm:$0xff] %v154_v20  }

</bundles_post_ra>
